<compile_context>
chip_gen: v5e
topology: v5e:2x2
jax: 0.10.0
libtpu: 0.0.40
codegen_flags: <defaults>
</compile_context>

<pallas_src>
import jax
import jax.numpy as jnp
from jax.experimental import pallas as pl
from jax.experimental.pallas import tpu as pltpu


def _make_se_gate_kernel(multiply_in_f32):
    def _se_gate_kernel(xse_ref, w_ref, b_ref, ximg_ref, o_ref):
        # 1x1 conv on a 1x1 spatial input == matrix-vector product on the MXU.
        # w: [blk_c_out, C_in], xse: [C_in, 1]  ->  [blk_c_out, 1]  (f32 acc)
        w = w_ref[...].astype(jnp.float32)
        xse = xse_ref[...].astype(jnp.float32)
        s = jnp.dot(w, xse, preferred_element_type=jnp.float32)
        gate = jax.nn.sigmoid(s + b_ref[...].astype(jnp.float32))   # [blk, 1]

        if multiply_in_f32:
            # f32 activations, or bf16 activations on v5e (no bf16 VALU):
            # upcast in-vreg, multiply in f32, downcast on store.
            x = ximg_ref[...].astype(jnp.float32)                    # [blk, HW]
            o_ref[...] = (x * gate).astype(o_ref.dtype)
        else:
            # v6e / v7x bf16 path: keep the big tile in bf16, downcast the
            # tiny per-channel gate instead.
            o_ref[...] = ximg_ref[...] * gate.astype(o_ref.dtype)    # [blk, HW]

    return _se_gate_kernel


def _device_kind_lower():
    try:
        return jax.devices()[0].device_kind.lower()
    except Exception:
        return ""


def se_conv_sigmoid_mul(x159, x156, weight, bias):
    """x159: [1, C_in, 1, 1], x156: [1, C_out, H, W],
    weight: [C_out, C_in, 1, 1], bias: [C_out]."""
    n, c_in, _, _ = x159.shape
    _, c_out, h, w = x156.shape
    assert n == 1
    hw = h * w

    kind = _device_kind_lower()
    is_v5e = ("v5 lite" in kind) or ("v5e" in kind)
    is_v7x = ("v7" in kind) or ("tpu7" in kind)

    # Multiply the big tile in f32 only when required (f32 activations, or
    # bf16 activations on v5e which lacks a bf16 VALU).
    multiply_in_f32 = (x156.dtype == jnp.float32) or is_v5e

    # 2-block grid over C_out only on v7x (2 TensorCores / chip); one block
    # elsewhere to avoid per-step overhead on single-TC chips.
    nb = 2 if (is_v7x and c_out % 2 == 0 and (c_out // 2) % 8 == 0) else 1
    blk = c_out // nb

    # All of these are no-op reshapes (no transposes, no dtype converts).
    xse = x159.reshape(c_in, 1)                     # [C_in, 1]   native dtype
    wmat = weight.reshape(c_out, c_in)              # [C_out, C_in]
    b = bias.reshape(c_out, 1)                      # [C_out, 1]
    ximg = x156.reshape(c_out, hw)                  # [C_out, HW] native dtype

    act_bytes = ximg.dtype.itemsize
    cost = pl.CostEstimate(
        flops=2 * c_out * c_in + c_out * hw,
        transcendentals=c_out,
        bytes_accessed=(2 * c_out * hw * act_bytes
                        + c_out * c_in * wmat.dtype.itemsize
                        + c_out * b.dtype.itemsize
                        + c_in * xse.dtype.itemsize),
    )

    out = pl.pallas_call(
        _make_se_gate_kernel(multiply_in_f32),
        out_shape=jax.ShapeDtypeStruct((c_out, hw), ximg.dtype),
        grid=(nb,),
        in_specs=[
            pl.BlockSpec((c_in, 1), lambda i: (0, 0)),
            pl.BlockSpec((blk, c_in), lambda i: (i, 0)),
            pl.BlockSpec((blk, 1), lambda i: (i, 0)),
            pl.BlockSpec((blk, hw), lambda i: (i, 0)),
        ],
        out_specs=pl.BlockSpec((blk, hw), lambda i: (i, 0)),
        compiler_params=pltpu.CompilerParams(
            dimension_semantics=("parallel",)),
        cost_estimate=cost,
    )(xse, wmat, b, ximg)

    # Free reshape back to NCHW (no transpose).
    return out.reshape(1, c_out, h, w)


if __name__ == "__main__":
    key = jax.random.PRNGKey(0)
    k1, k2, k3, k4 = jax.random.split(key, 4)

    C_IN, C_OUT, H, W = 28, 672, 14, 14

    x159 = jax.random.normal(k1, (1, C_IN, 1, 1), dtype=jnp.float32)
    x156 = jax.random.normal(k2, (1, C_OUT, H, W), dtype=jnp.float32)

    # Deterministic Conv2d(28, 672, 1x1) parameter init.
    fan_in = C_IN  # 1x1 kernel
    bound = 1.0 / (fan_in ** 0.5)
    weight = jax.random.uniform(k3, (C_OUT, C_IN, 1, 1), jnp.float32, -bound, bound)
    bias = jax.random.uniform(k4, (C_OUT,), jnp.float32, -bound, bound)

    # Pure-JAX reference.
    gate_ref = jax.nn.sigmoid(
        jnp.einsum("oi,ni->no", weight.reshape(C_OUT, C_IN), x159.reshape(1, C_IN)) + bias
    ).reshape(1, C_OUT, 1, 1)
    ref = gate_ref * x156

    # --- f32 path (matches the original module's dtype) ---
    out = se_conv_sigmoid_mul(x159, x156, weight, bias)
    out = jax.block_until_ready(out)
    assert out.shape == (1, C_OUT, H, W)
    assert out.dtype == jnp.float32
    assert jnp.allclose(out, ref, atol=1e-5, rtol=1e-5)

    # --- bf16 activation path (serving dtype: half the HBM traffic) ---
    x156_bf16 = x156.astype(jnp.bfloat16)
    out_bf16 = se_conv_sigmoid_mul(x159, x156_bf16, weight, bias)
    out_bf16 = jax.block_until_ready(out_bf16)
    assert out_bf16.dtype == jnp.bfloat16
    assert jnp.allclose(out_bf16.astype(jnp.float32), ref, atol=3e-2, rtol=3e-2)

    # --- bf16 weights + bf16 activations (full serving path, in-kernel cast) ---
    out_full_bf16 = se_conv_sigmoid_mul(
        x159.astype(jnp.bfloat16), x156_bf16,
        weight.astype(jnp.bfloat16), bias.astype(jnp.bfloat16))
    out_full_bf16 = jax.block_until_ready(out_full_bf16)
    assert out_full_bf16.dtype == jnp.bfloat16
    assert jnp.allclose(out_full_bf16.astype(jnp.float32), ref, atol=5e-2, rtol=5e-2)

    print("KERNEL_OK")
</pallas_src>

<mosaic_0001>
module attributes {stable_mosaic.version = 11 : i64} {
  func.func @_se_gate_kernel(%arg0: i32, %arg1: memref<28x1xf32, #tpu.memory_space<vmem>>, %arg2: memref<672x28xf32, #tpu.memory_space<vmem>>, %arg3: memref<672x1xf32, #tpu.memory_space<vmem>>, %arg4: memref<672x196xf32, #tpu.memory_space<vmem>>, %arg5: memref<672x196xf32, #tpu.memory_space<vmem>>) attributes {dimension_semantics = [#tpu.dimension_semantics<parallel>], iteration_bounds = array<i64: 1>, scalar_prefetch = 0 : i64, scratch_operands = 0 : i64, tpu.core_type = #tpu.core_type<tc>, window_params = [{pipeline_mode = #tpu.pipeline_mode<synchronous>, transform_indices = @transform_0, window_bounds = array<i64: 28, 1>}, {transform_indices = @transform_1, window_bounds = array<i64: 672, 28>}, {transform_indices = @transform_2, window_bounds = array<i64: 672, 1>}, {transform_indices = @transform_3, window_bounds = array<i64: 672, 196>}, {transform_indices = @transform_4, window_bounds = array<i64: 672, 196>}]} {
    %c0 = arith.constant 0 : index
    %c0_0 = arith.constant 0 : index
    %0 = vector.load %arg2[%c0, %c0_0] : memref<672x28xf32, #tpu.memory_space<vmem>>, vector<672x28xf32>
    %c0_1 = arith.constant 0 : index
    %c0_2 = arith.constant 0 : index
    %1 = vector.load %arg1[%c0_1, %c0_2] : memref<28x1xf32, #tpu.memory_space<vmem>>, vector<28x1xf32>
    %cst = arith.constant dense<0.000000e+00> : vector<672x1xf32>
    %2 = tpu.matmul %0, %1, %cst {dimension_numbers = #tpu.dot_dimension_numbers<[1], [0], [0], [1], [0, 0, 1, 1], [], []>} : vector<672x28xf32>, vector<28x1xf32>, vector<672x1xf32> -> vector<672x1xf32>
    %c0_3 = arith.constant 0 : index
    %c0_4 = arith.constant 0 : index
    %3 = vector.load %arg3[%c0_3, %c0_4] : memref<672x1xf32, #tpu.memory_space<vmem>>, vector<672x1xf32>
    %4 = arith.addf %2, %3 : vector<672x1xf32>
    %5 = arith.negf %4 : vector<672x1xf32>
    %6 = math.exp %5 : vector<672x1xf32>
    %cst_5 = arith.constant 1.000000e+00 : f32
    %7 = vector.broadcast %cst_5 : f32 to vector<672x1xf32>
    %8 = arith.addf %7, %6 : vector<672x1xf32>
    %9 = arith.divf %7, %8 : vector<672x1xf32>
    %c0_6 = arith.constant 0 : index
    %c0_7 = arith.constant 0 : index
    %10 = vector.load %arg4[%c0_6, %c0_7] : memref<672x196xf32, #tpu.memory_space<vmem>>, vector<672x196xf32>
    %11 = vector.broadcast %9 : vector<672x1xf32> to vector<672x196xf32>
    %12 = arith.mulf %10, %11 : vector<672x196xf32>
    %c0_8 = arith.constant 0 : index
    %c0_9 = arith.constant 0 : index
    %13 = vector.load %arg5[%c0_8, %c0_9] : memref<672x196xf32, #tpu.memory_space<vmem>>, vector<672x196xf32>
    tpu.vector_store %arg5[%c0_8, %c0_9], %12 {strides = array<i32>} : memref<672x196xf32, #tpu.memory_space<vmem>>, vector<672x196xf32>,
    return
  }
  func.func @transform_0(%arg0: i32) -> (i32, i32) {
    %c0_i32 = arith.constant 0 : i32
    %c0_i32_0 = arith.constant 0 : i32
    %c0_i32_1 = arith.constant 0 : i32
    return %c0_i32, %c0_i32_0 : i32, i32
  }
  func.func @transform_1(%arg0: i32) -> (i32, i32) {
    %c0_i32 = arith.constant 0 : i32
    %c0_i32_0 = arith.constant 0 : i32
    return %arg0, %c0_i32 : i32, i32
  }
  func.func @transform_2(%arg0: i32) -> (i32, i32) {
    %c0_i32 = arith.constant 0 : i32
    %c0_i32_0 = arith.constant 0 : i32
    return %arg0, %c0_i32 : i32, i32
  }
  func.func @transform_3(%arg0: i32) -> (i32, i32) {
    %c0_i32 = arith.constant 0 : i32
    %c0_i32_0 = arith.constant 0 : i32
    return %arg0, %c0_i32 : i32, i32
  }
  func.func @transform_4(%arg0: i32) -> (i32, i32) {
    %c0_i32 = arith.constant 0 : i32
    %c0_i32_0 = arith.constant 0 : i32
    return %arg0, %c0_i32 : i32, i32
  }
}

</mosaic_0001>

<bundles_post_ra>
// kernel: tpu_custom_call.1
= control target key start
LH: loop header
LB: loop body
LE: loop exit
PB: predicated region body
PF: predicated region fallthrough
CT: control target
= control target key end

     0   :  { %vm442_vm0 = vcmask 1043456   ;;  %vm189_vm1 = vcmask 228352   ;;  %s8087_s0 = inlined_call_operand.vmem [shape: f32[28,1], index: 0, kind: input, shape index: {}]   ;;  %s8088_s1 = inlined_call_operand.vmem [shape: f32[672,28], index: 1, kind: input, shape index: {}]   ;;  %s8089_s2 = inlined_call_operand.vmem [shape: f32[672,1], index: 2, kind: input, shape index: {}]   ;;  %s8090_s3 = inlined_call_operand.vmem [shape: f32[672,196], index: 3, kind: input, shape index: {}]   ;;  %s8091_s4 = inlined_call_operand.vmem [shape: f32[672,196], index: 4, kind: output, shape index: {}]  }
   0x1   :  { %v104_v0 = vld [vmem:[%s8087_s0 + $0x18] sm:$0xf]  ;;  %v103_v1 = vld [vmem:[%s8087_s0 + $0x10] sm:$0xff]  ;;  %v102_v2 = vld [vmem:[%s8087_s0 + $0x8] sm:$0xff] }
   0x2   :  { %3240 = vmatpush.msk.msra.mxu0 %vm442_vm0, %v104_v0  ;;  %3409 = vmatpush.msk.msra.mxu1 %vm442_vm0, %v104_v0  ;;  %v101_v3 = vld [vmem:[%s8087_s0] sm:$0xff]  ;;  %v38_v5 = vld [vmem:[%s8088_s1 + $0xa8] sm:$0xff]  ;;  %v59_v6 = vld [vmem:[%s8088_s1 + $0x150] sm:$0xff] }
   0x3   :  { %3410 = vmatpush.msk.msra.mxu2 %vm442_vm0, %v104_v0  ;;  %3411 = vmatpush.msk.msra.mxu3 %vm442_vm0, %v104_v0  ;;  %v17_v4 = vld [vmem:[%s8088_s1] sm:$0xff]  ;;  %v80_v7 = vld [vmem:[%s8088_s1 + $0x1f8] sm:$0xff]  ;;  %v39_v8 = vld [vmem:[%s8088_s1 + $0xb0] sm:$0xff] }
   0x4   :  { %459 = vmatpush.msra.mxu0 %v103_v1  ;;  %3412 = vmatpush.msra.mxu1 %v103_v1  ;;  %v18_v9 = vld [vmem:[%s8088_s1 + $0x8] sm:$0xff]  ;;  %v60_v10 = vld [vmem:[%s8088_s1 + $0x158] sm:$0xff]  ;;  %v81_v11 = vld [vmem:[%s8088_s1 + $0x200] sm:$0xff] }
   0x5   :  { %3413 = vmatpush.msra.mxu2 %v103_v1  ;;  %3414 = vmatpush.msra.mxu3 %v103_v1  ;;  %v40_v12 = vld [vmem:[%s8088_s1 + $0xb8] sm:$0xff]  ;;  %v19_v13 = vld [vmem:[%s8088_s1 + $0x10] sm:$0xff]  ;;  %v61_v14 = vld [vmem:[%s8088_s1 + $0x160] sm:$0xff] }
   0x6   :  { %460 = vmatpush.msra.mxu0 %v102_v2  ;;  %3415 = vmatpush.msra.mxu1 %v102_v2  ;;  %v82_v15 = vld [vmem:[%s8088_s1 + $0x208] sm:$0xff]  ;;  %v20_v16 = vld [vmem:[%s8088_s1 + $0x18] sm:$0xff]  ;;  %v41_v17 = vld [vmem:[%s8088_s1 + $0xc0] sm:$0xff] }
   0x7   :  { %3416 = vmatpush.msra.mxu2 %v102_v2  ;;  %3417 = vmatpush.msra.mxu3 %v102_v2  ;;  %v62_v18 = vld [vmem:[%s8088_s1 + $0x168] sm:$0xff]  ;;  %v83_v19 = vld [vmem:[%s8088_s1 + $0x210] sm:$0xff]  ;;  %v21_v20 = vld [vmem:[%s8088_s1 + $0x20] sm:$0xff] }
   0x8   :  { %461 = vmatpush.msra.mxu0 %v101_v3  ;;  %3418 = vmatpush.msra.mxu1 %v101_v3  ;;  %v42_v21 = vld [vmem:[%s8088_s1 + $0xc8] sm:$0xff]  ;;  %v63_v22 = vld [vmem:[%s8088_s1 + $0x170] sm:$0xff]  ;;  %v84_v23 = vld [vmem:[%s8088_s1 + $0x218] sm:$0xff] }
   0x9   :  { %3419 = vmatpush.msra.mxu2 %v101_v3  ;;  %3420 = vmatpush.msra.mxu3 %v101_v3  ;;  %v22_v24 = vld [vmem:[%s8088_s1 + $0x28] sm:$0xff]  ;;  %v43_v25 = vld [vmem:[%s8088_s1 + $0xd0] sm:$0xff]  ;;  %v64_v26 = vld [vmem:[%s8088_s1 + $0x178] sm:$0xff] }
   0xa   :  { %3241 = vmatmul.msk.f32.vlgmr.msra.gmra.mxu0 %vm189_vm1, %v17_v4  ;;  %3262 = vmatmul.msk.f32.vlgmr.msra.gmra.mxu1 %vm189_vm1, %v38_v5  ;;  %v85_v27 = vld [vmem:[%s8088_s1 + $0x220] sm:$0xff]  ;;  %v23_v28 = vld [vmem:[%s8088_s1 + $0x30] sm:$0xff]  ;;  %v44_v29 = vld [vmem:[%s8088_s1 + $0xd8] sm:$0xff] }
   0xb   :  { %3283 = vmatmul.msk.f32.vlgmr.msra.gmra.mxu2 %vm189_vm1, %v59_v6  ;;  %3304 = vmatmul.msk.f32.vlgmr.msra.gmra.mxu3 %vm189_vm1, %v80_v7  ;;  %v65_v30 = vld [vmem:[%s8088_s1 + $0x180] sm:$0xff]  ;;  %v86_v31 = vld [vmem:[%s8088_s1 + $0x228] sm:$0xff]  ;;  %v24_v32 = vld [vmem:[%s8088_s1 + $0x38] sm:$0xff] }
   0xc   :  { %v45_v33 = vld [vmem:[%s8088_s1 + $0xe0] sm:$0xff]  ;;  %v66_v34 = vld [vmem:[%s8088_s1 + $0x188] sm:$0xff]  ;;  %v87_v35 = vld [vmem:[%s8088_s1 + $0x230] sm:$0xff] }
   0xd   :  { %v25_v36 = vld [vmem:[%s8088_s1 + $0x40] sm:$0xff]  ;;  %v46_v37 = vld [vmem:[%s8088_s1 + $0xe8] sm:$0xff]  ;;  %v67_v38 = vld [vmem:[%s8088_s1 + $0x190] sm:$0xff] }
   0xe   :  { %v88_v39 = vld [vmem:[%s8088_s1 + $0x238] sm:$0xff]  ;;  %v26_v40 = vld [vmem:[%s8088_s1 + $0x48] sm:$0xff]  ;;  %v47_v41 = vld [vmem:[%s8088_s1 + $0xf0] sm:$0xff] }
   0xf   :  { %v68_v42 = vld [vmem:[%s8088_s1 + $0x198] sm:$0xff]  ;;  %v89_v43 = vld [vmem:[%s8088_s1 + $0x240] sm:$0xff]  ;;  %v27_v44 = vld [vmem:[%s8088_s1 + $0x50] sm:$0xff] }
  0x10   :  { %v48_v45 = vld [vmem:[%s8088_s1 + $0xf8] sm:$0xff]  ;;  %v69_v46 = vld [vmem:[%s8088_s1 + $0x1a0] sm:$0xff]  ;;  %v90_v47 = vld [vmem:[%s8088_s1 + $0x248] sm:$0xff] }
  0x11   :  { %v28_v48 = vld [vmem:[%s8088_s1 + $0x58] sm:$0xff]  ;;  %v49_v49 = vld [vmem:[%s8088_s1 + $0x100] sm:$0xff]  ;;  %v70_v50 = vld [vmem:[%s8088_s1 + $0x1a8] sm:$0xff] }
  0x12   :  { %3263 = vmatmul.msk.f32.gmra.mxu1 %vm189_vm1, %v39_v8  ;;  %3242 = vmatmul.msk.f32.gmra.mxu0 %vm189_vm1, %v18_v9  ;;  %v29_v51 = vld [vmem:[%s8088_s1 + $0x60] sm:$0xff]  ;;  %v50_v52 = vld [vmem:[%s8088_s1 + $0x108] sm:$0xff]  ;;  %v91_v53 = vld [vmem:[%s8088_s1 + $0x250] sm:$0xff]  ;;  %v3761_v8 = vmov 0  }
  0x13   :  { %3284 = vmatmul.msk.f32.gmra.mxu2 %vm189_vm1, %v60_v10  ;;  %3305 = vmatmul.msk.f32.gmra.mxu3 %vm189_vm1, %v81_v11  ;;  %v71_v54 = vld [vmem:[%s8088_s1 + $0x1b0] sm:$0xff]  ;;  %v30_v55 = vld [vmem:[%s8088_s1 + $0x68] sm:$0xff]  ;;  %v72_v57 = vld [vmem:[%s8088_s1 + $0x1b8] sm:$0xff] }
  0x14   :  { %v51_v56 = vld [vmem:[%s8088_s1 + $0x110] sm:$0xff]  ;;  %v92_v58 = vld [vmem:[%s8088_s1 + $0x258] sm:$0xff]  ;;  %v93_v60 = vld [vmem:[%s8088_s1 + $0x260] sm:$0xff]  ;;  %3422 = vset.pattern.permute.xlu0 %v3761_v8  ;;  %3423 = vset.pattern.permute.xlu1 %v3761_v8 }
  0x15   :  { %v31_v59 = vld [vmem:[%s8088_s1 + $0x70] sm:$0xff]  ;;  %v32_v61 = vld [vmem:[%s8088_s1 + $0x78] sm:$0xff]  ;;  %v73_v63 = vld [vmem:[%s8088_s1 + $0x1c0] sm:$0xff]  ;;  %3424 = vset.pattern.permute.xlu2 %v3761_v8 }
  0x16   :  { %v52_v62 = vld [vmem:[%s8088_s1 + $0x118] sm:$0xff]  ;;  %v105_v0 = vld [vmem:[%s8089_s2] sm:$0xff]  ;;  %v126_v1 = vld [vmem:[%s8089_s2 + $0xa8] sm:$0xff] }
  0x17   :  { %v33_v6 = vld [vmem:[%s8088_s1 + $0x80] sm:$0xff]  ;;  %v74_v11 = vld [vmem:[%s8088_s1 + $0x1c8] sm:$0xff] }
  0x18   :  { %v53_v7 = vld [vmem:[%s8088_s1 + $0x120] sm:$0xff] }
  0x1a   :  { %3264 = vmatmul.msk.f32.gmra.mxu1 %vm189_vm1, %v40_v12  ;;  %3243 = vmatmul.msk.f32.gmra.mxu0 %vm189_vm1, %v19_v13  ;;  %v94_v12 = vld [vmem:[%s8088_s1 + $0x268] sm:$0xff]  ;;  %v147_v13 = vld [vmem:[%s8089_s2 + $0x150] sm:$0xff] }
  0x1b   :  { %3285 = vmatmul.msk.f32.gmra.mxu2 %vm189_vm1, %v61_v14  ;;  %3306 = vmatmul.msk.f32.gmra.mxu3 %vm189_vm1, %v82_v15  ;;  %v168_v14 = vld [vmem:[%s8089_s2 + $0x1f8] sm:$0xff]  ;;  %v127_v15 = vld [vmem:[%s8089_s2 + $0xb0] sm:$0xff] }
  0x22   :  { %3244 = vmatmul.msk.f32.gmra.mxu0 %vm189_vm1, %v20_v16  ;;  %3265 = vmatmul.msk.f32.gmra.mxu1 %vm189_vm1, %v41_v17  ;;  %v106_v16 = vld [vmem:[%s8089_s2 + $0x8] sm:$0xff] }
  0x23   :  { %3286 = vmatmul.msk.f32.gmra.mxu2 %vm189_vm1, %v62_v18  ;;  %3307 = vmatmul.msk.f32.gmra.mxu3 %vm189_vm1, %v83_v19 }
  0x2a   :  { %3245 = vmatmul.msk.f32.gmra.mxu0 %vm189_vm1, %v21_v20  ;;  %3266 = vmatmul.msk.f32.gmra.mxu1 %vm189_vm1, %v42_v21 }
  0x2b   :  { %3287 = vmatmul.msk.f32.gmra.mxu2 %vm189_vm1, %v63_v22  ;;  %3308 = vmatmul.msk.f32.gmra.mxu3 %vm189_vm1, %v84_v23 }
  0x32   :  { %3246 = vmatmul.msk.f32.gmra.mxu0 %vm189_vm1, %v22_v24  ;;  %3267 = vmatmul.msk.f32.gmra.mxu1 %vm189_vm1, %v43_v25  ;;  %v54_v25 = vld [vmem:[%s8088_s1 + $0x128] sm:$0xff] }
  0x33   :  { %3288 = vmatmul.msk.f32.gmra.mxu2 %vm189_vm1, %v64_v26  ;;  %3309 = vmatmul.msk.f32.gmra.mxu3 %vm189_vm1, %v85_v27 }
  0x3a   :  { %3247 = vmatmul.msk.f32.gmra.mxu0 %vm189_vm1, %v23_v28  ;;  %3268 = vmatmul.msk.f32.gmra.mxu1 %vm189_vm1, %v44_v29 }
  0x3b   :  { %3289 = vmatmul.msk.f32.gmra.mxu2 %vm189_vm1, %v65_v30  ;;  %3310 = vmatmul.msk.f32.gmra.mxu3 %vm189_vm1, %v86_v31 }
  0x42   :  { %3248 = vmatmul.msk.f32.gmra.mxu0 %vm189_vm1, %v24_v32  ;;  %3269 = vmatmul.msk.f32.gmra.mxu1 %vm189_vm1, %v45_v33 }
  0x43   :  { %3290 = vmatmul.msk.f32.gmra.mxu2 %vm189_vm1, %v66_v34  ;;  %3311 = vmatmul.msk.f32.gmra.mxu3 %vm189_vm1, %v87_v35  ;;  %v148_v34 = vld [vmem:[%s8089_s2 + $0x158] sm:$0xff]  ;;  %v169_v35 = vld [vmem:[%s8089_s2 + $0x200] sm:$0xff] }
  0x4a   :  { %3249 = vmatmul.msk.f32.gmra.mxu0 %vm189_vm1, %v25_v36  ;;  %3270 = vmatmul.msk.f32.gmra.mxu1 %vm189_vm1, %v46_v37  ;;  %v128_v36 = vld [vmem:[%s8089_s2 + $0xb8] sm:$0xff] }
  0x4b   :  { %3291 = vmatmul.msk.f32.gmra.mxu2 %vm189_vm1, %v67_v38  ;;  %3312 = vmatmul.msk.f32.gmra.mxu3 %vm189_vm1, %v88_v39  ;;  %v107_v39 = vld [vmem:[%s8089_s2 + $0x10] sm:$0xff] }
  0x52   :  { %3250 = vmatmul.msk.f32.gmra.mxu0 %vm189_vm1, %v26_v40  ;;  %3271 = vmatmul.msk.f32.gmra.mxu1 %vm189_vm1, %v47_v41  ;;  %v75_v40 = vld [vmem:[%s8088_s1 + $0x1d0] sm:$0xff] }
  0x53   :  { %3292 = vmatmul.msk.f32.gmra.mxu2 %vm189_vm1, %v68_v42  ;;  %3313 = vmatmul.msk.f32.gmra.mxu3 %vm189_vm1, %v89_v43  ;;  %v95_v41 = vld [vmem:[%s8088_s1 + $0x270] sm:$0xff] }
  0x5a   :  { %3251 = vmatmul.msk.f32.gmra.mxu0 %vm189_vm1, %v27_v44  ;;  %3272 = vmatmul.msk.f32.gmra.mxu1 %vm189_vm1, %v48_v45 }
  0x5b   :  { %3293 = vmatmul.msk.f32.gmra.mxu2 %vm189_vm1, %v69_v46  ;;  %3314 = vmatmul.msk.f32.gmra.mxu3 %vm189_vm1, %v90_v47 }
  0x62   :  { %3252 = vmatmul.msk.f32.gmra.mxu0 %vm189_vm1, %v28_v48  ;;  %3273 = vmatmul.msk.f32.gmra.mxu1 %vm189_vm1, %v49_v49 }
  0x63   :  { %3294 = vmatmul.msk.f32.gmra.mxu2 %vm189_vm1, %v70_v50  ;;  %3315 = vmatmul.msk.f32.gmra.mxu3 %vm189_vm1, %v91_v53 }
  0x6a   :  { %3253 = vmatmul.msk.f32.gmra.mxu0 %vm189_vm1, %v29_v51  ;;  %3274 = vmatmul.msk.f32.gmra.mxu1 %vm189_vm1, %v50_v52 }
  0x6b   :  { %3295 = vmatmul.msk.f32.gmra.mxu2 %vm189_vm1, %v71_v54  ;;  %3316 = vmatmul.msk.f32.gmra.mxu3 %vm189_vm1, %v92_v58 }
  0x72   :  { %3254 = vmatmul.msk.f32.gmra.mxu0 %vm189_vm1, %v30_v55  ;;  %3275 = vmatmul.msk.f32.gmra.mxu1 %vm189_vm1, %v51_v56 }
  0x73   :  { %3296 = vmatmul.msk.f32.gmra.mxu2 %vm189_vm1, %v72_v57  ;;  %3317 = vmatmul.msk.f32.gmra.mxu3 %vm189_vm1, %v93_v60  ;;  %v149_v60 = vld [vmem:[%s8089_s2 + $0x160] sm:$0xff] }
  0x7a   :  { %3255 = vmatmul.msk.f32.gmra.mxu0 %vm189_vm1, %v31_v59  ;;  %3276 = vmatmul.msk.f32.gmra.mxu1 %vm189_vm1, %v52_v62 }
  0x7b   :  { %3297 = vmatmul.msk.f32.gmra.mxu2 %vm189_vm1, %v73_v63  ;;  %3318 = vmatmul.msk.f32.gmra.mxu3 %vm189_vm1, %v94_v12  ;;  %v170_v63 = vld [vmem:[%s8089_s2 + $0x208] sm:$0xff] }
  0x82   :  { %3256 = vmatmul.msk.f32.gmra.mxu0 %vm189_vm1, %v32_v61  ;;  %3277 = vmatmul.msk.f32.gmra.mxu1 %vm189_vm1, %v53_v7 }
  0x83   :  { %3298 = vmatmul.msk.f32.gmra.mxu2 %vm189_vm1, %v74_v11  ;;  %3319 = vmatmul.msk.f32.gmra.mxu3 %vm189_vm1, %v95_v41 }
  0x87   :  { %v463_v2 = vpop.f32.mrf.mxu0  ;;  %v526_v3 = vpop.f32.mrf.mxu1 }
  0x88   :  { %v464_v4 = vadd.f32 %v463_v2, %v105_v0  ;;  %v527_v5 = vadd.f32 %v526_v3, %v126_v1  ;;  %v34_v1 = vld [vmem:[%s8088_s1 + $0x88] sm:$0xff] }
  0x8a   :  { %v3325_v9 = vmul.f32 -1.442695, %v464_v4  ;;  %v3346_v10 = vmul.f32 -1.442695, %v527_v5  ;;  %3257 = vmatmul.msk.f32.gmra.mxu0 %vm189_vm1, %v33_v6  ;;  %3278 = vmatmul.msk.f32.gmra.mxu1 %vm189_vm1, %v54_v25  ;;  %v108_v4 = vld [vmem:[%s8089_s2 + $0x18] sm:$0xff]  ;;  %v129_v5 = vld [vmem:[%s8089_s2 + $0xc0] sm:$0xff] }
  0x8b   :  { %3299 = vmatmul.msk.f32.gmra.mxu2 %vm189_vm1, %v75_v40 }
  0x8c   :  { %3425 = vpow2.f32 %v3325_v9 }
  0x8d   :  { %3427 = vpow2.f32 %v3346_v10 }
  0x8e   :  { %v589_v17 = vpop.f32.mrf.mxu2  ;;  %v652_v18 = vpop.f32.mrf.mxu3 }
  0x8f   :  { %v590_v19 = vadd.f32 %v589_v17, %v147_v13  ;;  %v653_v20 = vadd.f32 %v652_v18, %v168_v14  ;;  %v529_v21 = vpop.f32.mrf.mxu1  ;;  %v466_v22 = vpop.f32.mrf.mxu0 }
  0x90   :  { %v530_v23 = vadd.f32 %v529_v21, %v127_v15  ;;  %v467_v24 = vadd.f32 %v466_v22, %v106_v16 }
  0x91   :  { %v3367_v26 = vmul.f32 -1.442695, %v590_v19  ;;  %v3388_v27 = vmul.f32 -1.442695, %v653_v20  ;;  %v96_v19 = vld [vmem:[%s8088_s1 + $0x278] sm:$0xff] }
  0x92   :  { %v3426_v28 = vpop.eup %3425  ;;  %v3347_v31 = vmul.f32 -1.442695, %v530_v23  ;;  %v3326_v33 = vmul.f32 -1.442695, %v467_v24  ;;  %3258 = vmatmul.msk.f32.gmra.mxu0 %vm189_vm1, %v34_v1  ;;  %3320 = vmatmul.msk.f32.gmra.mxu3 %vm189_vm1, %v96_v19 }
  0x93   :  { %v3428_v29 = vpop.eup %3427  ;;  %v4077_v30 = vadd.f32 1.0, %v3426_v28  ;;  %3429 = vpow2.f32 %v3367_v26 }
  0x94   :  { %v4079_v32 = vadd.f32 1.0, %v3428_v29  ;;  %3431 = vpow2.f32 %v3388_v27 }
  0x95   :  { %3433 = vrcp.f32 %v4077_v30  ;;  %v1062_v47 = vand.u32 2147483648, %v4077_v30  ;;  %v1060_v51 = vand.u32 2147483647, %v4077_v30  ;;  %vm1056_vm2 = vweird.f32 %v4077_v30 }
  0x96   :  { %3435 = vrcp.f32 %v4079_v32  ;;  %v592_v37 = vpop.f32.mrf.mxu2  ;;  %v655_v38 = vpop.f32.mrf.mxu3  ;;  %v1377_v52 = vand.u32 2147483648, %v4079_v32  ;;  %v1375_v0 = vand.u32 2147483647, %v4079_v32  ;;  %vm1371_vm6 = vweird.f32 %v4079_v32 }
  0x97   :  { %3437 = vpow2.f32 %v3347_v31  ;;  %v593_v42 = vadd.f32 %v592_v37, %v148_v34  ;;  %v656_v43 = vadd.f32 %v655_v38, %v169_v35  ;;  %v532_v44 = vpop.f32.mrf.mxu1  ;;  %v469_v45 = vpop.f32.mrf.mxu0  ;;  %v4121_v62 = vor.u32 1.1754944e-38, %v1062_v47 }
  0x98   :  { %3439 = vpow2.f32 %v3326_v33  ;;  %v533_v46 = vadd.f32 %v532_v44, %v128_v36  ;;  %v470_v50 = vadd.f32 %v469_v45, %v107_v39  ;;  %vm4138_vm4 = vcmp.eq.f32.partialorder %v1060_v51, 8.507059e+37  ;;  %v150_v39 = vld [vmem:[%s8089_s2 + $0x168] sm:$0xff]  ;;  %v109_v45 = vld [vmem:[%s8089_s2 + $0x20] sm:$0xff] }
  0x99   :  { %v3430_v48 = vpop.eup %3429  ;;  %v3368_v49 = vmul.f32 -1.442695, %v593_v42  ;;  %v3389_v55 = vmul.f32 -1.442695, %v656_v43  ;;  %v4142_v7 = vor.u32 1.1754944e-38, %v1377_v52  ;;  %vm4185_vm8 = vcmp.eq.f32.partialorder %v1375_v0, 8.507059e+37 }
  0x9a   :  { %v3432_v53 = vpop.eup %3431  ;;  %v4106_v54 = vadd.f32 1.0, %v3430_v48  ;;  %v3348_v58 = vmul.f32 -1.442695, %v533_v46  ;;  %v3327_v3 = vmul.f32 -1.442695, %v470_v50  ;;  %v130_v46 = vld [vmem:[%s8089_s2 + $0xc8] sm:$0xff] }
  0x9b   :  { %v4108_v56 = vpop.eup %3433  ;;  %v4110_v57 = vadd.f32 1.0, %v3432_v53  ;;  %3441 = vpow2.f32 %v3368_v49 }
  0x9c   :  { %v4113_v59 = vpop.eup %3435  ;;  %3443 = vrcp.f32 %v4106_v54  ;;  %v1052_v61 = vmul.f32 %v4108_v56, %v4077_v30  ;;  %vm1057_vm3 = vweird.f32 %v4108_v56  ;;  %v1690_v25 = vand.u32 2147483647, %v4106_v54 }
  0x9d   :  { %v3438_v2 = vpop.eup %3437  ;;  %3445 = vrcp.f32 %v4110_v57  ;;  %v4149_v13 = vmul.f32 %v4113_v59, %v4079_v32  ;;  %vm1372_vm5 = vweird.f32 %v4113_v59  ;;  %vm4177_vm7 = vmor %vm1056_vm2, %vm1057_vm3  ;;  %v1692_v42 = vand.u32 2147483648, %v4106_v54 }
  0x9e   :  { %v3440_v8 = vpop.eup %3439  ;;  %v4145_v9 = vadd.f32 1.0, %v3438_v2  ;;  %3447 = vpow2.f32 %v3389_v55  ;;  %v595_v10 = vpop.f32.mrf.mxu2  ;;  %v1053_v11 = vsub.f32 1.0, %v1052_v61  ;;  %v171_v2 = vld [vmem:[%s8089_s2 + $0x210] sm:$0xff]  ;;  %vm4243_vm12 = vmor %vm1371_vm6, %vm1372_vm5  ;;  %vm1686_vm5 = vweird.f32 %v4106_v54 }
  0x9f   :  { %v658_v12 = vpop.f32.mrf.mxu3  ;;  %v4151_v14 = vadd.f32 1.0, %v3440_v8  ;;  %3449 = vpow2.f32 %v3348_v58  ;;  %v596_v15 = vadd.f32 %v595_v10, %v149_v60  ;;  %v472_v16 = vpop.f32.mrf.mxu0  ;;  %v1368_v40 = vsub.f32 1.0, %v4149_v13 }
  0xa0   :  { %v535_v17 = vpop.f32.mrf.mxu1  ;;  %v659_v18 = vadd.f32 %v658_v12, %v170_v63  ;;  %3451 = vrcp.f32 %v4145_v9  ;;  %v473_v20 = vadd.f32 %v472_v16, %v108_v4  ;;  %v1054_v22 = vmul.f32 %v4108_v56, %v1053_v11  ;;  %v35_v16 = vld [vmem:[%s8088_s1 + $0x90] sm:$0xff] }
  0xa1   :  { %v536_v21 = vadd.f32 %v535_v17, %v129_v5  ;;  %v3442_v23 = vpop.eup %3441  ;;  %3453 = vrcp.f32 %v4151_v14  ;;  %v3369_v24 = vmul.f32 -1.442695, %v596_v15  ;;  %v1390_v34 = vand.u32 2147483647, %v4145_v9  ;;  %3259 = vmatmul.msk.f32.gmra.mxu0 %vm189_vm1, %v35_v16 }
  0xa2   :  { %v4162_v26 = vpop.eup %3443  ;;  %v4164_v27 = vadd.f32 1.0, %v3442_v23  ;;  %3455 = vpow2.f32 %v3327_v3  ;;  %v3328_v28 = vmul.f32 -1.442695, %v473_v20  ;;  %v1055_v33 = vadd.f32 %v4108_v56, %v1054_v22 }
  0xa3   :  { %v3349_v29 = vmul.f32 -1.442695, %v536_v21  ;;  %v4167_v31 = vpop.eup %3445  ;;  %3457 = vpow2.f32 %v3369_v24  ;;  %v1392_v35 = vand.u32 2147483648, %v4145_v9  ;;  %v3390_v38 = vmul.f32 -1.442695, %v659_v18  ;;  %v55_v21 = vld [vmem:[%s8088_s1 + $0x130] sm:$0xff] }
  0xa4   :  { %v3448_v36 = vpop.eup %3447  ;;  %3459 = vrcp.f32 %v4164_v27  ;;  %v1059_v30 = vsel %vm4177_vm7, %v4108_v56, %v1055_v33  ;;  %vm1386_vm9 = vweird.f32 %v4145_v9  ;;  %v1705_v47 = vand.u32 2147483647, %v4164_v27  ;;  %v151_v24 = vld [vmem:[%s8089_s2 + $0x170] sm:$0xff]  ;;  %3279 = vmatmul.msk.f32.gmra.mxu1 %vm189_vm1, %v55_v21 }
  0xa5   :  { %v3450_v43 = vpop.eup %3449  ;;  %v4190_v44 = vadd.f32 1.0, %v3448_v36  ;;  %3461 = vpow2.f32 %v3328_v28  ;;  %v1064_v50 = vsel %vm4138_vm4, %v4121_v62, %v1059_v30  ;;  %v4210_v52 = vor.u32 1.1754944e-38, %v1392_v35  ;;  %v110_v36 = vld [vmem:[%s8089_s2 + $0x28] sm:$0xff] }
  0xa6   :  { %v4203_v48 = vpop.eup %3451  ;;  %v4205_v49 = vadd.f32 1.0, %v3450_v43  ;;  %3463 = vpow2.f32 %v3349_v29  ;;  %v598_v51 = vpop.f32.mrf.mxu2  ;;  %2481 = vperm.xlu0 %3422, %v1064_v50   ;;  %vm4218_vm11 = vcmp.eq.f32.partialorder %v1390_v34, 8.507059e+37  ;;  %v1369_v1 = vmul.f32 %v4113_v59, %v1368_v40  ;;  %v76_v29 = vld [vmem:[%s8088_s1 + $0x1d8] sm:$0xff] }
  0xa7   :  { %v4212_v53 = vpop.eup %3453  ;;  %3465 = vrcp.f32 %v4190_v44  ;;  %v475_v55 = vpop.f32.mrf.mxu0  ;;  %v599_v58 = vadd.f32 %v598_v51, %v150_v39  ;;  %v1382_v60 = vmul.f32 %v4203_v48, %v4145_v9  ;;  %vm1387_vm10 = vweird.f32 %v4203_v48  ;;  %3300 = vmatmul.msk.f32.gmra.mxu2 %vm189_vm1, %v76_v29 }
  0xa8   :  { %v538_v56 = vpop.f32.mrf.mxu1  ;;  %v3456_v62 = vpop.eup %3455  ;;  %3467 = vrcp.f32 %v4205_v49  ;;  %v476_v63 = vadd.f32 %v475_v55, %v109_v45  ;;  %v1370_v15 = vadd.f32 %v4113_v59, %v1369_v1  ;;  %vm1401_vm13 = vweird.f32 %v4205_v49  ;;  %vm1388_vm14 = vmor %vm1386_vm9, %vm1387_vm10 }
  0xa9   :  { %v539_v0 = vadd.f32 %v538_v56, %v130_v46  ;;  %v661_v3 = vpop.f32.mrf.mxu3  ;;  %v3458_v4 = vpop.eup %3457  ;;  %v4227_v5 = vadd.f32 1.0, %v3456_v62  ;;  %3469 = vpow2.f32 %v3390_v38  ;;  %v3370_v6 = vmul.f32 -1.442695, %v599_v58 }
  0xaa   :  { %v1383_v8 = vsub.f32 1.0, %v1382_v60  ;;  %v4229_v10 = vpop.eup %3459  ;;  %v4231_v11 = vadd.f32 1.0, %v3458_v4  ;;  %v3329_v12 = vmul.f32 -1.442695, %v476_v63  ;;  %v662_v20 = vadd.f32 %v661_v3, %v171_v2 }
  0xab   :  { %v3350_v13 = vmul.f32 -1.442695, %v539_v0  ;;  %v3462_v17 = vpop.eup %3461  ;;  %3471 = vrcp.f32 %v4227_v5  ;;  %v1374_v32 = vsel %vm4243_vm12, %v4113_v59, %v1370_v15  ;;  %v1405_v28 = vand.u32 2147483647, %v4205_v49 }
  0xac   :  { %v1384_v18 = vmul.f32 %v4203_v48, %v1383_v8  ;;  %v3464_v22 = vpop.eup %3463  ;;  %3473 = vrcp.f32 %v4231_v11  ;;  %v4253_v23 = vadd.f32 1.0, %v3462_v17  ;;  %v1379_v59 = vsel %vm4185_vm8, %v4142_v7, %v1374_v32  ;;  %v56_v32 = vld [vmem:[%s8088_s1 + $0x138] sm:$0xff] }
  0xad   :  { %v4266_v33 = vpop.eup %3465  ;;  %v4268_v34 = vadd.f32 1.0, %v3464_v22  ;;  %3475 = vpow2.f32 %v3329_v12  ;;  %v3391_v39 = vmul.f32 -1.442695, %v662_v20  ;;  %vm4285_vm15 = vcmp.eq.f32.partialorder %v1405_v28, 8.507059e+37  ;;  %v172_v20 = vld [vmem:[%s8089_s2 + $0x218] sm:$0xff]  ;;  %3280 = vmatmul.msk.f32.gmra.mxu1 %vm189_vm1, %v56_v32 }
  0xae   :  { %v1385_v35 = vadd.f32 %v4203_v48, %v1384_v18  ;;  %v4278_v37 = vpop.eup %3467  ;;  %3477 = vrcp.f32 %v4253_v23  ;;  %v601_v38 = vpop.f32.mrf.mxu2  ;;  %v1407_v7 = vand.u32 2147483648, %v4205_v49  ;;  %2586 = vperm.xlu0 %3422, %v1379_v59   ;;  %vm1701_vm0 = vweird.f32 %v4164_v27  ;;  %v36_v22 = vld [vmem:[%s8088_s1 + $0x98] sm:$0xff] }
  0xaf   :  { %v3470_v41 = vpop.eup %3469  ;;  %3479 = vrcp.f32 %v4268_v34  ;;  %v478_v30 = vpop.f32.mrf.mxu0  ;;  %v602_v45 = vadd.f32 %v601_v38, %v151_v24  ;;  %v1397_v9 = vmul.f32 %v4278_v37, %v4205_v49  ;;  %vm1402_vm2 = vweird.f32 %v4278_v37  ;;  %v111_v49 = vld [vmem:[%s8089_s2 + $0x30] sm:$0xff]  ;;  %3260 = vmatmul.msk.f32.gmra.mxu0 %vm189_vm1, %v36_v22 }
  0xb0   :  { %v1389_v43 = vsel %vm1388_vm14, %v4203_v48, %v1385_v35  ;;  %v4294_v46 = vadd.f32 1.0, %v3470_v41  ;;  %3481 = vpow2.f32 %v3350_v13  ;;  %v479_v51 = vadd.f32 %v478_v30, %v110_v36  ;;  %vm4325_vm6 = vmor %vm1401_vm13, %vm1402_vm2  ;;  %v131_v13 = vld [vmem:[%s8089_s2 + $0xd0] sm:$0xff]  ;;  %v541_v19 = vpop.f32.mrf.mxu1 }
  0xb1   :  { %v1394_v50 = vsel %vm4218_vm11, %v4210_v52, %v1389_v43  ;;  %v4300_v55 = vpop.eup %3471  ;;  %3483 = vpow2.f32 %v3370_v6  ;;  %v3371_v48 = vmul.f32 -1.442695, %v602_v45  ;;  %v1398_v56 = vsub.f32 1.0, %v1397_v9  ;;  %v664_v21 = vpop.f32.mrf.mxu3  ;;  %v77_v45 = vld [vmem:[%s8088_s1 + $0x1e0] sm:$0xff] }
  0xb2   :  { %2591 = vperm.xlu1 %3423, %v1394_v50   ;;  %v4303_v58 = vpop.eup %3473  ;;  %3485 = vrcp.f32 %v4294_v46  ;;  %v3330_v60 = vmul.f32 -1.442695, %v479_v51  ;;  %v1408_v62 = vor.u32 1.1754944e-38, %v1407_v7  ;;  %v1697_v52 = vmul.f32 %v4229_v10, %v4164_v27  ;;  %v97_v9 = vld [vmem:[%s8088_s1 + $0x280] sm:$0xff]  ;;  %3301 = vmatmul.msk.f32.gmra.mxu2 %vm189_vm1, %v77_v45 }
  0xb3   :  { %v3476_v61 = vpop.eup %3475  ;;  %3487 = vpow2.f32 %v3371_v48  ;;  %v1399_v63 = vmul.f32 %v4278_v37, %v1398_v56  ;;  %vm1702_vm3 = vweird.f32 %v4229_v10  ;;  %vm4312_vm4 = vcmp.eq.f32.partialorder %v1705_v47, 8.507059e+37  ;;  %3321 = vmatmul.msk.f32.gmra.mxu3 %vm189_vm1, %v97_v9  ;;  %v152_v9 = vld [vmem:[%s8089_s2 + $0x178] sm:$0xff] }
  0xb4   :  { %v4317_v1 = vpop.eup %3477  ;;  %v4319_v2 = vadd.f32 1.0, %v3476_v61  ;;  %3489 = vpow2.f32 %v3330_v60  ;;  %v1698_v4 = vsub.f32 1.0, %v1697_v52  ;;  %v1707_v47 = vand.u32 2147483648, %v4164_v27  ;;  %vm4380_vm9 = vmor %vm1701_vm0, %vm1702_vm3 }
  0xb5   :  { %v4330_v6 = vpop.eup %3479  ;;  %3491 = vpow2.f32 %v3391_v39  ;;  %v1400_v8 = vadd.f32 %v4278_v37, %v1399_v63  ;;  %v1682_v12 = vmul.f32 %v4162_v26, %v4106_v54  ;;  %vm1687_vm7 = vweird.f32 %v4162_v26 }
  0xb6   :  { %v3482_v15 = vpop.eup %3481  ;;  %3493 = vrcp.f32 %v4319_v2  ;;  %v1699_v16 = vmul.f32 %v4229_v10, %v1698_v4  ;;  %v1708_v17 = vor.u32 1.1754944e-38, %v1707_v47  ;;  %vm4346_vm8 = vcmp.eq.f32.partialorder %v1690_v25, 8.507059e+37  ;;  %vm1688_vm10 = vmor %vm1686_vm5, %vm1687_vm7 }
  0xb7   :  { %v3484_v24 = vpop.eup %3483  ;;  %v4359_v28 = vadd.f32 1.0, %v3482_v15  ;;  %v1404_v25 = vsel %vm4325_vm6, %v4278_v37, %v1400_v8  ;;  %v1683_v29 = vsub.f32 1.0, %v1682_v12  ;;  %v1693_v35 = vor.u32 1.1754944e-38, %v1692_v42  ;;  %v481_v59 = vpop.f32.mrf.mxu0 }
  0xb8   :  { %v4368_v36 = vpop.eup %3485  ;;  %v4370_v38 = vadd.f32 1.0, %v3484_v24  ;;  %v1409_v39 = vsel %vm4285_vm15, %v1408_v62, %v1404_v25  ;;  %v1700_v7 = vadd.f32 %v4229_v10, %v1699_v16  ;;  %v482_v41 = vadd.f32 %v481_v59, %v111_v49 }
  0xb9   :  { %v3488_v37 = vpop.eup %3487  ;;  %3495 = vrcp.f32 %v4359_v28  ;;  %2596 = vperm.xlu2 %3424, %v1409_v39   ;;  %v1684_v43 = vmul.f32 %v4162_v26, %v1683_v29  ;;  %v542_v30 = vadd.f32 %v541_v19, %v131_v13  ;;  %v665_v40 = vadd.f32 %v664_v21, %v172_v20  ;;  %v57_v29 = vld [vmem:[%s8088_s1 + $0x140] sm:$0xff] }
  0xba   :  { %v3490_v50 = vpop.eup %3489  ;;  %3497 = vrcp.f32 %v4370_v38  ;;  %v4392_v27 = vadd.f32 1.0, %v3488_v37  ;;  %v1704_v51 = vsel %vm4380_vm9, %v4229_v10, %v1700_v7  ;;  %v3331_v48 = vmul.f32 -1.442695, %v482_v41  ;;  %v132_v41 = vld [vmem:[%s8089_s2 + $0xd8] sm:$0xff]  ;;  %v544_v37 = vpop.f32.mrf.mxu1  ;;  %3281 = vmatmul.msk.f32.gmra.mxu1 %vm189_vm1, %v57_v29 }
  0xbb   :  { %v3492_v56 = vpop.eup %3491  ;;  %v4399_v60 = vadd.f32 1.0, %v3490_v50  ;;  %v1709_v62 = vsel %vm4312_vm4, %v1708_v17, %v1704_v51  ;;  %v1685_v52 = vadd.f32 %v4162_v26, %v1684_v43  ;;  %v3351_v61 = vmul.f32 -1.442695, %v542_v30  ;;  %v604_v50 = vpop.f32.mrf.mxu2 }
  0xbc   :  { %v4404_v63 = vpop.eup %3493  ;;  %3499 = vrcp.f32 %v4392_v27  ;;  %v4407_v3 = vadd.f32 1.0, %v3492_v56  ;;  %2696 = vperm.xlu1 %3423, %v1709_v62   ;;  %v3392_v10 = vmul.f32 -1.442695, %v665_v40  ;;  %v1712_v0 = vmul.f32 %v4303_v58, %v4231_v11 }
  0xbd   :  { %3501 = vrcp.f32 %v4399_v60  ;;  %v1689_v4 = vsel %vm1688_vm10, %v4162_v26, %v1685_v52  ;;  %vm1716_vm11 = vweird.f32 %v4231_v11  ;;  %vm1717_vm12 = vweird.f32 %v4303_v58  ;;  %v78_v52 = vld [vmem:[%s8088_s1 + $0x1e8] sm:$0xff] }
  0xbe   :  { %3503 = vrcp.f32 %v4407_v3  ;;  %v1694_v47 = vsel %vm4346_vm8, %v1693_v35, %v1689_v4  ;;  %v1713_v8 = vsub.f32 1.0, %v1712_v0  ;;  %v1720_v54 = vand.u32 2147483647, %v4231_v11  ;;  %vm4441_vm0 = vmor %vm1716_vm11, %vm1717_vm12  ;;  %3302 = vmatmul.msk.f32.gmra.mxu2 %vm189_vm1, %v78_v52 }
  0xbf   :  { %v4423_v12 = vpop.eup %3495  ;;  %2691 = vperm.xlu0 %3422, %v1694_v47   ;;  %3505 = vpow2.f32 %v3331_v48  ;;  %v1722_v49 = vand.u32 2147483648, %v4231_v11  ;;  %v2012_v26 = vmul.f32 %v4266_v33, %v4190_v44  ;;  %vm2016_vm13 = vweird.f32 %v4190_v44  ;;  %v112_v11 = vld [vmem:[%s8089_s2 + $0x38] sm:$0xff]  ;;  %v484_v25 = vpop.f32.mrf.mxu0 }
  0xc0   :  { %v4429_v13 = vpop.eup %3497  ;;  %3507 = vpow2.f32 %v3351_v61  ;;  %v1714_v15 = vmul.f32 %v4303_v58, %v1713_v8  ;;  %vm4432_vm14 = vcmp.eq.f32.partialorder %v1720_v54, 8.507059e+37  ;;  %vm2017_vm15 = vweird.f32 %v4266_v33  ;;  %v98_v61 = vld [vmem:[%s8088_s1 + $0x288] sm:$0xff] }
  0xc1   :  { %3509 = vpow2.f32 %v3392_v10  ;;  %v1723_v18 = vor.u32 1.1754944e-38, %v1722_v49  ;;  %v2013_v19 = vsub.f32 1.0, %v2012_v26  ;;  %v2020_v20 = vand.u32 2147483647, %v4190_v44  ;;  %vm2018_vm6 = vmor %vm2016_vm13, %vm2017_vm15  ;;  %3322 = vmatmul.msk.f32.gmra.mxu3 %vm189_vm1, %v98_v61 }
  0xc2   :  { %v4446_v21 = vpop.eup %3499  ;;  %v1715_v22 = vadd.f32 %v4303_v58, %v1714_v15  ;;  %v2022_v32 = vand.u32 2147483648, %v4190_v44  ;;  %v1997_v24 = vmul.f32 %v4167_v31, %v4110_v57  ;;  %vm2001_vm2 = vweird.f32 %v4110_v57 }
  0xc3   :  { %v4459_v35 = vpop.eup %3501  ;;  %v2014_v59 = vmul.f32 %v4266_v33, %v2013_v19  ;;  %vm4462_vm3 = vcmp.eq.f32.partialorder %v2020_v20, 8.507059e+37  ;;  %vm2002_vm4 = vweird.f32 %v4167_v31  ;;  %v2005_v7 = vand.u32 2147483647, %v4110_v57 }
  0xc4   :  { %v4472_v42 = vpop.eup %3503  ;;  %v1719_v43 = vsel %vm4441_vm0, %v4303_v58, %v1715_v22  ;;  %v2023_v30 = vor.u32 1.1754944e-38, %v2022_v32  ;;  %v1998_v40 = vsub.f32 1.0, %v1997_v24  ;;  %v2007_v45 = vand.u32 2147483648, %v4110_v57  ;;  %vm2003_vm7 = vmor %vm2001_vm2, %vm2002_vm4 }
  0xc5   :  { %v3506_v51 = vpop.eup %3505  ;;  %v1724_v48 = vsel %vm4432_vm14, %v1723_v18, %v1719_v43  ;;  %v2015_v56 = vadd.f32 %v4266_v33, %v2014_v59  ;;  %vm4484_vm5 = vcmp.eq.f32.partialorder %v2005_v7, 8.507059e+37  ;;  %v485_v58 = vadd.f32 %v484_v25, %v112_v11 }
  0xc6   :  { %v3508_v10 = vpop.eup %3507  ;;  %v4494_v0 = vadd.f32 1.0, %v3506_v51  ;;  %2701 = vperm.xlu2 %3424, %v1724_v48   ;;  %v1999_v4 = vmul.f32 %v4167_v31, %v1998_v40  ;;  %v2008_v47 = vor.u32 1.1754944e-38, %v2007_v45  ;;  %v545_v8 = vadd.f32 %v544_v37, %v132_v41  ;;  %v547_v40 = vpop.f32.mrf.mxu1 }
  0xc7   :  { %v3510_v54 = vpop.eup %3509  ;;  %v4502_v49 = vadd.f32 1.0, %v3508_v10  ;;  %v2019_v26 = vsel %vm2018_vm6, %v4266_v33, %v2015_v56  ;;  %v3332_v15 = vmul.f32 -1.442695, %v485_v58  ;;  %v605_v16 = vadd.f32 %v604_v50, %v152_v9 }
  0xc8   :  { %3511 = vrcp.f32 %v4494_v0  ;;  %v4507_v17 = vadd.f32 1.0, %v3510_v54  ;;  %v2024_v44 = vsel %vm4462_vm3, %v2023_v30, %v2019_v26  ;;  %v2000_v18 = vadd.f32 %v4167_v31, %v1999_v4  ;;  %v133_v30 = vld [vmem:[%s8089_s2 + $0xe0] sm:$0xff]  ;;  %v607_v54 = vpop.f32.mrf.mxu2 }
  0xc9   :  { %3513 = vrcp.f32 %v4502_v49  ;;  %2801 = vperm.xlu1 %3423, %v2024_v44   ;;  %v3352_v33 = vmul.f32 -1.442695, %v545_v8  ;;  %v3372_v19 = vmul.f32 -1.442695, %v605_v16  ;;  %v2027_v20 = vmul.f32 %v4368_v36, %v4294_v46  ;;  %v153_v8 = vld [vmem:[%s8089_s2 + $0x180] sm:$0xff] }
  0xca   :  { %3515 = vrcp.f32 %v4507_v17  ;;  %v2004_v22 = vsel %vm2003_vm7, %v4167_v31, %v2000_v18  ;;  %vm2031_vm8 = vweird.f32 %v4294_v46  ;;  %vm2032_vm9 = vweird.f32 %v4368_v36  ;;  %v173_v44 = vld [vmem:[%s8089_s2 + $0x220] sm:$0xff]  ;;  %v667_v18 = vpop.f32.mrf.mxu3 }
  0xcb   :  { %v2009_v32 = vsel %vm4484_vm5, %v2008_v47, %v2004_v22  ;;  %3517 = vpow2.f32 %v3332_v15  ;;  %v2028_v24 = vsub.f32 1.0, %v2027_v20  ;;  %v2035_v57 = vand.u32 2147483647, %v4294_v46  ;;  %vm4542_vm13 = vmor %vm2031_vm8, %vm2032_vm9 }
  0xcc   :  { %2796 = vperm.xlu0 %3422, %v2009_v32   ;;  %3519 = vpow2.f32 %v3352_v33  ;;  %v2037_v11 = vand.u32 2147483648, %v4294_v46  ;;  %v1082_v25 = vmul.f32 %v4300_v55, %v4227_v5  ;;  %vm1086_vm10 = vweird.f32 %v4227_v5  ;;  %v99_v33 = vld [vmem:[%s8088_s1 + $0x290] sm:$0xff] }
  0xcd   :  { %3521 = vpow2.f32 %v3372_v19  ;;  %v2029_v31 = vmul.f32 %v4368_v36, %v2028_v24  ;;  %vm4531_vm11 = vcmp.eq.f32.partialorder %v2035_v57, 8.507059e+37  ;;  %vm1087_vm12 = vweird.f32 %v4300_v55  ;;  %3323 = vmatmul.msk.f32.gmra.mxu3 %vm189_vm1, %v99_v33 }
  0xce   :  { %v4536_v59 = vpop.eup %3511  ;;  %v2038_v7 = vor.u32 1.1754944e-38, %v2037_v11  ;;  %v1083_v41 = vsub.f32 1.0, %v1082_v25  ;;  %v1090_v37 = vand.u32 2147483647, %v4227_v5  ;;  %v1092_v43 = vand.u32 2147483648, %v4227_v5  ;;  %vm4573_vm2 = vmor %vm1086_vm10, %vm1087_vm12 }
  0xcf   :  { %v4551_v45 = vpop.eup %3513  ;;  %v2030_v9 = vadd.f32 %v4368_v36, %v2029_v31  ;;  %v1067_v46 = vmul.f32 %v4212_v53, %v4151_v14  ;;  %vm1071_vm14 = vweird.f32 %v4151_v14  ;;  %vm1072_vm15 = vweird.f32 %v4212_v53 }
  0xd0   :  { %v4558_v50 = vpop.eup %3515  ;;  %v1084_v51 = vmul.f32 %v4300_v55, %v1083_v41  ;;  %vm4561_vm0 = vcmp.eq.f32.partialorder %v1090_v37, 8.507059e+37  ;;  %v1093_v56 = vor.u32 1.1754944e-38, %v1092_v43  ;;  %v1075_v62 = vand.u32 2147483647, %v4151_v14  ;;  %vm4610_vm4 = vmor %vm1071_vm14, %vm1072_vm15 }
  0xd1   :  { %v3518_v58 = vpop.eup %3517  ;;  %v2034_v52 = vsel %vm4542_vm13, %v4368_v36, %v2030_v9  ;;  %v1068_v10 = vsub.f32 1.0, %v1067_v46  ;;  %v1077_v4 = vand.u32 2147483648, %v4151_v14  ;;  %v548_v47 = vadd.f32 %v547_v40, %v133_v30 }
  0xd2   :  { %v3520_v26 = vpop.eup %3519  ;;  %v4581_v15 = vadd.f32 1.0, %v3518_v58  ;;  %v2039_v36 = vsel %vm4531_vm11, %v2038_v7, %v2034_v52  ;;  %v1085_v5 = vadd.f32 %v4300_v55, %v1084_v51  ;;  %vm4586_vm3 = vcmp.eq.f32.partialorder %v1075_v62, 8.507059e+37  ;;  %v37_v62 = vld [vmem:[%s8088_s1 + $0xa0] sm:$0xff] }
  0xd3   :  { %v3522_v19 = vpop.eup %3521  ;;  %v4596_v20 = vadd.f32 1.0, %v3520_v26  ;;  %2806 = vperm.xlu2 %3424, %v2039_v36   ;;  %v1069_v22 = vmul.f32 %v4212_v53, %v1068_v10  ;;  %v1078_v32 = vor.u32 1.1754944e-38, %v1077_v4  ;;  %v3353_v24 = vmul.f32 -1.442695, %v548_v47  ;;  %3261 = vmatmul.msk.f32.gmra.mxu0 %vm189_vm1, %v37_v62 }
  0xd4   :  { %3523 = vrcp.f32 %v4581_v15  ;;  %v4601_v57 = vadd.f32 1.0, %v3522_v19  ;;  %v1089_v11 = vsel %vm4573_vm2, %v4300_v55, %v1085_v5  ;;  %v608_v31 = vadd.f32 %v607_v54, %v153_v8  ;;  %v113_v8 = vld [vmem:[%s8089_s2 + $0x40] sm:$0xff]  ;;  %v487_v54 = vpop.f32.mrf.mxu0 }
  0xd5   :  { %3525 = vrcp.f32 %v4596_v20  ;;  %v1094_v29 = vsel %vm4561_vm0, %v1093_v56, %v1089_v11  ;;  %v1070_v39 = vadd.f32 %v4212_v53, %v1069_v22  ;;  %v668_v7 = vadd.f32 %v667_v18, %v173_v44 }
  0xd6   :  { %3527 = vrcp.f32 %v4601_v57  ;;  %2491 = vperm.xlu1 %3423, %v1094_v29   ;;  %v3373_v55 = vmul.f32 -1.442695, %v608_v31  ;;  %v1112_v14 = vmul.f32 %v4404_v63, %v4319_v2  ;;  %vm1116_vm5 = vweird.f32 %v4319_v2 }
  0xd7   :  { %v1074_v41 = vsel %vm4610_vm4, %v4212_v53, %v1070_v39  ;;  %3529 = vpow2.f32 %v3353_v24  ;;  %v3393_v37 = vmul.f32 -1.442695, %v668_v7  ;;  %vm1117_vm6 = vweird.f32 %v4404_v63 }
  0xd8   :  { %v1079_v43 = vsel %vm4586_vm3, %v1078_v32, %v1074_v41  ;;  %3531 = vpow2.f32 %v3373_v55  ;;  %v1113_v30 = vsub.f32 1.0, %v1112_v14  ;;  %v1120_v40 = vand.u32 2147483647, %v4319_v2  ;;  %vm4651_vm10 = vmor %vm1116_vm5, %vm1117_vm6  ;;  %v610_v55 = vpop.f32.mrf.mxu2  ;;  %v174_v14 = vld [vmem:[%s8089_s2 + $0x228] sm:$0xff]  ;;  %v670_v41 = vpop.f32.mrf.mxu3 }
  0xd9   :  { %2486 = vperm.xlu0 %3422, %v1079_v43   ;;  %3533 = vpow2.f32 %v3393_v37  ;;  %v1122_v9 = vand.u32 2147483648, %v4319_v2  ;;  %v1097_v46 = vmul.f32 %v4317_v1, %v4253_v23  ;;  %vm1101_vm7 = vweird.f32 %v4253_v23  ;;  %v134_v43 = vld [vmem:[%s8089_s2 + $0xe8] sm:$0xff] }
  0xda   :  { %v4633_v53 = vpop.eup %3523  ;;  %v1114_v51 = vmul.f32 %v4404_v63, %v1113_v30  ;;  %vm4636_vm8 = vcmp.eq.f32.partialorder %v1120_v40, 8.507059e+37  ;;  %vm1102_vm9 = vweird.f32 %v4317_v1  ;;  %v1105_v56 = vand.u32 2147483647, %v4253_v23 }
  0xdb   :  { %v4645_v58 = vpop.eup %3525  ;;  %v1123_v61 = vor.u32 1.1754944e-38, %v1122_v9  ;;  %v1098_v10 = vsub.f32 1.0, %v1097_v46  ;;  %v1107_v4 = vand.u32 2147483648, %v4253_v23  ;;  %v1412_v47 = vmul.f32 %v4330_v6, %v4268_v34  ;;  %vm4682_vm14 = vmor %vm1101_vm7, %vm1102_vm9  ;;  %v154_v23 = vld [vmem:[%s8089_s2 + $0x188] sm:$0xff] }
  0xdc   :  { %v4662_v26 = vpop.eup %3527  ;;  %v1115_v2 = vadd.f32 %v4404_v63, %v1114_v51  ;;  %vm4665_vm11 = vcmp.eq.f32.partialorder %v1105_v56, 8.507059e+37  ;;  %vm1416_vm12 = vweird.f32 %v4268_v34  ;;  %vm1417_vm13 = vweird.f32 %v4330_v6 }
  0xdd   :  { %v3530_v5 = vpop.eup %3529  ;;  %v1099_v16 = vmul.f32 %v4317_v1, %v1098_v10  ;;  %v1108_v44 = vor.u32 1.1754944e-38, %v1107_v4  ;;  %v1413_v18 = vsub.f32 1.0, %v1412_v47  ;;  %v1420_v33 = vand.u32 2147483647, %v4268_v34  ;;  %vm4706_vm15 = vmor %vm1416_vm12, %vm1417_vm13 }
  0xde   :  { %v3532_v19 = vpop.eup %3531  ;;  %v4673_v22 = vadd.f32 1.0, %v3530_v5  ;;  %v1119_v32 = vsel %vm4651_vm10, %v4404_v63, %v1115_v2  ;;  %v1422_v11 = vand.u32 2147483648, %v4268_v34  ;;  %v488_v25 = vadd.f32 %v487_v54, %v113_v8 }
  0xdf   :  { %v3534_v31 = vpop.eup %3533  ;;  %v4687_v29 = vadd.f32 1.0, %v3532_v19  ;;  %v1124_v39 = vsel %vm4636_vm8, %v1123_v61, %v1119_v32  ;;  %v1100_v7 = vadd.f32 %v4317_v1, %v1099_v16  ;;  %v1414_v63 = vmul.f32 %v4330_v6, %v1413_v18 }
  0xe0   :  { %3535 = vrcp.f32 %v4673_v22  ;;  %v4700_v37 = vadd.f32 1.0, %v3534_v31  ;;  %2501 = vperm.xlu2 %3424, %v1124_v39   ;;  %vm1421_vm0 = vcmp.eq.f32.partialorder %v1420_v33, 8.507059e+37  ;;  %v1423_v30 = vor.u32 1.1754944e-38, %v1422_v11  ;;  %v490_v31 = vpop.f32.mrf.mxu0 }
  0xe1   :  { %3537 = vrcp.f32 %v4687_v29  ;;  %v1104_v40 = vsel %vm4682_vm14, %v4317_v1, %v1100_v7  ;;  %v1415_v9 = vadd.f32 %v4330_v6, %v1414_v63  ;;  %v3333_v46 = vmul.f32 -1.442695, %v488_v25  ;;  %v114_v25 = vld [vmem:[%s8089_s2 + $0x48] sm:$0xff]  ;;  %v79_v63 = vld [vmem:[%s8088_s1 + $0x1f0] sm:$0xff] }
  0xe2   :  { %3539 = vrcp.f32 %v4700_v37  ;;  %v1109_v34 = vsel %vm4665_vm11, %v1108_v44, %v1104_v40  ;;  %v611_v51 = vadd.f32 %v610_v55, %v154_v23  ;;  %v671_v48 = vadd.f32 %v670_v41, %v174_v14  ;;  %v58_v44 = vld [vmem:[%s8088_s1 + $0x148] sm:$0xff]  ;;  %3303 = vmatmul.msk.f32.gmra.mxu2 %vm189_vm1, %v79_v63 }
  0xe3   :  { %2496 = vperm.xlu1 %3423, %v1109_v34   ;;  %v1419_v56 = vsel %vm4706_vm15, %v4330_v6, %v1415_v9  ;;  %3541 = vpow2.f32 %v3333_v46  ;;  %v1127_v62 = vmul.f32 %v4459_v35, %v4399_v60  ;;  %vm1131_vm2 = vweird.f32 %v4399_v60  ;;  %3282 = vmatmul.msk.f32.gmra.mxu1 %vm189_vm1, %v58_v44 }
  0xe4   :  { %v1424_v1 = vsel %vm1421_vm0, %v1423_v30, %v1419_v56  ;;  %v3374_v52 = vmul.f32 -1.442695, %v611_v51  ;;  %v3394_v61 = vmul.f32 -1.442695, %v671_v48  ;;  %vm1132_vm3 = vweird.f32 %v4459_v35  ;;  %v550_v30 = vpop.f32.mrf.mxu1  ;;  %v175_v48 = vld [vmem:[%s8089_s2 + $0x230] sm:$0xff] }
  0xe5   :  { %2601 = vperm.xlu0 %3422, %v1424_v1   ;;  %v1128_v10 = vsub.f32 1.0, %v1127_v62  ;;  %v1135_v4 = vand.u32 2147483647, %v4399_v60  ;;  %v1137_v47 = vand.u32 2147483648, %v4399_v60  ;;  %v1427_v6 = vmul.f32 %v4423_v12, %v4359_v28  ;;  %vm4750_vm7 = vmor %vm1131_vm2, %vm1132_vm3 }
  0xe6   :  { %v4729_v8 = vpop.eup %3535  ;;  %3543 = vpow2.f32 %v3374_v52  ;;  %vm1431_vm4 = vweird.f32 %v4359_v28  ;;  %vm1432_vm5 = vweird.f32 %v4423_v12  ;;  %v1435_v54 = vand.u32 2147483647, %v4359_v28 }
  0xe7   :  { %v4734_v2 = vpop.eup %3537  ;;  %3545 = vpow2.f32 %v3394_v61  ;;  %v1129_v36 = vmul.f32 %v4459_v35, %v1128_v10  ;;  %vm4737_vm6 = vcmp.eq.f32.partialorder %v1135_v4, 8.507059e+37  ;;  %v1138_v16 = vor.u32 1.1754944e-38, %v1137_v47  ;;  %vm4786_vm11 = vmor %vm1431_vm4, %vm1432_vm5 }
  0xe8   :  { %v4744_v18 = vpop.eup %3539  ;;  %v1428_v19 = vsub.f32 1.0, %v1427_v6  ;;  %vm4754_vm8 = vcmp.eq.f32.partialorder %v1435_v54, 8.507059e+37  ;;  %v1437_v24 = vand.u32 2147483648, %v4359_v28  ;;  %v1727_v11 = vmul.f32 %v4429_v13, %v4370_v38 }
  0xe9   :  { %v3542_v60 = vpop.eup %3541  ;;  %v1130_v39 = vadd.f32 %v4459_v35, %v1129_v36  ;;  %vm1731_vm9 = vweird.f32 %v4370_v38  ;;  %vm1732_vm10 = vweird.f32 %v4429_v13  ;;  %v1735_v7 = vand.u32 2147483647, %v4370_v38 }
  0xea   :  { %v4772_v23 = vadd.f32 1.0, %v3542_v60  ;;  %v1429_v55 = vmul.f32 %v4423_v12, %v1428_v19  ;;  %v1438_v14 = vor.u32 1.1754944e-38, %v1437_v24  ;;  %v1728_v41 = vsub.f32 1.0, %v1727_v11  ;;  %vm4809_vm13 = vmor %vm1731_vm9, %vm1732_vm10 }
  0xeb   :  { %v1134_v40 = vsel %vm4750_vm7, %v4459_v35, %v1130_v39  ;;  %vm4790_vm12 = vcmp.eq.f32.partialorder %v1735_v7, 8.507059e+37  ;;  %v1737_v34 = vand.u32 2147483648, %v4370_v38  ;;  %v491_v51 = vadd.f32 %v490_v31, %v114_v25  ;;  %v673_v35 = vpop.f32.mrf.mxu3 }
  0xec   :  { %v3544_v56 = vpop.eup %3543  ;;  %3547 = vrcp.f32 %v4772_v23  ;;  %v1139_v28 = vsel %vm4737_vm6, %v1138_v16, %v1134_v40  ;;  %v1430_v62 = vadd.f32 %v4423_v12, %v1429_v55  ;;  %v1729_v1 = vmul.f32 %v4429_v13, %v1728_v41  ;;  %v100_v40 = vld [vmem:[%s8088_s1 + $0x298] sm:$0xff] }
  0xed   :  { %v3546_v52 = vpop.eup %3545  ;;  %v4803_v61 = vadd.f32 1.0, %v3544_v56  ;;  %2506 = vperm.xlu2 %3424, %v1139_v28   ;;  %v1738_v4 = vor.u32 1.1754944e-38, %v1737_v34  ;;  %v3334_v47 = vmul.f32 -1.442695, %v491_v51  ;;  %v551_v6 = vadd.f32 %v550_v30, %v134_v43  ;;  %3324 = vmatmul.msk.f32.gmra.mxu3 %vm189_vm1, %v100_v40 }
  0xee   :  { %v4813_v54 = vadd.f32 1.0, %v3546_v52  ;;  %v1434_v36 = vsel %vm4786_vm11, %v4423_v12, %v1430_v62  ;;  %v1730_v5 = vadd.f32 %v4429_v13, %v1729_v1  ;;  %v674_v16 = vadd.f32 %v673_v35, %v175_v48  ;;  %v115_v48 = vld [vmem:[%s8089_s2 + $0x50] sm:$0xff]  ;;  %v493_v35 = vpop.f32.mrf.mxu0 }
  0xef   :  { %3549 = vrcp.f32 %v4803_v61  ;;  %v1439_v38 = vsel %vm4754_vm8, %v1438_v14, %v1434_v36  ;;  %v3354_v44 = vmul.f32 -1.442695, %v551_v6  ;;  %v1442_v33 = vmul.f32 %v4551_v45, %v4502_v49 }
  0xf0   :  { %3551 = vrcp.f32 %v4813_v54  ;;  %2606 = vperm.xlu1 %3423, %v1439_v38   ;;  %v1734_v19 = vsel %vm4809_vm13, %v4429_v13, %v1730_v5  ;;  %v3395_v12 = vmul.f32 -1.442695, %v674_v16  ;;  %vm1446_vm14 = vweird.f32 %v4502_v49  ;;  %v136_v5 = vld [vmem:[%s8089_s2 + $0xf8] sm:$0xff] }
  0xf1   :  { %v1739_v24 = vsel %vm4790_vm12, %v1738_v4, %v1734_v19  ;;  %3553 = vpow2.f32 %v3334_v47  ;;  %v1443_v32 = vsub.f32 1.0, %v1442_v33  ;;  %vm1447_vm15 = vweird.f32 %v4551_v45  ;;  %v135_v4 = vld [vmem:[%s8089_s2 + $0xf0] sm:$0xff]  ;;  %v553_v47 = vpop.f32.mrf.mxu1 }
  0xf2   :  { %v4832_v11 = vpop.eup %3547  ;;  %2706 = vperm.xlu0 %3422, %v1739_v24   ;;  %3555 = vpow2.f32 %v3354_v44  ;;  %v1450_v25 = vand.u32 2147483647, %v4502_v49  ;;  %v1452_v31 = vand.u32 2147483648, %v4502_v49  ;;  %v1742_v13 = vmul.f32 %v4446_v21, %v4392_v27  ;;  %vm4843_vm3 = vmor %vm1446_vm14, %vm1447_vm15  ;;  %v613_v24 = vpop.f32.mrf.mxu2 }
  0xf3   :  { %3557 = vpow2.f32 %v3395_v12  ;;  %v1444_v60 = vmul.f32 %v4551_v45, %v1443_v32  ;;  %vm1746_vm0 = vweird.f32 %v4392_v27  ;;  %vm1747_vm2 = vweird.f32 %v4446_v21  ;;  %v155_v12 = vld [vmem:[%s8089_s2 + $0x190] sm:$0xff] }
  0xf4   :  { %vm4847_vm4 = vcmp.eq.f32.partialorder %v1450_v25, 8.507059e+37  ;;  %v1453_v63 = vor.u32 1.1754944e-38, %v1452_v31  ;;  %v1743_v55 = vsub.f32 1.0, %v1742_v13  ;;  %v1750_v14 = vand.u32 2147483647, %v4392_v27  ;;  %vm4882_vm8 = vmor %vm1746_vm0, %vm1747_vm2  ;;  %v156_v31 = vld [vmem:[%s8089_s2 + $0x198] sm:$0xff] }
  0xf5   :  { %v4852_v41 = vpop.eup %3549  ;;  %v1445_v43 = vadd.f32 %v4551_v45, %v1444_v60  ;;  %v1752_v30 = vand.u32 2147483648, %v4392_v27  ;;  %v2042_v49 = vmul.f32 %v4472_v42, %v4407_v3  ;;  %vm2046_vm5 = vweird.f32 %v4407_v3 }
  0xf6   :  { %v4862_v9 = vpop.eup %3551  ;;  %v1744_v46 = vmul.f32 %v4446_v21, %v1743_v55  ;;  %vm4865_vm6 = vcmp.eq.f32.partialorder %v1750_v14, 8.507059e+37  ;;  %vm2047_vm7 = vweird.f32 %v4472_v42  ;;  %v2050_v51 = vand.u32 2147483647, %v4407_v3 }
  0xf7   :  { %v3554_v56 = vpop.eup %3553  ;;  %v1449_v28 = vsel %vm4843_vm3, %v4551_v45, %v1445_v43  ;;  %v1753_v1 = vor.u32 1.1754944e-38, %v1752_v30  ;;  %v2043_v52 = vsub.f32 1.0, %v2042_v49  ;;  %v2052_v10 = vand.u32 2147483648, %v4407_v3  ;;  %vm4915_vm9 = vmor %vm2046_vm5, %vm2047_vm7 }
  0xf8   :  { %v3556_v6 = vpop.eup %3555  ;;  %v4890_v36 = vadd.f32 1.0, %v3554_v56  ;;  %v1454_v45 = vsel %vm4847_vm4, %v1453_v63, %v1449_v28  ;;  %v1745_v27 = vadd.f32 %v4446_v21, %v1744_v46  ;;  %vm4895_vm1 = vcmp.eq.f32.partialorder %v2050_v51, 8.507059e+37 }
  0xf9   :  { %v3558_v16 = vpop.eup %3557  ;;  %v4899_v38 = vadd.f32 1.0, %v3556_v6  ;;  %2611 = vperm.xlu2 %3424, %v1454_v45   ;;  %v2044_v44 = vmul.f32 %v4472_v42, %v2043_v52  ;;  %v2053_v33 = vor.u32 1.1754944e-38, %v2052_v10  ;;  %v494_v19 = vadd.f32 %v493_v35, %v115_v48 }
  0xfa   :  { %3559 = vrcp.f32 %v4890_v36  ;;  %v4906_v32 = vadd.f32 1.0, %v3558_v16  ;;  %v1749_v25 = vsel %vm4882_vm8, %v4446_v21, %v1745_v27  ;;  %v554_v13 = vadd.f32 %v553_v47, %v135_v4  ;;  %v556_v16 = vpop.f32.mrf.mxu1 }
  0xfb   :  { %3561 = vrcp.f32 %v4899_v38  ;;  %v1754_v60 = vsel %vm4865_vm6, %v1753_v1, %v1749_v25  ;;  %v2045_v39 = vadd.f32 %v4472_v42, %v2044_v44  ;;  %v3335_v7 = vmul.f32 -1.442695, %v494_v19 }
  0xfc   :  { %3563 = vrcp.f32 %v4906_v32  ;;  %2711 = vperm.xlu1 %3423, %v1754_v60   ;;  %v3355_v21 = vmul.f32 -1.442695, %v554_v13  ;;  %v614_v63 = vadd.f32 %v613_v24, %v155_v12  ;;  %v1757_v3 = vmul.f32 %v4662_v26, %v4601_v57  ;;  %v616_v13 = vpop.f32.mrf.mxu2 }
  0xfd   :  { %v2049_v55 = vsel %vm4915_vm9, %v4472_v42, %v2045_v39  ;;  %3565 = vpow2.f32 %v3335_v7  ;;  %vm1761_vm10 = vweird.f32 %v4601_v57  ;;  %vm1762_vm11 = vweird.f32 %v4662_v26  ;;  %v176_v7 = vld [vmem:[%s8089_s2 + $0x238] sm:$0xff] }
  0xfe   :  { %v2054_v14 = vsel %vm4895_vm1, %v2053_v33, %v2049_v55  ;;  %3567 = vpow2.f32 %v3355_v21  ;;  %v3375_v43 = vmul.f32 -1.442695, %v614_v63  ;;  %v1758_v30 = vsub.f32 1.0, %v1757_v3  ;;  %vm4949_vm14 = vmor %vm1761_vm10, %vm1762_vm11  ;;  %v676_v21 = vpop.f32.mrf.mxu3 }
  0xff   :  { %2811 = vperm.xlu0 %3422, %v2054_v14   ;;  %v1765_v49 = vand.u32 2147483647, %v4601_v57  ;;  %v1767_v40 = vand.u32 2147483648, %v4601_v57  ;;  %v2057_v46 = vmul.f32 %v4558_v50, %v4507_v17  ;;  %vm2061_vm12 = vweird.f32 %v4507_v17 }
 0x100   :  { %v4938_v42 = vpop.eup %3559  ;;  %3569 = vpow2.f32 %v3375_v43  ;;  %v1759_v34 = vmul.f32 %v4662_v26, %v1758_v30  ;;  %vm2062_vm13 = vweird.f32 %v4558_v50  ;;  %v2065_v51 = vand.u32 2147483647, %v4507_v17 }
 0x101   :  { %v4943_v48 = vpop.eup %3561  ;;  %vm4953_vm15 = vcmp.eq.f32.partialorder %v1765_v49, 8.507059e+37  ;;  %v1768_v28 = vor.u32 1.1754944e-38, %v1767_v40  ;;  %v2058_v62 = vsub.f32 1.0, %v2057_v46  ;;  %v2067_v1 = vand.u32 2147483648, %v4507_v17  ;;  %vm4983_vm4 = vmor %vm2061_vm12, %vm2062_vm13 }
 0x102   :  { %v4958_v52 = vpop.eup %3563  ;;  %v1760_v10 = vadd.f32 %v4662_v26, %v1759_v34  ;;  %vm4961_vm0 = vcmp.eq.f32.partialorder %v2065_v51, 8.507059e+37  ;;  %v1142_v57 = vmul.f32 %v4536_v59, %v4494_v0  ;;  %vm1146_vm2 = vweird.f32 %v4494_v0 }
 0x103   :  { %v3566_v47 = vpop.eup %3565  ;;  %v2059_v6 = vmul.f32 %v4558_v50, %v2058_v62  ;;  %v2068_v45 = vor.u32 1.1754944e-38, %v2067_v1  ;;  %vm1147_vm3 = vweird.f32 %v4536_v59  ;;  %v1150_v27 = vand.u32 2147483647, %v4494_v0 }
 0x104   :  { %v3568_v44 = vpop.eup %3567  ;;  %v4974_v33 = vadd.f32 1.0, %v3566_v47  ;;  %v1764_v19 = vsel %vm4949_vm14, %v4662_v26, %v1760_v10  ;;  %v1143_v24 = vsub.f32 1.0, %v1142_v57  ;;  %v1152_v25 = vand.u32 2147483648, %v4494_v0  ;;  %vm5015_vm6 = vmor %vm1146_vm2, %vm1147_vm3 }
 0x105   :  { %v4991_v60 = vadd.f32 1.0, %v3568_v44  ;;  %v1769_v26 = vsel %vm4953_vm15, %v1768_v28, %v1764_v19  ;;  %v2060_v39 = vadd.f32 %v4558_v50, %v2059_v6  ;;  %vm4996_vm5 = vcmp.eq.f32.partialorder %v1150_v27, 8.507059e+37 }
 0x106   :  { %v3570_v63 = vpop.eup %3569  ;;  %3571 = vrcp.f32 %v4974_v33  ;;  %2716 = vperm.xlu2 %3424, %v1769_v26   ;;  %v1144_v3 = vmul.f32 %v4536_v59, %v1143_v24  ;;  %v1153_v55 = vor.u32 1.1754944e-38, %v1152_v25  ;;  %v557_v14 = vadd.f32 %v556_v16, %v136_v5  ;;  %v116_v24 = vld [vmem:[%s8089_s2 + $0x58] sm:$0xff]  ;;  %v496_v25 = vpop.f32.mrf.mxu0 }
 0x107   :  { %3573 = vrcp.f32 %v4991_v60  ;;  %v5006_v43 = vadd.f32 1.0, %v3570_v63  ;;  %v2064_v30 = vsel %vm4983_vm4, %v4558_v50, %v2060_v39  ;;  %v617_v40 = vadd.f32 %v616_v13, %v156_v31 }
 0x108   :  { %v2069_v46 = vsel %vm4961_vm0, %v2068_v45, %v2064_v30  ;;  %v1145_v34 = vadd.f32 %v4536_v59, %v1144_v3  ;;  %v3356_v51 = vmul.f32 -1.442695, %v557_v14  ;;  %v677_v35 = vadd.f32 %v676_v21, %v176_v7 }
 0x109   :  { %3575 = vrcp.f32 %v5006_v43  ;;  %2816 = vperm.xlu1 %3423, %v2069_v46   ;;  %v3376_v50 = vmul.f32 -1.442695, %v617_v40  ;;  %v2072_v56 = vmul.f32 %v4744_v18, %v4700_v37  ;;  %vm2076_vm7 = vweird.f32 %v4700_v37 }
 0x10a   :  { %v1149_v0 = vsel %vm5015_vm6, %v4536_v59, %v1145_v34  ;;  %3577 = vpow2.f32 %v3356_v51  ;;  %v3396_v28 = vmul.f32 -1.442695, %v677_v35  ;;  %vm2077_vm8 = vweird.f32 %v4744_v18  ;;  %v619_v35 = vpop.f32.mrf.mxu2 }
 0x10b   :  { %v1154_v62 = vsel %vm4996_vm5, %v1153_v55, %v1149_v0  ;;  %3579 = vpow2.f32 %v3376_v50  ;;  %v2073_v1 = vsub.f32 1.0, %v2072_v56  ;;  %v2080_v10 = vand.u32 2147483647, %v4700_v37  ;;  %vm5052_vm11 = vmor %vm2076_vm7, %vm2077_vm8  ;;  %v177_v50 = vld [vmem:[%s8089_s2 + $0x240] sm:$0xff]  ;;  %v679_v56 = vpop.f32.mrf.mxu3 }
 0x10c   :  { %v5033_v4 = vpop.eup %3571  ;;  %2511 = vperm.xlu0 %3422, %v1154_v62   ;;  %3581 = vpow2.f32 %v3396_v28  ;;  %v2082_v57 = vand.u32 2147483648, %v4700_v37  ;;  %v1157_v59 = vmul.f32 %v4633_v53, %v4581_v15  ;;  %vm1161_vm1 = vweird.f32 %v4581_v15 }
 0x10d   :  { %v5039_v47 = vpop.eup %3573  ;;  %v2074_v6 = vmul.f32 %v4744_v18, %v2073_v1  ;;  %vm5042_vm9 = vcmp.eq.f32.partialorder %v2080_v10, 8.507059e+37  ;;  %vm1162_vm10 = vweird.f32 %v4633_v53  ;;  %v1165_v27 = vand.u32 2147483647, %v4581_v15 }
 0x10e   :  { %v2083_v16 = vor.u32 1.1754944e-38, %v2082_v57  ;;  %v1158_v44 = vsub.f32 1.0, %v1157_v59  ;;  %v1167_v19 = vand.u32 2147483648, %v4581_v15  ;;  %v1457_v12 = vmul.f32 %v4645_v58, %v4596_v20  ;;  %vm5082_vm15 = vmor %vm1161_vm1, %vm1162_vm10  ;;  %v157_v15 = vld [vmem:[%s8089_s2 + $0x1a0] sm:$0xff] }
 0x10f   :  { %v5062_v31 = vpop.eup %3575  ;;  %v2075_v37 = vadd.f32 %v4744_v18, %v2074_v6  ;;  %vm5065_vm12 = vcmp.eq.f32.partialorder %v1165_v27, 8.507059e+37  ;;  %vm1461_vm13 = vweird.f32 %v4596_v20  ;;  %vm1462_vm14 = vweird.f32 %v4645_v58 }
 0x110   :  { %v3578_v26 = vpop.eup %3577  ;;  %v1159_v39 = vmul.f32 %v4633_v53, %v1158_v44  ;;  %v1168_v17 = vor.u32 1.1754944e-38, %v1167_v19  ;;  %v1458_v7 = vsub.f32 1.0, %v1457_v12  ;;  %v1465_v21 = vand.u32 2147483647, %v4596_v20  ;;  %vm5106_vm0 = vmor %vm1461_vm13, %vm1462_vm14 }
 0x111   :  { %v3580_v63 = vpop.eup %3579  ;;  %v5073_v3 = vadd.f32 1.0, %v3578_v26  ;;  %v2079_v55 = vsel %vm5052_vm11, %v4744_v18, %v2075_v37  ;;  %v1467_v30 = vand.u32 2147483648, %v4596_v20  ;;  %v497_v49 = vadd.f32 %v496_v25, %v116_v24 }
 0x112   :  { %v3582_v40 = vpop.eup %3581  ;;  %v5087_v46 = vadd.f32 1.0, %v3580_v63  ;;  %v2084_v34 = vsel %vm5042_vm9, %v2083_v16, %v2079_v55  ;;  %v1160_v51 = vadd.f32 %v4633_v53, %v1159_v39  ;;  %v1459_v18 = vmul.f32 %v4645_v58, %v1458_v7 }
 0x113   :  { %3583 = vrcp.f32 %v5073_v3  ;;  %v5100_v0 = vadd.f32 1.0, %v3582_v40  ;;  %2821 = vperm.xlu2 %3424, %v2084_v34   ;;  %vm1466_vm2 = vcmp.eq.f32.partialorder %v1465_v21, 8.507059e+37  ;;  %v1468_v62 = vor.u32 1.1754944e-38, %v1467_v30  ;;  %v117_v30 = vld [vmem:[%s8089_s2 + $0x60] sm:$0xff] }
 0x114   :  { %3585 = vrcp.f32 %v5087_v46  ;;  %v1164_v1 = vsel %vm5082_vm15, %v4633_v53, %v1160_v51  ;;  %v1460_v10 = vadd.f32 %v4645_v58, %v1459_v18  ;;  %v3336_v57 = vmul.f32 -1.442695, %v497_v49  ;;  %v499_v49 = vpop.f32.mrf.mxu0 }
 0x115   :  { %3587 = vrcp.f32 %v5100_v0  ;;  %v1169_v20 = vsel %vm5065_vm12, %v1168_v17, %v1164_v1  ;;  %v620_v59 = vadd.f32 %v619_v35, %v157_v15  ;;  %v680_v6 = vadd.f32 %v679_v56, %v177_v50  ;;  %v137_v50 = vld [vmem:[%s8089_s2 + $0x100] sm:$0xff]  ;;  %v559_v56 = vpop.f32.mrf.mxu1 }
 0x116   :  { %2516 = vperm.xlu1 %3423, %v1169_v20   ;;  %v1464_v45 = vsel %vm5106_vm0, %v4645_v58, %v1460_v10  ;;  %3589 = vpow2.f32 %v3336_v57  ;;  %v1172_v27 = vmul.f32 %v4832_v11, %v4772_v23  ;;  %vm1176_vm3 = vweird.f32 %v4772_v23  ;;  %v178_v20 = vld [vmem:[%s8089_s2 + $0x248] sm:$0xff] }
 0x117   :  { %v1469_v53 = vsel %vm1466_vm2, %v1468_v62, %v1464_v45  ;;  %v3377_v5 = vmul.f32 -1.442695, %v620_v59  ;;  %v3397_v16 = vmul.f32 -1.442695, %v680_v6  ;;  %vm1177_vm4 = vweird.f32 %v4832_v11 }
 0x118   :  { %2616 = vperm.xlu0 %3422, %v1469_v53   ;;  %v1173_v44 = vsub.f32 1.0, %v1172_v27  ;;  %v1180_v19 = vand.u32 2147483647, %v4772_v23  ;;  %v1182_v12 = vand.u32 2147483648, %v4772_v23  ;;  %v1472_v58 = vmul.f32 %v4729_v8, %v4673_v22  ;;  %vm5147_vm8 = vmor %vm1176_vm3, %vm1177_vm4 }
 0x119   :  { %v5129_v24 = vpop.eup %3583  ;;  %3591 = vpow2.f32 %v3377_v5  ;;  %vm1476_vm5 = vweird.f32 %v4673_v22  ;;  %vm1477_vm6 = vweird.f32 %v4729_v8  ;;  %v1480_v25 = vand.u32 2147483647, %v4673_v22  ;;  %v138_v5 = vld [vmem:[%s8089_s2 + $0x108] sm:$0xff] }
 0x11a   :  { %v5134_v37 = vpop.eup %3585  ;;  %3593 = vpow2.f32 %v3397_v16  ;;  %v1174_v13 = vmul.f32 %v4832_v11, %v1173_v44  ;;  %vm5137_vm7 = vcmp.eq.f32.partialorder %v1180_v19, 8.507059e+37  ;;  %v1183_v39 = vor.u32 1.1754944e-38, %v1182_v12  ;;  %vm5178_vm11 = vmor %vm1476_vm5, %vm1477_vm6 }
 0x11b   :  { %v5141_v17 = vpop.eup %3587  ;;  %v1473_v21 = vsub.f32 1.0, %v1472_v58  ;;  %vm5151_vm1 = vcmp.eq.f32.partialorder %v1480_v25, 8.507059e+37  ;;  %v1482_v55 = vand.u32 2147483648, %v4673_v22  ;;  %v1772_v14 = vmul.f32 %v4734_v2, %v4687_v29 }
 0x11c   :  { %v3590_v23 = vpop.eup %3589  ;;  %v1175_v40 = vadd.f32 %v4832_v11, %v1174_v13  ;;  %vm1776_vm9 = vweird.f32 %v4687_v29  ;;  %vm1777_vm10 = vweird.f32 %v4734_v2  ;;  %v1780_v34 = vand.u32 2147483647, %v4687_v29 }
 0x11d   :  { %v5165_v51 = vadd.f32 1.0, %v3590_v23  ;;  %v1474_v18 = vmul.f32 %v4729_v8, %v1473_v21  ;;  %v1483_v15 = vor.u32 1.1754944e-38, %v1482_v55  ;;  %v1773_v35 = vsub.f32 1.0, %v1772_v14  ;;  %vm5201_vm13 = vmor %vm1776_vm9, %vm1777_vm10 }
 0x11e   :  { %v1179_v28 = vsel %vm5147_vm8, %v4832_v11, %v1175_v40  ;;  %vm5182_vm12 = vcmp.eq.f32.partialorder %v1780_v34, 8.507059e+37  ;;  %v1782_v10 = vand.u32 2147483648, %v4687_v29  ;;  %v500_v57 = vadd.f32 %v499_v49, %v117_v30  ;;  %v682_v11 = vpop.f32.mrf.mxu3 }
 0x11f   :  { %v3592_v59 = vpop.eup %3591  ;;  %3595 = vrcp.f32 %v5165_v51  ;;  %v1184_v22 = vsel %vm5137_vm7, %v1183_v39, %v1179_v28  ;;  %v1475_v6 = vadd.f32 %v4729_v8, %v1474_v18  ;;  %v1774_v45 = vmul.f32 %v4734_v2, %v1773_v35 }
 0x120   :  { %v3594_v27 = vpop.eup %3593  ;;  %v5195_v53 = vadd.f32 1.0, %v3592_v59  ;;  %2521 = vperm.xlu2 %3424, %v1184_v22   ;;  %v1783_v16 = vor.u32 1.1754944e-38, %v1782_v10  ;;  %v3337_v44 = vmul.f32 -1.442695, %v500_v57  ;;  %v560_v19 = vadd.f32 %v559_v56, %v137_v50  ;;  %v118_v57 = vld [vmem:[%s8089_s2 + $0x68] sm:$0xff] }
 0x121   :  { %v5205_v12 = vadd.f32 1.0, %v3594_v27  ;;  %v1479_v58 = vsel %vm5178_vm11, %v4729_v8, %v1475_v6  ;;  %v1775_v25 = vadd.f32 %v4734_v2, %v1774_v45  ;;  %v683_v13 = vadd.f32 %v682_v11, %v178_v20  ;;  %v502_v20 = vpop.f32.mrf.mxu0 }
 0x122   :  { %3597 = vrcp.f32 %v5195_v53  ;;  %v1484_v29 = vsel %vm5151_vm1, %v1483_v15, %v1479_v58  ;;  %v3357_v26 = vmul.f32 -1.442695, %v560_v19  ;;  %v1487_v39 = vmul.f32 %v4943_v48, %v4899_v38  ;;  %v139_v58 = vld [vmem:[%s8089_s2 + $0x110] sm:$0xff] }
 0x123   :  { %3599 = vrcp.f32 %v5205_v12  ;;  %2621 = vperm.xlu1 %3423, %v1484_v29   ;;  %v1779_v7 = vsel %vm5201_vm13, %v4734_v2, %v1775_v25  ;;  %v3398_v8 = vmul.f32 -1.442695, %v683_v13  ;;  %vm1491_vm14 = vweird.f32 %v4899_v38 }
 0x124   :  { %v1784_v21 = vsel %vm5182_vm12, %v1783_v16, %v1779_v7  ;;  %3601 = vpow2.f32 %v3337_v44  ;;  %v1488_v63 = vsub.f32 1.0, %v1487_v39  ;;  %vm1492_vm15 = vweird.f32 %v4943_v48  ;;  %v562_v16 = vpop.f32.mrf.mxu1  ;;  %v158_v7 = vld [vmem:[%s8089_s2 + $0x1a8] sm:$0xff] }
 0x125   :  { %v5224_v55 = vpop.eup %3595  ;;  %2721 = vperm.xlu0 %3422, %v1784_v21   ;;  %3603 = vpow2.f32 %v3357_v26  ;;  %v1495_v14 = vand.u32 2147483647, %v4899_v38  ;;  %v1497_v30 = vand.u32 2147483648, %v4899_v38  ;;  %v1787_v2 = vmul.f32 %v4852_v41, %v4803_v61  ;;  %vm5235_vm3 = vmor %vm1491_vm14, %vm1492_vm15 }
 0x126   :  { %3605 = vpow2.f32 %v3398_v8  ;;  %v1489_v49 = vmul.f32 %v4943_v48, %v1488_v63  ;;  %vm1791_vm0 = vweird.f32 %v4803_v61  ;;  %vm1792_vm2 = vweird.f32 %v4852_v41  ;;  %v622_v8 = vpop.f32.mrf.mxu2 }
 0x127   :  { %vm5239_vm4 = vcmp.eq.f32.partialorder %v1495_v14, 8.507059e+37  ;;  %v1498_v34 = vor.u32 1.1754944e-38, %v1497_v30  ;;  %v1788_v18 = vsub.f32 1.0, %v1787_v2  ;;  %v1795_v15 = vand.u32 2147483647, %v4803_v61  ;;  %vm5270_vm8 = vmor %vm1791_vm0, %vm1792_vm2  ;;  %v159_v14 = vld [vmem:[%s8089_s2 + $0x1b0] sm:$0xff] }
 0x128   :  { %v5244_v35 = vpop.eup %3597  ;;  %v1490_v50 = vadd.f32 %v4943_v48, %v1489_v49  ;;  %v1797_v56 = vand.u32 2147483648, %v4803_v61  ;;  %v2087_v38 = vmul.f32 %v4862_v9, %v4813_v54  ;;  %vm2091_vm5 = vweird.f32 %v4813_v54 }
 0x129   :  { %v5251_v28 = vpop.eup %3599  ;;  %v1789_v62 = vmul.f32 %v4852_v41, %v1788_v18  ;;  %vm5254_vm6 = vcmp.eq.f32.partialorder %v1795_v15, 8.507059e+37  ;;  %vm2092_vm7 = vweird.f32 %v4862_v9  ;;  %v2095_v10 = vand.u32 2147483647, %v4813_v54 }
 0x12a   :  { %v3602_v11 = vpop.eup %3601  ;;  %v1494_v59 = vsel %vm5235_vm3, %v4943_v48, %v1490_v50  ;;  %v1798_v6 = vor.u32 1.1754944e-38, %v1797_v56  ;;  %v2088_v45 = vsub.f32 1.0, %v2087_v38  ;;  %v2097_v27 = vand.u32 2147483648, %v4813_v54  ;;  %vm5303_vm9 = vmor %vm2091_vm5, %vm2092_vm7 }
 0x12b   :  { %v3604_v44 = vpop.eup %3603  ;;  %v5278_v19 = vadd.f32 1.0, %v3602_v11  ;;  %v1499_v48 = vsel %vm5239_vm4, %v1498_v34, %v1494_v59  ;;  %v1790_v61 = vadd.f32 %v4852_v41, %v1789_v62  ;;  %vm5283_vm1 = vcmp.eq.f32.partialorder %v2095_v10, 8.507059e+37 }
 0x12c   :  { %v3606_v25 = vpop.eup %3605  ;;  %v5287_v13 = vadd.f32 1.0, %v3604_v44  ;;  %2626 = vperm.xlu2 %3424, %v1499_v48   ;;  %v2089_v29 = vmul.f32 %v4862_v9, %v2088_v45  ;;  %v2098_v26 = vor.u32 1.1754944e-38, %v2097_v27  ;;  %v503_v39 = vadd.f32 %v502_v20, %v118_v57 }
 0x12d   :  { %3607 = vrcp.f32 %v5278_v19  ;;  %v5294_v21 = vadd.f32 1.0, %v3606_v25  ;;  %v1794_v63 = vsel %vm5270_vm8, %v4852_v41, %v1790_v61  ;;  %v563_v30 = vadd.f32 %v562_v16, %v138_v5  ;;  %v565_v25 = vpop.f32.mrf.mxu1 }
 0x12e   :  { %3609 = vrcp.f32 %v5287_v13  ;;  %v1799_v2 = vsel %vm5254_vm6, %v1798_v6, %v1794_v63  ;;  %v2090_v49 = vadd.f32 %v4862_v9, %v2089_v29  ;;  %v3338_v23 = vmul.f32 -1.442695, %v503_v39 }
 0x12f   :  { %3611 = vrcp.f32 %v5294_v21  ;;  %2726 = vperm.xlu1 %3423, %v1799_v2   ;;  %v3358_v41 = vmul.f32 -1.442695, %v563_v30  ;;  %v623_v40 = vadd.f32 %v622_v8, %v158_v7  ;;  %v1802_v54 = vmul.f32 %v5062_v31, %v5006_v43  ;;  %v625_v30 = vpop.f32.mrf.mxu2 }
 0x130   :  { %v2094_v34 = vsel %vm5303_vm9, %v4862_v9, %v2090_v49  ;;  %3613 = vpow2.f32 %v3338_v23  ;;  %vm1806_vm10 = vweird.f32 %v5006_v43  ;;  %vm1807_vm11 = vweird.f32 %v5062_v31  ;;  %v179_v23 = vld [vmem:[%s8089_s2 + $0x250] sm:$0xff] }
 0x131   :  { %v2099_v18 = vsel %vm5283_vm1, %v2098_v26, %v2094_v34  ;;  %3615 = vpow2.f32 %v3358_v41  ;;  %v3378_v15 = vmul.f32 -1.442695, %v623_v40  ;;  %v1803_v50 = vsub.f32 1.0, %v1802_v54  ;;  %vm5337_vm14 = vmor %vm1806_vm10, %vm1807_vm11  ;;  %v685_v41 = vpop.f32.mrf.mxu3 }
 0x132   :  { %2826 = vperm.xlu0 %3422, %v2099_v18   ;;  %v1810_v56 = vand.u32 2147483647, %v5006_v43  ;;  %v1812_v38 = vand.u32 2147483648, %v5006_v43  ;;  %v2102_v62 = vmul.f32 %v4958_v52, %v4906_v32  ;;  %vm2106_vm12 = vweird.f32 %v4906_v32 }
 0x133   :  { %v5326_v9 = vpop.eup %3607  ;;  %3617 = vpow2.f32 %v3378_v15  ;;  %v1804_v1 = vmul.f32 %v5062_v31, %v1803_v50  ;;  %vm2107_vm13 = vweird.f32 %v4958_v52  ;;  %v2110_v10 = vand.u32 2147483647, %v4906_v32 }
 0x134   :  { %v5331_v57 = vpop.eup %3609  ;;  %vm5341_vm15 = vcmp.eq.f32.partialorder %v1810_v56, 8.507059e+37  ;;  %v1813_v59 = vor.u32 1.1754944e-38, %v1812_v38  ;;  %v2103_v22 = vsub.f32 1.0, %v2102_v62  ;;  %v2112_v6 = vand.u32 2147483648, %v4906_v32  ;;  %vm5371_vm4 = vmor %vm2106_vm12, %vm2107_vm13 }
 0x135   :  { %v5346_v45 = vpop.eup %3611  ;;  %v1805_v27 = vadd.f32 %v5062_v31, %v1804_v1  ;;  %vm5349_vm0 = vcmp.eq.f32.partialorder %v2110_v10, 8.507059e+37  ;;  %v1187_v43 = vmul.f32 %v4938_v42, %v4890_v36  ;;  %vm1191_vm2 = vweird.f32 %v4890_v36 }
 0x136   :  { %v3614_v16 = vpop.eup %3613  ;;  %v2104_v44 = vmul.f32 %v4958_v52, %v2103_v22  ;;  %v2113_v48 = vor.u32 1.1754944e-38, %v2112_v6  ;;  %vm1192_vm3 = vweird.f32 %v4938_v42  ;;  %v1195_v61 = vand.u32 2147483647, %v4890_v36 }
 0x137   :  { %v3616_v29 = vpop.eup %3615  ;;  %v5362_v26 = vadd.f32 1.0, %v3614_v16  ;;  %v1809_v39 = vsel %vm5337_vm14, %v5062_v31, %v1805_v27  ;;  %v1188_v8 = vsub.f32 1.0, %v1187_v43  ;;  %v1197_v63 = vand.u32 2147483648, %v4890_v36  ;;  %vm5403_vm6 = vmor %vm1191_vm2, %vm1192_vm3 }
 0x138   :  { %v5379_v2 = vadd.f32 1.0, %v3616_v29  ;;  %v1814_v31 = vsel %vm5341_vm15, %v1813_v59, %v1809_v39  ;;  %v2105_v49 = vadd.f32 %v4958_v52, %v2104_v44  ;;  %vm5384_vm5 = vcmp.eq.f32.partialorder %v1195_v61, 8.507059e+37 }
 0x139   :  { %v3618_v40 = vpop.eup %3617  ;;  %3619 = vrcp.f32 %v5362_v26  ;;  %2731 = vperm.xlu2 %3424, %v1814_v31   ;;  %v1189_v54 = vmul.f32 %v4938_v42, %v1188_v8  ;;  %v1198_v34 = vor.u32 1.1754944e-38, %v1197_v63  ;;  %v566_v18 = vadd.f32 %v565_v25, %v139_v58 }
 0x13a   :  { %3621 = vrcp.f32 %v5379_v2  ;;  %v5394_v15 = vadd.f32 1.0, %v3618_v40  ;;  %v2109_v50 = vsel %vm5371_vm4, %v4958_v52, %v2105_v49  ;;  %v626_v38 = vadd.f32 %v625_v30, %v159_v14 }
 0x13b   :  { %v2114_v62 = vsel %vm5349_vm0, %v2113_v48, %v2109_v50  ;;  %v1190_v1 = vadd.f32 %v4938_v42, %v1189_v54  ;;  %v3359_v10 = vmul.f32 -1.442695, %v566_v18  ;;  %v686_v20 = vadd.f32 %v685_v41, %v179_v23  ;;  %v2357_v18 = vld [vmem:[%s8090_s3 + $0x170] sm:$0xff] }
 0x13c   :  { %3623 = vrcp.f32 %v5394_v15  ;;  %2831 = vperm.xlu1 %3423, %v2114_v62   ;;  %v3379_v52 = vmul.f32 -1.442695, %v626_v38  ;;  %v2117_v11 = vmul.f32 %v5141_v17, %v5100_v0  ;;  %vm2121_vm7 = vweird.f32 %v5100_v0  ;;  %v2358_v62 = vld [vmem:[%s8090_s3 + $0x178] sm:$0xff] }
 0x13d   :  { %v1194_v36 = vsel %vm5403_vm6, %v4938_v42, %v1190_v1  ;;  %3625 = vpow2.f32 %v3359_v10  ;;  %v3399_v59 = vmul.f32 -1.442695, %v686_v20  ;;  %vm2122_vm8 = vweird.f32 %v5141_v17  ;;  %v2597_v1 = vpop.permute.xlu2 %2596  ;;  %v119_v10 = vld [vmem:[%s8089_s2 + $0x70] sm:$0xff]  ;;  %v505_v20 = vpop.f32.mrf.mxu0 }
 0x13e   :  { %v1199_v22 = vsel %vm5384_vm5, %v1198_v34, %v1194_v36  ;;  %3627 = vpow2.f32 %v3379_v52  ;;  %v2118_v6 = vsub.f32 1.0, %v2117_v11  ;;  %v2125_v27 = vand.u32 2147483647, %v5100_v0  ;;  %vm5440_vm11 = vmor %vm2121_vm7, %vm2122_vm8 }
 0x13f   :  { %v5421_v5 = vpop.eup %3619  ;;  %2526 = vperm.xlu0 %3422, %v1199_v22   ;;  %3629 = vpow2.f32 %v3399_v59  ;;  %v2127_v43 = vand.u32 2147483648, %v5100_v0  ;;  %v1202_v42 = vmul.f32 %v5033_v4, %v4974_v33  ;;  %vm1206_vm1 = vweird.f32 %v4974_v33  ;;  %v160_v22 = vld [vmem:[%s8089_s2 + $0x1b8] sm:$0xff] }
 0x140   :  { %v5427_v16 = vpop.eup %3621  ;;  %v2119_v44 = vmul.f32 %v5141_v17, %v2118_v6  ;;  %vm5430_vm9 = vcmp.eq.f32.partialorder %v2125_v27, 8.507059e+37  ;;  %vm1207_vm10 = vweird.f32 %v5033_v4  ;;  %v1210_v61 = vand.u32 2147483647, %v4974_v33  ;;  %v628_v6 = vpop.f32.mrf.mxu2  ;;  %v180_v27 = vld [vmem:[%s8089_s2 + $0x258] sm:$0xff] }
 0x141   :  { %v2128_v25 = vor.u32 1.1754944e-38, %v2127_v43  ;;  %v1203_v29 = vsub.f32 1.0, %v1202_v42  ;;  %v1212_v39 = vand.u32 2147483648, %v4974_v33  ;;  %v1502_v7 = vmul.f32 %v5039_v47, %v4991_v60  ;;  %vm5467_vm15 = vmor %vm1206_vm1, %vm1207_vm10  ;;  %v688_v43 = vpop.f32.mrf.mxu3 }
 0x142   :  { %v5447_v8 = vpop.eup %3623  ;;  %v2120_v63 = vadd.f32 %v5141_v17, %v2119_v44  ;;  %vm5450_vm12 = vcmp.eq.f32.partialorder %v1210_v61, 8.507059e+37  ;;  %vm1506_vm13 = vweird.f32 %v4991_v60  ;;  %vm1507_vm14 = vweird.f32 %v5039_v47 }
 0x143   :  { %v3626_v0 = vpop.eup %3625  ;;  %v1204_v30 = vmul.f32 %v5033_v4, %v1203_v29  ;;  %v1213_v31 = vor.u32 1.1754944e-38, %v1212_v39  ;;  %v1503_v49 = vsub.f32 1.0, %v1502_v7  ;;  %v1510_v32 = vand.u32 2147483647, %v4991_v60  ;;  %vm5494_vm2 = vmor %vm1506_vm13, %vm1507_vm14 }
 0x144   :  { %v3628_v23 = vpop.eup %3627  ;;  %v5458_v41 = vadd.f32 1.0, %v3626_v0  ;;  %v2124_v40 = vsel %vm5440_vm11, %v5141_v17, %v2120_v63  ;;  %v1512_v34 = vand.u32 2147483648, %v4991_v60  ;;  %vm3068_vm0 = vcmask 556032  }
 0x145   :  { %v3630_v50 = vpop.eup %3629  ;;  %v5475_v56 = vadd.f32 1.0, %v3628_v23  ;;  %v2129_v17 = vsel %vm5430_vm9, %v2128_v25, %v2124_v40  ;;  %v1205_v38 = vadd.f32 %v5033_v4, %v1204_v30  ;;  %v1504_v33 = vmul.f32 %v5039_v47, %v1503_v49 }
 0x146   :  { %3631 = vrcp.f32 %v5458_v41  ;;  %v5488_v52 = vadd.f32 1.0, %v3630_v50  ;;  %2836 = vperm.xlu2 %3424, %v2129_v17   ;;  %vm5498_vm3 = vcmp.eq.f32.partialorder %v1510_v32, 8.507059e+37  ;;  %v1513_v59 = vor.u32 1.1754944e-38, %v1512_v34 }
 0x147   :  { %3633 = vrcp.f32 %v5475_v56  ;;  %v1209_v60 = vsel %vm5467_vm15, %v5033_v4, %v1205_v38  ;;  %v1505_v42 = vadd.f32 %v5039_v47, %v1504_v33  ;;  %v2945_v44 = vmul.f32 %v2597_v1, %v2357_v18 }
 0x148   :  { %3635 = vrcp.f32 %v5488_v52  ;;  %v1214_v48 = vsel %vm5450_vm12, %v1213_v31, %v1209_v60  ;;  %v2946_v61 = vmul.f32 %v2597_v1, %v2358_v62  ;;  %v506_v58 = vadd.f32 %v505_v20, %v119_v10  ;;  %v2399_v10 = vld [vmem:[%s8090_s3 + $0x2c0] sm:$0xff]  ;;  %v2702_v60 = vpop.permute.xlu2 %2701 }
 0x149   :  { %2531 = vperm.xlu1 %3423, %v1214_v48   ;;  %v1509_v25 = vsel %vm5494_vm2, %v5039_v47, %v1505_v42  ;;  %3114 = vst [vmem:[%s8091_s4 + $0x170] sm:$0xff] %v2945_v44  ;;  %v629_v4 = vadd.f32 %v628_v6, %v160_v22  ;;  %v689_v29 = vadd.f32 %v688_v43, %v180_v27  ;;  %vm1221_vm4 = vweird.f32 %v5165_v51  ;;  %v2482_v42 = vpop.permute.xlu0 %2481 }
 0x14a   :  { %v1514_v39 = vsel %vm5498_vm3, %v1513_v59, %v1509_v25  ;;  %3115 = vst.msk [vmem:[%s8091_s4 + $0x178] sm:$0xff] %vm3068_vm0, %v2946_v61  ;;  %v3339_v7 = vmul.f32 -1.442695, %v506_v58  ;;  %v1217_v47 = vmul.f32 %v5224_v55, %v5165_v51  ;;  %vm1222_vm5 = vweird.f32 %v5224_v55 }
 0x14b   :  { %2631 = vperm.xlu0 %3422, %v1514_v39   ;;  %v3380_v63 = vmul.f32 -1.442695, %v629_v4  ;;  %v3400_v14 = vmul.f32 -1.442695, %v689_v29  ;;  %v1225_v0 = vand.u32 2147483647, %v5165_v51  ;;  %v1517_v30 = vmul.f32 %v5129_v24, %v5073_v3  ;;  %vm5554_vm1 = vmor %vm1221_vm4, %vm1222_vm5  ;;  %v508_v29 = vpop.f32.mrf.mxu0 }
 0x14c   :  { %v5535_v31 = vpop.eup %3631  ;;  %3637 = vpow2.f32 %v3339_v7  ;;  %v1218_v49 = vsub.f32 1.0, %v1217_v47  ;;  %v1227_v32 = vand.u32 2147483648, %v5165_v51  ;;  %vm1521_vm6 = vweird.f32 %v5073_v3  ;;  %v2400_v51 = vld [vmem:[%s8090_s3 + $0x2c8] sm:$0xff] }
 0x14d   :  { %v5539_v23 = vpop.eup %3633  ;;  %3639 = vpow2.f32 %v3380_v63  ;;  %vm5541_vm7 = vcmp.eq.f32.partialorder %v1225_v0, 8.507059e+37  ;;  %v1518_v54 = vsub.f32 1.0, %v1517_v30  ;;  %vm1522_vm8 = vweird.f32 %v5129_v24  ;;  %v2312_v4 = vld [vmem:[%s8090_s3 + $0x8] sm:$0xff]  ;;  %v140_v0 = vld [vmem:[%s8089_s2 + $0x118] sm:$0xff]  ;;  %v568_v30 = vpop.f32.mrf.mxu1 }
 0x14e   :  { %v5546_v34 = vpop.eup %3635  ;;  %3641 = vpow2.f32 %v3400_v14  ;;  %v1219_v18 = vmul.f32 %v5224_v55, %v1218_v49  ;;  %v1228_v50 = vor.u32 1.1754944e-38, %v1227_v32  ;;  %v1525_v17 = vand.u32 2147483647, %v5073_v3  ;;  %vm5572_vm10 = vmor %vm1521_vm6, %vm1522_vm8  ;;  %v120_v14 = vld [vmem:[%s8089_s2 + $0x78] sm:$0xff]  ;;  %v181_v49 = vld [vmem:[%s8089_s2 + $0x260] sm:$0xff]  ;;  %v691_v32 = vpop.f32.mrf.mxu3 }
 0x14f   :  { %v1519_v33 = vmul.f32 %v5129_v24, %v1518_v54  ;;  %v1527_v62 = vand.u32 2147483648, %v5073_v3  ;;  %v1817_v1 = vmul.f32 %v5134_v37, %v5087_v46  ;;  %vm1821_vm9 = vweird.f32 %v5087_v46  ;;  %v2311_v3 = vld [vmem:[%s8090_s3] sm:$0xff] }
 0x150   :  { %v1220_v20 = vadd.f32 %v5224_v55, %v1219_v18  ;;  %vm5576_vm11 = vcmp.eq.f32.partialorder %v1525_v17, 8.507059e+37  ;;  %vm1822_vm12 = vweird.f32 %v5134_v37  ;;  %v1825_v59 = vand.u32 2147483647, %v5087_v46 }
 0x151   :  { %v1520_v22 = vadd.f32 %v5129_v24, %v1519_v33  ;;  %v1528_v6 = vor.u32 1.1754944e-38, %v1527_v62  ;;  %v1818_v27 = vsub.f32 1.0, %v1817_v1  ;;  %v1827_v43 = vand.u32 2147483648, %v5087_v46  ;;  %vm5622_vm14 = vmor %vm1821_vm9, %vm1822_vm12 }
 0x152   :  { %v3638_v44 = vpop.eup %3637  ;;  %v1224_v48 = vsel %vm5554_vm1, %v5224_v55, %v1220_v20  ;;  %vm5590_vm13 = vcmp.eq.f32.partialorder %v1825_v59, 8.507059e+37  ;;  %v2987_v58 = vmul.f32 %v2702_v60, %v2399_v10  ;;  %v2988_v25 = vmul.f32 %v2702_v60, %v2400_v51 }
 0x153   :  { %v3640_v39 = vpop.eup %3639  ;;  %v5597_v7 = vadd.f32 1.0, %v3638_v44  ;;  %v1229_v47 = vsel %vm5541_vm7, %v1228_v50, %v1224_v48  ;;  %v1524_v55 = vsel %vm5572_vm10, %v5129_v24, %v1520_v22  ;;  %v1819_v63 = vmul.f32 %v5134_v37, %v1818_v27 }
 0x154   :  { %v3642_v40 = vpop.eup %3641  ;;  %v5614_v54 = vadd.f32 1.0, %v3640_v39  ;;  %2536 = vperm.xlu2 %3424, %v1229_v47   ;;  %v1529_v24 = vsel %vm5576_vm11, %v1528_v6, %v1524_v55  ;;  %v1828_v50 = vor.u32 1.1754944e-38, %v1827_v43  ;;  %3156 = vst [vmem:[%s8091_s4 + $0x2c0] sm:$0xff] %v2987_v58  ;;  %v2899_v17 = vmul.f32 %v2482_v42, %v2311_v3  ;;  %v2807_v39 = vpop.permute.xlu2 %2806 }
 0x155   :  { %3643 = vrcp.f32 %v5597_v7  ;;  %v5630_v38 = vadd.f32 1.0, %v3642_v40  ;;  %2636 = vperm.xlu1 %3423, %v1529_v24   ;;  %v1820_v33 = vadd.f32 %v5134_v37, %v1819_v63  ;;  %3157 = vst.msk [vmem:[%s8091_s4 + $0x2c8] sm:$0xff] %vm3068_vm0, %v2988_v25  ;;  %v2900_v46 = vmul.f32 %v2482_v42, %v2312_v4  ;;  %v2442_v63 = vld [vmem:[%s8090_s3 + $0x418] sm:$0xff]  ;;  %v2592_v40 = vpop.permute.xlu1 %2591  ;;  %v571_v42 = vpop.f32.mrf.mxu1 }
 0x156   :  { %3645 = vrcp.f32 %v5614_v54  ;;  %3067 = vst [vmem:[%s8091_s4] sm:$0xff] %v2899_v17  ;;  %v509_v62 = vadd.f32 %v508_v29, %v120_v14  ;;  %v569_v1 = vadd.f32 %v568_v30, %v140_v0  ;;  %v692_v10 = vadd.f32 %v691_v32, %v181_v49  ;;  %v2441_v29 = vld [vmem:[%s8090_s3 + $0x410] sm:$0xff]  ;;  %v2355_v32 = vld [vmem:[%s8090_s3 + $0x160] sm:$0xff] }
 0x157   :  { %3647 = vrcp.f32 %v5630_v38  ;;  %v1824_v51 = vsel %vm5622_vm14, %v5134_v37, %v1820_v33  ;;  %3069 = vst.msk [vmem:[%s8091_s4 + $0x8] sm:$0xff] %vm3068_vm0, %v2900_v46  ;;  %v1532_v20 = vmul.f32 %v5331_v57, %v5287_v13  ;;  %vm1536_vm15 = vweird.f32 %v5287_v13  ;;  %v2356_v46 = vld [vmem:[%s8090_s3 + $0x168] sm:$0xff] }
 0x158   :  { %v1829_v11 = vsel %vm5590_vm13, %v1828_v50, %v1824_v51  ;;  %v3340_v36 = vmul.f32 -1.442695, %v509_v62  ;;  %v3360_v59 = vmul.f32 -1.442695, %v569_v1  ;;  %v3401_v22 = vmul.f32 -1.442695, %v692_v10  ;;  %v2587_v62 = vpop.permute.xlu0 %2586 }
 0x159   :  { %2736 = vperm.xlu0 %3422, %v1829_v11   ;;  %v1533_v6 = vsub.f32 1.0, %v1532_v20  ;;  %vm1537_vm2 = vweird.f32 %v5331_v57  ;;  %v1540_v37 = vand.u32 2147483647, %v5287_v13  ;;  %v1542_v27 = vand.u32 2147483648, %v5287_v13 }
 0x15a   :  { %3649 = vpow2.f32 %v3340_v36  ;;  %v1832_v43 = vmul.f32 %v5244_v35, %v5195_v53  ;;  %vm1836_vm3 = vweird.f32 %v5195_v53  ;;  %vm1837_vm4 = vweird.f32 %v5244_v35  ;;  %vm5672_vm6 = vmor %vm1536_vm15, %vm1537_vm2 }
 0x15b   :  { %v5661_v60 = vpop.eup %3643  ;;  %3651 = vpow2.f32 %v3360_v59  ;;  %v1534_v3 = vmul.f32 %v5331_v57, %v1533_v6  ;;  %vm5664_vm5 = vcmp.eq.f32.partialorder %v1540_v37, 8.507059e+37  ;;  %v1543_v44 = vor.u32 1.1754944e-38, %v1542_v27  ;;  %vm5707_vm9 = vmor %vm1836_vm3, %vm1837_vm4  ;;  %v2354_v37 = vld [vmem:[%s8090_s3 + $0x158] sm:$0xff]  ;;  %v121_v27 = vld [vmem:[%s8089_s2 + $0x80] sm:$0xff] }
 0x15c   :  { %v5668_v48 = vpop.eup %3645  ;;  %3653 = vpow2.f32 %v3401_v22  ;;  %v1833_v58 = vsub.f32 1.0, %v1832_v43  ;;  %v1840_v25 = vand.u32 2147483647, %v5195_v53  ;;  %v1842_v4 = vand.u32 2147483648, %v5195_v53  ;;  %v511_v43 = vpop.f32.mrf.mxu0 }
 0x15d   :  { %v5681_v47 = vpop.eup %3647  ;;  %v1535_v55 = vadd.f32 %v5331_v57, %v1534_v3  ;;  %v2132_v13 = vmul.f32 %v5251_v28, %v5205_v12  ;;  %vm2136_vm7 = vweird.f32 %v5205_v12  ;;  %vm2137_vm8 = vweird.f32 %v5251_v28  ;;  %v141_v3 = vld [vmem:[%s8089_s2 + $0x120] sm:$0xff] }
 0x15e   :  { %v1834_v14 = vmul.f32 %v5244_v35, %v1833_v58  ;;  %vm5692_vm1 = vcmp.eq.f32.partialorder %v1840_v25, 8.507059e+37  ;;  %v1843_v30 = vor.u32 1.1754944e-38, %v1842_v4  ;;  %v2140_v49 = vand.u32 2147483647, %v5205_v12  ;;  %vm5749_vm11 = vmor %vm2136_vm7, %vm2137_vm8 }
 0x15f   :  { %v1539_v24 = vsel %vm5672_vm6, %v5331_v57, %v1535_v55  ;;  %v2133_v50 = vsub.f32 1.0, %v2132_v13  ;;  %v2142_v17 = vand.u32 2147483648, %v5205_v12  ;;  %v3029_v33 = vmul.f32 %v2807_v39, %v2441_v29  ;;  %v2353_v57 = vld [vmem:[%s8090_s3 + $0x150] sm:$0xff] }
 0x160   :  { %v3650_v1 = vpop.eup %3649  ;;  %v1544_v53 = vsel %vm5664_vm5, %v1543_v44, %v1539_v24  ;;  %v1835_v10 = vadd.f32 %v5244_v35, %v1834_v14  ;;  %vm5721_vm10 = vcmp.eq.f32.partialorder %v2140_v49, 8.507059e+37  ;;  %v3030_v20 = vmul.f32 %v2807_v39, %v2442_v63  ;;  %v161_v39 = vld [vmem:[%s8089_s2 + $0x1c0] sm:$0xff] }
 0x161   :  { %v3652_v11 = vpop.eup %3651  ;;  %v5725_v36 = vadd.f32 1.0, %v3650_v1  ;;  %2641 = vperm.xlu2 %3424, %v1544_v53   ;;  %v2134_v59 = vmul.f32 %v5251_v28, %v2133_v50  ;;  %v2143_v22 = vor.u32 1.1754944e-38, %v2142_v17  ;;  %3198 = vst [vmem:[%s8091_s4 + $0x410] sm:$0xff] %v3029_v33  ;;  %v2943_v6 = vmul.f32 %v2592_v40, %v2355_v32 }
 0x162   :  { %v3654_v44 = vpop.eup %3653  ;;  %v5740_v61 = vadd.f32 1.0, %v3652_v11  ;;  %v1839_v58 = vsel %vm5707_vm9, %v5244_v35, %v1835_v10  ;;  %3199 = vst.msk [vmem:[%s8091_s4 + $0x418] sm:$0xff] %vm3068_vm0, %v3030_v20  ;;  %v2944_v4 = vmul.f32 %v2592_v40, %v2356_v46  ;;  %v2941_v29 = vmul.f32 %v2587_v62, %v2353_v57  ;;  %v631_v35 = vpop.f32.mrf.mxu2 }
 0x163   :  { %3655 = vrcp.f32 %v5725_v36  ;;  %v5761_v55 = vadd.f32 1.0, %v3654_v44  ;;  %v1844_v12 = vsel %vm5692_vm1, %v1843_v30, %v1839_v58  ;;  %v2135_v13 = vadd.f32 %v5251_v28, %v2134_v59  ;;  %3112 = vst [vmem:[%s8091_s4 + $0x160] sm:$0xff] %v2943_v6  ;;  %v2398_v44 = vld [vmem:[%s8090_s3 + $0x2b8] sm:$0xff] }
 0x164   :  { %3657 = vrcp.f32 %v5740_v61  ;;  %2741 = vperm.xlu1 %3423, %v1844_v12   ;;  %3113 = vst.msk [vmem:[%s8091_s4 + $0x168] sm:$0xff] %vm3068_vm0, %v2944_v4  ;;  %v2942_v63 = vmul.f32 %v2587_v62, %v2354_v37  ;;  %v512_v14 = vadd.f32 %v511_v43, %v121_v27  ;;  %v572_v49 = vadd.f32 %v571_v42, %v141_v3  ;;  %v2697_v27 = vpop.permute.xlu1 %2696  ;;  %v2502_v12 = vpop.permute.xlu2 %2501 }
 0x165   :  { %3659 = vrcp.f32 %v5761_v55  ;;  %v2139_v0 = vsel %vm5749_vm11, %v5251_v28, %v2135_v13  ;;  %3110 = vst [vmem:[%s8091_s4 + $0x150] sm:$0xff] %v2941_v29  ;;  %v632_v30 = vadd.f32 %v631_v35, %v161_v39  ;;  %v1847_v32 = vmul.f32 %v5447_v8, %v5394_v15  ;;  %v2319_v35 = vld [vmem:[%s8090_s3 + $0x40] sm:$0xff] }
 0x166   :  { %v2144_v40 = vsel %vm5721_vm10, %v2143_v22, %v2139_v0  ;;  %3111 = vst.msk [vmem:[%s8091_s4 + $0x158] sm:$0xff] %vm3068_vm0, %v2942_v63  ;;  %v3341_v24 = vmul.f32 -1.442695, %v512_v14  ;;  %v3361_v18 = vmul.f32 -1.442695, %v572_v49  ;;  %vm1851_vm12 = vweird.f32 %v5394_v15 }
 0x167   :  { %2841 = vperm.xlu0 %3422, %v2144_v40   ;;  %v3381_v28 = vmul.f32 -1.442695, %v632_v30  ;;  %v1848_v50 = vsub.f32 1.0, %v1847_v32  ;;  %vm1852_vm13 = vweird.f32 %v5447_v8  ;;  %v1855_v17 = vand.u32 2147483647, %v5394_v15 }
 0x168   :  { %3661 = vpow2.f32 %v3341_v24  ;;  %v1857_v33 = vand.u32 2147483648, %v5394_v15  ;;  %v2147_v46 = vmul.f32 %v5346_v45, %v5294_v21  ;;  %vm2151_vm14 = vweird.f32 %v5294_v21  ;;  %vm5808_vm3 = vmor %vm1851_vm12, %vm1852_vm13  ;;  %v2397_v15 = vld [vmem:[%s8090_s3 + $0x2b0] sm:$0xff] }
 0x169   :  { %v5796_v57 = vpop.eup %3655  ;;  %3663 = vpow2.f32 %v3361_v18  ;;  %v1849_v62 = vmul.f32 %v5447_v8, %v1848_v50  ;;  %vm5799_vm15 = vcmp.eq.f32.partialorder %v1855_v17, 8.507059e+37  ;;  %vm2152_vm2 = vweird.f32 %v5346_v45  ;;  %v2395_v18 = vld [vmem:[%s8090_s3 + $0x2a0] sm:$0xff]  ;;  %v2692_v50 = vpop.permute.xlu0 %2691  ;;  %v142_v17 = vld [vmem:[%s8089_s2 + $0x128] sm:$0xff] }
 0x16a   :  { %v5804_v53 = vpop.eup %3657  ;;  %3665 = vpow2.f32 %v3381_v28  ;;  %v1858_v51 = vor.u32 1.1754944e-38, %v1857_v33  ;;  %v2148_v20 = vsub.f32 1.0, %v2147_v46  ;;  %v2155_v11 = vand.u32 2147483647, %v5294_v21  ;;  %vm5840_vm7 = vmor %vm2151_vm14, %vm2152_vm2  ;;  %v2396_v28 = vld [vmem:[%s8090_s3 + $0x2a8] sm:$0xff]  ;;  %v574_v33 = vpop.f32.mrf.mxu1 }
 0x16b   :  { %v5813_v59 = vpop.eup %3659  ;;  %v1850_v22 = vadd.f32 %v5447_v8, %v1849_v62  ;;  %v2157_v6 = vand.u32 2147483648, %v5294_v21  ;;  %v1232_v37 = vmul.f32 %v5326_v9, %v5278_v19  ;;  %vm1236_vm4 = vweird.f32 %v5278_v19 }
 0x16c   :  { %v2149_v43 = vmul.f32 %v5346_v45, %v2148_v20  ;;  %vm5824_vm5 = vcmp.eq.f32.partialorder %v2155_v11, 8.507059e+37  ;;  %vm1237_vm6 = vweird.f32 %v5326_v9  ;;  %v1240_v42 = vand.u32 2147483647, %v5278_v19  ;;  %v162_v11 = vld [vmem:[%s8089_s2 + $0x1c8] sm:$0xff] }
 0x16d   :  { %v1854_v58 = vsel %vm5808_vm3, %v5447_v8, %v1850_v22  ;;  %v2158_v4 = vor.u32 1.1754944e-38, %v2157_v6  ;;  %v1233_v29 = vsub.f32 1.0, %v1232_v37  ;;  %v1242_v39 = vand.u32 2147483648, %v5278_v19  ;;  %v2320_v8 = vld [vmem:[%s8090_s3 + $0x48] sm:$0xff]  ;;  %vm5879_vm1 = vmor %vm1236_vm4, %vm1237_vm6  ;;  %v634_v22 = vpop.f32.mrf.mxu2  ;;  %v694_v19 = vpop.f32.mrf.mxu3 }
 0x16e   :  { %v3662_v13 = vpop.eup %3661  ;;  %v1859_v21 = vsel %vm5799_vm15, %v1858_v51, %v1854_v58  ;;  %v2150_v63 = vadd.f32 %v5346_v45, %v2149_v43  ;;  %vm5854_vm8 = vcmp.eq.f32.partialorder %v1240_v42, 8.507059e+37  ;;  %v2985_v49 = vmul.f32 %v2697_v27, %v2397_v15 }
 0x16f   :  { %v3664_v0 = vpop.eup %3663  ;;  %v5858_v30 = vadd.f32 1.0, %v3662_v13  ;;  %2746 = vperm.xlu2 %3424, %v1859_v21   ;;  %v1234_v32 = vmul.f32 %v5326_v9, %v1233_v29  ;;  %v1243_v40 = vor.u32 1.1754944e-38, %v1242_v39  ;;  %v2986_v24 = vmul.f32 %v2697_v27, %v2398_v44 }
 0x170   :  { %v3666_v46 = vpop.eup %3665  ;;  %v5870_v62 = vadd.f32 1.0, %v3664_v0  ;;  %v2154_v1 = vsel %vm5840_vm7, %v5346_v45, %v2150_v63  ;;  %3154 = vst [vmem:[%s8091_s4 + $0x2b0] sm:$0xff] %v2985_v49  ;;  %v2907_v51 = vmul.f32 %v2502_v12, %v2319_v35  ;;  %v2908_v20 = vmul.f32 %v2502_v12, %v2320_v8  ;;  %v182_v45 = vld [vmem:[%s8089_s2 + $0x268] sm:$0xff] }
 0x171   :  { %3667 = vrcp.f32 %v5858_v30  ;;  %v5893_v6 = vadd.f32 1.0, %v3666_v46  ;;  %v2159_v37 = vsel %vm5824_vm5, %v2158_v4, %v2154_v1  ;;  %v1235_v15 = vadd.f32 %v5326_v9, %v1234_v32  ;;  %3155 = vst.msk [vmem:[%s8091_s4 + $0x2b8] sm:$0xff] %vm3068_vm0, %v2986_v24  ;;  %v122_v0 = vld [vmem:[%s8089_s2 + $0x88] sm:$0xff] }
 0x172   :  { %3669 = vrcp.f32 %v5870_v62  ;;  %2846 = vperm.xlu1 %3423, %v2159_v37   ;;  %3076 = vst [vmem:[%s8091_s4 + $0x40] sm:$0xff] %v2907_v51  ;;  %v2983_v27 = vmul.f32 %v2692_v50, %v2395_v18  ;;  %v2984_v43 = vmul.f32 %v2692_v50, %v2396_v28  ;;  %v575_v42 = vadd.f32 %v574_v33, %v142_v17  ;;  %v2439_v17 = vld [vmem:[%s8090_s3 + $0x400] sm:$0xff]  ;;  %v2802_v33 = vpop.permute.xlu1 %2801 }
 0x173   :  { %3671 = vrcp.f32 %v5893_v6  ;;  %v1239_v3 = vsel %vm5879_vm1, %v5326_v9, %v1235_v15  ;;  %3077 = vst.msk [vmem:[%s8091_s4 + $0x48] sm:$0xff] %vm3068_vm0, %v2908_v20  ;;  %v635_v44 = vadd.f32 %v634_v22, %v162_v11  ;;  %v695_v58 = vadd.f32 %v694_v19, %v182_v45  ;;  %v2440_v45 = vld [vmem:[%s8090_s3 + $0x408] sm:$0xff]  ;;  %v2507_v19 = vpop.permute.xlu2 %2506 }
 0x174   :  { %v1244_v25 = vsel %vm5854_vm8, %v1243_v40, %v1239_v3  ;;  %3152 = vst [vmem:[%s8091_s4 + $0x2a0] sm:$0xff] %v2983_v27  ;;  %v3362_v4 = vmul.f32 -1.442695, %v575_v42  ;;  %v2162_v29 = vmul.f32 %v5546_v34, %v5488_v52  ;;  %vm2166_vm9 = vweird.f32 %v5488_v52 }
 0x175   :  { %2541 = vperm.xlu0 %3422, %v1244_v25   ;;  %3153 = vst.msk [vmem:[%s8091_s4 + $0x2a8] sm:$0xff] %vm3068_vm0, %v2984_v43  ;;  %v3382_v9 = vmul.f32 -1.442695, %v635_v44  ;;  %v3402_v39 = vmul.f32 -1.442695, %v695_v58  ;;  %vm2167_vm10 = vweird.f32 %v5546_v34  ;;  %v2172_v35 = vand.u32 2147483648, %v5488_v52 }
 0x176   :  { %3673 = vpow2.f32 %v3362_v4  ;;  %v2163_v8 = vsub.f32 1.0, %v2162_v29  ;;  %v2170_v12 = vand.u32 2147483647, %v5488_v52  ;;  %v1247_v13 = vmul.f32 %v5421_v5, %v5362_v26  ;;  %vm5948_vm14 = vmor %vm2166_vm9, %vm2167_vm10  ;;  %v2437_v29 = vld [vmem:[%s8090_s3 + $0x3f0] sm:$0xff] }
 0x177   :  { %v5931_v21 = vpop.eup %3667  ;;  %3675 = vpow2.f32 %v3382_v9  ;;  %v2173_v63 = vor.u32 1.1754944e-38, %v2172_v35  ;;  %vm1251_vm11 = vweird.f32 %v5362_v26  ;;  %vm1252_vm12 = vweird.f32 %v5421_v5  ;;  %v2438_v9 = vld [vmem:[%s8090_s3 + $0x3f8] sm:$0xff] }
 0x178   :  { %v5935_v14 = vpop.eup %3669  ;;  %3677 = vpow2.f32 %v3402_v39  ;;  %v2164_v49 = vmul.f32 %v5546_v34, %v2163_v8  ;;  %vm5938_vm13 = vcmp.eq.f32.partialorder %v2170_v12, 8.507059e+37  ;;  %v1248_v32 = vsub.f32 1.0, %v1247_v13  ;;  %vm5968_vm3 = vmor %vm1251_vm11, %vm1252_vm12  ;;  %v2797_v39 = vpop.permute.xlu0 %2796 }
 0x179   :  { %v5942_v40 = vpop.eup %3671  ;;  %v1255_v18 = vand.u32 2147483647, %v5362_v26  ;;  %v1257_v28 = vand.u32 2147483648, %v5362_v26  ;;  %v1547_v50 = vmul.f32 %v5427_v16, %v5379_v2  ;;  %vm1551_vm15 = vweird.f32 %v5379_v2  ;;  %v2321_v26 = vld [vmem:[%s8090_s3 + $0x50] sm:$0xff] }
 0x17a   :  { %v2165_v52 = vadd.f32 %v5546_v34, %v2164_v49  ;;  %v1249_v46 = vmul.f32 %v5421_v5, %v1248_v32  ;;  %vm1552_vm2 = vweird.f32 %v5427_v16  ;;  %v1555_v1 = vand.u32 2147483647, %v5379_v2  ;;  %v514_v32 = vpop.f32.mrf.mxu0 }
 0x17b   :  { %vm5972_vm4 = vcmp.eq.f32.partialorder %v1255_v18, 8.507059e+37  ;;  %v1258_v20 = vor.u32 1.1754944e-38, %v1257_v28  ;;  %v1548_v11 = vsub.f32 1.0, %v1547_v50  ;;  %v1557_v22 = vand.u32 2147483648, %v5379_v2  ;;  %vm6014_vm6 = vmor %vm1551_vm15, %vm1552_vm2  ;;  %v637_v2 = vpop.f32.mrf.mxu2  ;;  %v183_v50 = vld [vmem:[%s8089_s2 + $0x270] sm:$0xff]  ;;  %v2612_v13 = vpop.permute.xlu2 %2611 }
 0x17c   :  { %v3674_v37 = vpop.eup %3673  ;;  %v2169_v15 = vsel %vm5948_vm14, %v5546_v34, %v2165_v52  ;;  %v1250_v27 = vadd.f32 %v5421_v5, %v1249_v46  ;;  %vm5987_vm5 = vcmp.eq.f32.partialorder %v1555_v1, 8.507059e+37  ;;  %v3027_v42 = vmul.f32 %v2802_v33, %v2439_v17  ;;  %v2322_v34 = vld [vmem:[%s8090_s3 + $0x58] sm:$0xff]  ;;  %v697_v17 = vpop.f32.mrf.mxu3 }
 0x17d   :  { %v3676_v3 = vpop.eup %3675  ;;  %v5991_v44 = vadd.f32 1.0, %v3674_v37  ;;  %v2174_v58 = vsel %vm5938_vm13, %v2173_v63, %v2169_v15  ;;  %v1549_v25 = vmul.f32 %v5427_v16, %v1548_v11  ;;  %v1558_v4 = vor.u32 1.1754944e-38, %v1557_v22 }
 0x17e   :  { %v3678_v35 = vpop.eup %3677  ;;  %v6005_v8 = vadd.f32 1.0, %v3676_v3  ;;  %2851 = vperm.xlu2 %3424, %v2174_v58   ;;  %v1254_v12 = vsel %vm5968_vm3, %v5421_v5, %v1250_v27  ;;  %v3028_v63 = vmul.f32 %v2802_v33, %v2440_v45  ;;  %3196 = vst [vmem:[%s8091_s4 + $0x400] sm:$0xff] %v3027_v42  ;;  %v2909_v49 = vmul.f32 %v2507_v19, %v2321_v26  ;;  %v163_v5 = vld [vmem:[%s8089_s2 + $0x1d0] sm:$0xff] }
 0x17f   :  { %3679 = vrcp.f32 %v5991_v44  ;;  %v6028_v24 = vadd.f32 1.0, %v3678_v35  ;;  %v1259_v18 = vsel %vm5972_vm4, %v1258_v20, %v1254_v12  ;;  %v1550_v28 = vadd.f32 %v5427_v16, %v1549_v25  ;;  %v2363_v12 = vld [vmem:[%s8090_s3 + $0x1a0] sm:$0xff] }
 0x180   :  { %3681 = vrcp.f32 %v6005_v8  ;;  %2546 = vperm.xlu1 %3423, %v1259_v18   ;;  %3197 = vst.msk [vmem:[%s8091_s4 + $0x408] sm:$0xff] %vm3068_vm0, %v3028_v63  ;;  %v2910_v33 = vmul.f32 %v2507_v19, %v2322_v34  ;;  %v3025_v52 = vmul.f32 %v2797_v39, %v2437_v29  ;;  %v3026_v46 = vmul.f32 %v2797_v39, %v2438_v9 }
 0x181   :  { %3683 = vrcp.f32 %v6028_v24  ;;  %v1554_v1 = vsel %vm6014_vm6, %v5427_v16, %v1550_v28  ;;  %3078 = vst [vmem:[%s8091_s4 + $0x50] sm:$0xff] %v2909_v49  ;;  %v515_v10 = vadd.f32 %v514_v32, %v122_v0  ;;  %v638_v51 = vadd.f32 %v637_v2, %v163_v5  ;;  %v2364_v49 = vld [vmem:[%s8090_s3 + $0x1a8] sm:$0xff]  ;;  %v2315_v28 = vld [vmem:[%s8090_s3 + $0x20] sm:$0xff] }
 0x182   :  { %v1559_v20 = vsel %vm5987_vm5, %v1558_v4, %v1554_v1  ;;  %3079 = vst.msk [vmem:[%s8091_s4 + $0x58] sm:$0xff] %vm3068_vm0, %v2910_v33  ;;  %v698_v11 = vadd.f32 %v697_v17, %v183_v50  ;;  %v1262_v22 = vmul.f32 %v5661_v60, %v5597_v7  ;;  %vm1266_vm7 = vweird.f32 %v5597_v7  ;;  %v2492_v50 = vpop.permute.xlu1 %2491 }
 0x183   :  { %2646 = vperm.xlu0 %3422, %v1559_v20   ;;  %3194 = vst [vmem:[%s8091_s4 + $0x3f0] sm:$0xff] %v3025_v52  ;;  %v3342_v16 = vmul.f32 -1.442695, %v515_v10  ;;  %v3383_v45 = vmul.f32 -1.442695, %v638_v51  ;;  %vm1267_vm8 = vweird.f32 %v5661_v60  ;;  %v1272_v26 = vand.u32 2147483648, %v5597_v7 }
 0x184   :  { %3195 = vst.msk [vmem:[%s8091_s4 + $0x3f8] sm:$0xff] %vm3068_vm0, %v3026_v46  ;;  %v3403_v19 = vmul.f32 -1.442695, %v698_v11  ;;  %v1263_v37 = vsub.f32 1.0, %v1262_v22  ;;  %v1270_v15 = vand.u32 2147483647, %v5597_v7  ;;  %v1562_v27 = vmul.f32 %v5535_v31, %v5458_v41  ;;  %vm6086_vm11 = vmor %vm1266_vm7, %vm1267_vm8 }
 0x185   :  { %v6069_v43 = vpop.eup %3679  ;;  %3685 = vpow2.f32 %v3342_v16  ;;  %v1273_v42 = vor.u32 1.1754944e-38, %v1272_v26  ;;  %vm1566_vm1 = vweird.f32 %v5458_v41  ;;  %vm1567_vm9 = vweird.f32 %v5535_v31  ;;  %v2316_v46 = vld [vmem:[%s8090_s3 + $0x28] sm:$0xff]  ;;  %v2313_v11 = vld [vmem:[%s8090_s3 + $0x10] sm:$0xff]  ;;  %v2314_v22 = vld [vmem:[%s8090_s3 + $0x18] sm:$0xff]  ;;  %v2487_v16 = vpop.permute.xlu0 %2486 }
 0x186   :  { %v6073_v3 = vpop.eup %3681  ;;  %3687 = vpow2.f32 %v3383_v45  ;;  %v1264_v58 = vmul.f32 %v5661_v60, %v1263_v37  ;;  %vm6076_vm10 = vcmp.eq.f32.partialorder %v1270_v15, 8.507059e+37  ;;  %v1563_v4 = vsub.f32 1.0, %v1562_v27  ;;  %vm6108_vm14 = vmor %vm1566_vm1, %vm1567_vm9 }
 0x187   :  { %v6080_v34 = vpop.eup %3683  ;;  %3689 = vpow2.f32 %v3403_v19  ;;  %v1570_v9 = vand.u32 2147483647, %v5458_v41  ;;  %v1572_v39 = vand.u32 2147483648, %v5458_v41  ;;  %v1862_v35 = vmul.f32 %v5539_v23, %v5475_v56 }
 0x188   :  { %v1265_v63 = vadd.f32 %v5661_v60, %v1264_v58  ;;  %v1564_v7 = vmul.f32 %v5535_v31, %v1563_v4  ;;  %vm1866_vm12 = vweird.f32 %v5475_v56  ;;  %vm1867_vm13 = vweird.f32 %v5539_v23  ;;  %v517_v58 = vpop.f32.mrf.mxu0 }
 0x189   :  { %vm6112_vm15 = vcmp.eq.f32.partialorder %v1570_v9, 8.507059e+37  ;;  %v1573_v5 = vor.u32 1.1754944e-38, %v1572_v39  ;;  %v1863_v2 = vsub.f32 1.0, %v1862_v35  ;;  %v1870_v18 = vand.u32 2147483647, %v5475_v56  ;;  %vm6150_vm3 = vmor %vm1866_vm12, %vm1867_vm13  ;;  %v184_v35 = vld [vmem:[%s8089_s2 + $0x278] sm:$0xff] }
 0x18a   :  { %v1269_v41 = vsel %vm6086_vm11, %v5661_v60, %v1265_v63  ;;  %v1565_v17 = vadd.f32 %v5535_v31, %v1564_v7  ;;  %v1872_v33 = vand.u32 2147483648, %v5475_v56  ;;  %v2951_v52 = vmul.f32 %v2612_v13, %v2363_v12  ;;  %v577_v56 = vpop.f32.mrf.mxu1  ;;  %v700_v12 = vpop.f32.mrf.mxu3 }
 0x18b   :  { %v3686_v1 = vpop.eup %3685  ;;  %v1274_v10 = vsel %vm6076_vm10, %v1273_v42, %v1269_v41  ;;  %v1864_v51 = vmul.f32 %v5539_v23, %v1863_v2  ;;  %vm6131_vm2 = vcmp.eq.f32.partialorder %v1870_v18, 8.507059e+37  ;;  %v2952_v60 = vmul.f32 %v2612_v13, %v2364_v49  ;;  %v123_v42 = vld [vmem:[%s8089_s2 + $0x90] sm:$0xff] }
 0x18c   :  { %v3688_v45 = vpop.eup %3687  ;;  %v6141_v26 = vadd.f32 1.0, %v3686_v1  ;;  %2551 = vperm.xlu2 %3424, %v1274_v10   ;;  %v1569_v19 = vsel %vm6108_vm14, %v5535_v31, %v1565_v17  ;;  %v1873_v15 = vor.u32 1.1754944e-38, %v1872_v33  ;;  %3120 = vst [vmem:[%s8091_s4 + $0x1a0] sm:$0xff] %v2951_v52  ;;  %v2903_v27 = vmul.f32 %v2492_v50, %v2315_v28  ;;  %v143_v31 = vld [vmem:[%s8089_s2 + $0x130] sm:$0xff] }
 0x18d   :  { %v3690_v25 = vpop.eup %3689  ;;  %v6163_v4 = vadd.f32 1.0, %v3688_v45  ;;  %v1574_v29 = vsel %vm6112_vm15, %v1573_v5, %v1569_v19  ;;  %v1865_v9 = vadd.f32 %v5539_v23, %v1864_v51  ;;  %3121 = vst.msk [vmem:[%s8091_s4 + $0x1a8] sm:$0xff] %vm3068_vm0, %v2952_v60  ;;  %v2904_v39 = vmul.f32 %v2492_v50, %v2316_v46  ;;  %v2405_v45 = vld [vmem:[%s8090_s3 + $0x2f0] sm:$0xff]  ;;  %v2717_v19 = vpop.permute.xlu2 %2716 }
 0x18e   :  { %3691 = vrcp.f32 %v6141_v26  ;;  %v6176_v13 = vadd.f32 1.0, %v3690_v25  ;;  %2651 = vperm.xlu1 %3423, %v1574_v29   ;;  %3072 = vst [vmem:[%s8091_s4 + $0x20] sm:$0xff] %v2903_v27  ;;  %v2901_v63 = vmul.f32 %v2487_v16, %v2313_v11  ;;  %v2902_v7 = vmul.f32 %v2487_v16, %v2314_v22  ;;  %v2406_v27 = vld [vmem:[%s8090_s3 + $0x2f8] sm:$0xff]  ;;  %v2317_v25 = vld [vmem:[%s8090_s3 + $0x30] sm:$0xff]  ;;  %v2497_v29 = vpop.permute.xlu1 %2496 }
 0x18f   :  { %3693 = vrcp.f32 %v6163_v4  ;;  %v1869_v49 = vsel %vm6150_vm3, %v5539_v23, %v1865_v9  ;;  %3073 = vst.msk [vmem:[%s8091_s4 + $0x28] sm:$0xff] %vm3068_vm0, %v2904_v39  ;;  %v518_v0 = vadd.f32 %v517_v58, %v123_v42  ;;  %v578_v32 = vadd.f32 %v577_v56, %v143_v31 }
 0x190   :  { %3695 = vrcp.f32 %v6176_v13  ;;  %v1874_v5 = vsel %vm6131_vm2, %v1873_v15, %v1869_v49  ;;  %3070 = vst [vmem:[%s8091_s4 + $0x10] sm:$0xff] %v2901_v63  ;;  %v701_v2 = vadd.f32 %v700_v12, %v184_v35  ;;  %v1577_v23 = vmul.f32 %v5804_v53, %v5740_v61  ;;  %v2602_v49 = vpop.permute.xlu0 %2601 }
 0x191   :  { %2751 = vperm.xlu0 %3422, %v1874_v5   ;;  %3071 = vst.msk [vmem:[%s8091_s4 + $0x18] sm:$0xff] %vm3068_vm0, %v2902_v7  ;;  %v3343_v18 = vmul.f32 -1.442695, %v518_v0  ;;  %v3363_v28 = vmul.f32 -1.442695, %v578_v32  ;;  %vm1581_vm4 = vweird.f32 %v5740_v61  ;;  %vm1582_vm5 = vweird.f32 %v5804_v53  ;;  %v2318_v7 = vld [vmem:[%s8090_s3 + $0x38] sm:$0xff] }
 0x192   :  { %v3404_v50 = vmul.f32 -1.442695, %v701_v2  ;;  %v1578_v41 = vsub.f32 1.0, %v1577_v23  ;;  %v1585_v17 = vand.u32 2147483647, %v5740_v61  ;;  %v1587_v33 = vand.u32 2147483648, %v5740_v61  ;;  %vm6222_vm1 = vmor %vm1581_vm4, %vm1582_vm5  ;;  %v580_v10 = vpop.f32.mrf.mxu1 }
 0x193   :  { %3697 = vpow2.f32 %v3343_v18  ;;  %v1877_v52 = vmul.f32 %v5668_v48, %v5614_v54  ;;  %vm1881_vm6 = vweird.f32 %v5614_v54  ;;  %vm1882_vm7 = vweird.f32 %v5668_v48 }
 0x194   :  { %v6209_v46 = vpop.eup %3691  ;;  %3699 = vpow2.f32 %v3363_v28  ;;  %v1579_v1 = vmul.f32 %v5804_v53, %v1578_v41  ;;  %vm6212_vm8 = vcmp.eq.f32.partialorder %v1585_v17, 8.507059e+37  ;;  %v1588_v51 = vor.u32 1.1754944e-38, %v1587_v33  ;;  %vm6257_vm12 = vmor %vm1881_vm6, %vm1882_vm7  ;;  %v2360_v17 = vld [vmem:[%s8090_s3 + $0x188] sm:$0xff]  ;;  %v124_v33 = vld [vmem:[%s8089_s2 + $0x98] sm:$0xff] }
 0x195   :  { %v6216_v20 = vpop.eup %3693  ;;  %3701 = vpow2.f32 %v3404_v50  ;;  %v1878_v11 = vsub.f32 1.0, %v1877_v52  ;;  %v1885_v22 = vand.u32 2147483647, %v5614_v54  ;;  %v1887_v16 = vand.u32 2147483648, %v5614_v54  ;;  %v520_v52 = vpop.f32.mrf.mxu0 }
 0x196   :  { %v6231_v37 = vpop.eup %3695  ;;  %v1580_v15 = vadd.f32 %v5804_v53, %v1579_v1  ;;  %v2177_v61 = vmul.f32 %v5681_v47, %v5630_v38  ;;  %vm2181_vm9 = vweird.f32 %v5630_v38  ;;  %vm2182_vm10 = vweird.f32 %v5681_v47  ;;  %v144_v1 = vld [vmem:[%s8089_s2 + $0x138] sm:$0xff] }
 0x197   :  { %v1879_v42 = vmul.f32 %v5668_v48, %v1878_v11  ;;  %vm6242_vm11 = vcmp.eq.f32.partialorder %v1885_v22, 8.507059e+37  ;;  %v1888_v31 = vor.u32 1.1754944e-38, %v1887_v16  ;;  %v2185_v56 = vand.u32 2147483647, %v5630_v38  ;;  %vm6299_vm14 = vmor %vm2181_vm9, %vm2182_vm10  ;;  %v2448_v22 = vld [vmem:[%s8090_s3 + $0x448] sm:$0xff] }
 0x198   :  { %v1584_v9 = vsel %vm6222_vm1, %v5804_v53, %v1580_v15  ;;  %v2178_v35 = vsub.f32 1.0, %v2177_v61  ;;  %v2187_v12 = vand.u32 2147483648, %v5630_v38  ;;  %v2993_v63 = vmul.f32 %v2717_v19, %v2405_v45  ;;  %v2359_v53 = vld [vmem:[%s8090_s3 + $0x180] sm:$0xff] }
 0x199   :  { %v3698_v0 = vpop.eup %3697  ;;  %v1589_v54 = vsel %vm6212_vm8, %v1588_v51, %v1584_v9  ;;  %v1880_v32 = vadd.f32 %v5668_v48, %v1879_v42  ;;  %vm6271_vm13 = vcmp.eq.f32.partialorder %v2185_v56, 8.507059e+37  ;;  %v2994_v2 = vmul.f32 %v2717_v19, %v2406_v27  ;;  %v164_v19 = vld [vmem:[%s8089_s2 + $0x1d8] sm:$0xff] }
 0x19a   :  { %v3700_v23 = vpop.eup %3699  ;;  %v6275_v18 = vadd.f32 1.0, %v3698_v0  ;;  %2656 = vperm.xlu2 %3424, %v1589_v54   ;;  %v2179_v28 = vmul.f32 %v5681_v47, %v2178_v35  ;;  %v2188_v50 = vor.u32 1.1754944e-38, %v2187_v12  ;;  %3162 = vst [vmem:[%s8091_s4 + $0x2f0] sm:$0xff] %v2993_v63  ;;  %v2905_v41 = vmul.f32 %v2497_v29, %v2317_v25 }
 0x19b   :  { %v3702_v51 = vpop.eup %3701  ;;  %v6290_v60 = vadd.f32 1.0, %v3700_v23  ;;  %v1884_v11 = vsel %vm6257_vm12, %v5668_v48, %v1880_v32  ;;  %3163 = vst.msk [vmem:[%s8091_s4 + $0x2f8] sm:$0xff] %vm3068_vm0, %v2994_v2  ;;  %v2906_v16 = vmul.f32 %v2497_v29, %v2318_v7  ;;  %v2947_v45 = vmul.f32 %v2602_v49, %v2359_v53  ;;  %v640_v48 = vpop.f32.mrf.mxu2 }
 0x19c   :  { %3703 = vrcp.f32 %v6275_v18  ;;  %v6311_v15 = vadd.f32 1.0, %v3702_v51  ;;  %v1889_v38 = vsel %vm6242_vm11, %v1888_v31, %v1884_v11  ;;  %v2180_v61 = vadd.f32 %v5681_v47, %v2179_v28  ;;  %3074 = vst [vmem:[%s8091_s4 + $0x30] sm:$0xff] %v2905_v41  ;;  %v2822_v28 = vpop.permute.xlu2 %2821 }
 0x19d   :  { %3705 = vrcp.f32 %v6290_v60  ;;  %2756 = vperm.xlu1 %3423, %v1889_v38   ;;  %3075 = vst.msk [vmem:[%s8091_s4 + $0x38] sm:$0xff] %vm3068_vm0, %v2906_v16  ;;  %v2948_v27 = vmul.f32 %v2602_v49, %v2360_v17  ;;  %v521_v42 = vadd.f32 %v520_v52, %v124_v33  ;;  %v581_v56 = vadd.f32 %v580_v10, %v144_v1  ;;  %v2707_v1 = vpop.permute.xlu0 %2706 }
 0x19e   :  { %3707 = vrcp.f32 %v6311_v15  ;;  %v2184_v58 = vsel %vm6299_vm14, %v5681_v47, %v2180_v61  ;;  %3116 = vst [vmem:[%s8091_s4 + $0x180] sm:$0xff] %v2947_v45  ;;  %v641_v31 = vadd.f32 %v640_v48, %v164_v19  ;;  %v1892_v25 = vmul.f32 %v5942_v40, %v5893_v6  ;;  %v2361_v61 = vld [vmem:[%s8090_s3 + $0x190] sm:$0xff] }
 0x19f   :  { %v2189_v29 = vsel %vm6271_vm13, %v2188_v50, %v2184_v58  ;;  %3117 = vst.msk [vmem:[%s8091_s4 + $0x188] sm:$0xff] %vm3068_vm0, %v2948_v27  ;;  %v3344_v9 = vmul.f32 -1.442695, %v521_v42  ;;  %v3364_v39 = vmul.f32 -1.442695, %v581_v56  ;;  %vm1896_vm15 = vweird.f32 %v5893_v6  ;;  %v2607_v50 = vpop.permute.xlu1 %2606 }
 0x1a0   :  { %2856 = vperm.xlu0 %3422, %v2189_v29   ;;  %v3384_v47 = vmul.f32 -1.442695, %v641_v31  ;;  %v1893_v35 = vsub.f32 1.0, %v1892_v25  ;;  %vm1897_vm2 = vweird.f32 %v5942_v40  ;;  %v1900_v12 = vand.u32 2147483647, %v5893_v6 }
 0x1a1   :  { %3709 = vpow2.f32 %v3344_v9  ;;  %v1902_v63 = vand.u32 2147483648, %v5893_v6  ;;  %v2192_v7 = vmul.f32 %v5813_v59, %v5761_v55  ;;  %vm2196_vm3 = vweird.f32 %v5761_v55  ;;  %vm6358_vm6 = vmor %vm1896_vm15, %vm1897_vm2  ;;  %v2447_v6 = vld [vmem:[%s8090_s3 + $0x440] sm:$0xff] }
 0x1a2   :  { %v6346_v53 = vpop.eup %3703  ;;  %3711 = vpow2.f32 %v3364_v39  ;;  %v1894_v49 = vmul.f32 %v5942_v40, %v1893_v35  ;;  %vm6349_vm4 = vcmp.eq.f32.partialorder %v1900_v12, 8.507059e+37  ;;  %vm2197_vm5 = vweird.f32 %v5813_v59  ;;  %v2402_v35 = vld [vmem:[%s8090_s3 + $0x2d8] sm:$0xff]  ;;  %v145_v12 = vld [vmem:[%s8089_s2 + $0x140] sm:$0xff] }
 0x1a3   :  { %v6354_v54 = vpop.eup %3705  ;;  %3713 = vpow2.f32 %v3384_v47  ;;  %v1903_v5 = vor.u32 1.1754944e-38, %v1902_v63  ;;  %v2193_v2 = vsub.f32 1.0, %v2192_v7  ;;  %v2200_v23 = vand.u32 2147483647, %v5761_v55  ;;  %vm6390_vm9 = vmor %vm2196_vm3, %vm2197_vm5  ;;  %v2401_v47 = vld [vmem:[%s8090_s3 + $0x2d0] sm:$0xff]  ;;  %v583_v63 = vpop.f32.mrf.mxu1 }
 0x1a4   :  { %v6363_v41 = vpop.eup %3707  ;;  %v1895_v17 = vadd.f32 %v5942_v40, %v1894_v49  ;;  %v2202_v33 = vand.u32 2147483648, %v5761_v55  ;;  %v1277_v52 = vmul.f32 %v5796_v57, %v5725_v36  ;;  %vm1281_vm7 = vweird.f32 %v5725_v36 }
 0x1a5   :  { %v2194_v10 = vmul.f32 %v5813_v59, %v2193_v2  ;;  %vm6374_vm8 = vcmp.eq.f32.partialorder %v2200_v23, 8.507059e+37  ;;  %vm1282_vm1 = vweird.f32 %v5796_v57  ;;  %v1285_v11 = vand.u32 2147483647, %v5725_v36  ;;  %v165_v23 = vld [vmem:[%s8089_s2 + $0x1e0] sm:$0xff] }
 0x1a6   :  { %v1899_v16 = vsel %vm6358_vm6, %v5942_v40, %v1895_v17  ;;  %v2203_v19 = vor.u32 1.1754944e-38, %v2202_v33  ;;  %v1278_v48 = vsub.f32 1.0, %v1277_v52  ;;  %v1287_v38 = vand.u32 2147483648, %v5725_v36  ;;  %v2362_v40 = vld [vmem:[%s8090_s3 + $0x198] sm:$0xff]  ;;  %vm6429_vm11 = vmor %vm1281_vm7, %vm1282_vm1  ;;  %v703_v36 = vpop.f32.mrf.mxu3 }
 0x1a7   :  { %v3710_v27 = vpop.eup %3709  ;;  %v1904_v55 = vsel %vm6349_vm4, %v1903_v5, %v1899_v16  ;;  %v2195_v42 = vadd.f32 %v5813_v59, %v2194_v10  ;;  %vm6404_vm10 = vcmp.eq.f32.partialorder %v1285_v11, 8.507059e+37  ;;  %v3035_v58 = vmul.f32 %v2822_v28, %v2447_v6 }
 0x1a8   :  { %v3712_v31 = vpop.eup %3711  ;;  %v6408_v25 = vadd.f32 1.0, %v3710_v27  ;;  %2761 = vperm.xlu2 %3424, %v1904_v55   ;;  %v1279_v29 = vmul.f32 %v5796_v57, %v1278_v48  ;;  %v1288_v9 = vor.u32 1.1754944e-38, %v1287_v38  ;;  %v3036_v39 = vmul.f32 %v2822_v28, %v2448_v22  ;;  %v643_v28 = vpop.f32.mrf.mxu2 }
 0x1a9   :  { %v3714_v7 = vpop.eup %3713  ;;  %v6420_v49 = vadd.f32 1.0, %v3712_v31  ;;  %v2199_v0 = vsel %vm6390_vm9, %v5813_v59, %v2195_v42  ;;  %3204 = vst [vmem:[%s8091_s4 + $0x440] sm:$0xff] %v3035_v58  ;;  %v2949_v5 = vmul.f32 %v2607_v50, %v2361_v61  ;;  %v2950_v2 = vmul.f32 %v2607_v50, %v2362_v40  ;;  %v185_v59 = vld [vmem:[%s8089_s2 + $0x280] sm:$0xff]  ;;  %v6480_v40 = vpop.permute.xlu0 %2811 }
 0x1aa   :  { %3715 = vrcp.f32 %v6408_v25  ;;  %v6443_v17 = vadd.f32 1.0, %v3714_v7  ;;  %v2204_v33 = vsel %vm6374_vm8, %v2203_v19, %v2199_v0  ;;  %v1280_v52 = vadd.f32 %v5796_v57, %v1279_v29  ;;  %3205 = vst.msk [vmem:[%s8091_s4 + $0x448] sm:$0xff] %vm3068_vm0, %v3036_v39  ;;  %v6472_v19 = vpop.permute.xlu1 %2711  ;;  %v2327_v0 = vld [vmem:[%s8090_s3 + $0x80] sm:$0xff] }
 0x1ab   :  { %3717 = vrcp.f32 %v6420_v49  ;;  %2861 = vperm.xlu1 %3423, %v2204_v33   ;;  %3118 = vst [vmem:[%s8091_s4 + $0x190] sm:$0xff] %v2949_v5  ;;  %v2989_v50 = vmul.f32 %v2707_v1, %v2401_v47  ;;  %v2990_v6 = vmul.f32 %v2707_v1, %v2402_v35  ;;  %v584_v10 = vadd.f32 %v583_v63, %v145_v12  ;;  %v2328_v33 = vld [vmem:[%s8090_s3 + $0x88] sm:$0xff] }
 0x1ac   :  { %3719 = vrcp.f32 %v6443_v17  ;;  %v1284_v51 = vsel %vm6429_vm11, %v5796_v57, %v1280_v52  ;;  %3119 = vst.msk [vmem:[%s8091_s4 + $0x198] sm:$0xff] %vm3068_vm0, %v2950_v2  ;;  %v644_v11 = vadd.f32 %v643_v28, %v165_v23  ;;  %v704_v22 = vadd.f32 %v703_v36, %v185_v59  ;;  %v2522_v57 = vpop.permute.xlu2 %2521  ;;  %v166_v35 = vld [vmem:[%s8089_s2 + $0x1e8] sm:$0xff] }
 0x1ad   :  { %v1289_v16 = vsel %vm6404_vm10, %v1288_v9, %v1284_v51  ;;  %3158 = vst [vmem:[%s8091_s4 + $0x2d0] sm:$0xff] %v2989_v50  ;;  %v3365_v1 = vmul.f32 -1.442695, %v584_v10  ;;  %v2207_v45 = vmul.f32 %v6080_v34, %v6028_v24  ;;  %vm2211_vm12 = vweird.f32 %v6028_v24 }
 0x1ae   :  { %2556 = vperm.xlu0 %3422, %v1289_v16   ;;  %3159 = vst.msk [vmem:[%s8091_s4 + $0x2d8] sm:$0xff] %vm3068_vm0, %v2990_v6  ;;  %v3385_v48 = vmul.f32 -1.442695, %v644_v11  ;;  %v3405_v38 = vmul.f32 -1.442695, %v704_v22  ;;  %vm2212_vm13 = vweird.f32 %v6080_v34  ;;  %v2217_v61 = vand.u32 2147483648, %v6028_v24 }
 0x1af   :  { %3721 = vpow2.f32 %v3365_v1  ;;  %v2208_v27 = vsub.f32 1.0, %v2207_v45  ;;  %v2215_v55 = vand.u32 2147483647, %v6028_v24  ;;  %v1292_v42 = vmul.f32 %v5931_v21, %v5858_v30  ;;  %vm6502_vm3 = vmor %vm2211_vm12, %vm2212_vm13 }
 0x1b0   :  { %v6485_v56 = vpop.eup %3715  ;;  %3723 = vpow2.f32 %v3385_v48  ;;  %v2218_v58 = vor.u32 1.1754944e-38, %v2217_v61  ;;  %vm1296_vm14 = vweird.f32 %v5858_v30  ;;  %vm1297_vm15 = vweird.f32 %v5931_v21  ;;  %v2443_v48 = vld [vmem:[%s8090_s3 + $0x420] sm:$0xff]  ;;  %v646_v61 = vpop.f32.mrf.mxu2 }
 0x1b1   :  { %v6489_v31 = vpop.eup %3717  ;;  %3725 = vpow2.f32 %v3405_v38  ;;  %v2209_v29 = vmul.f32 %v6080_v34, %v2208_v27  ;;  %vm6492_vm2 = vcmp.eq.f32.partialorder %v2215_v55, 8.507059e+37  ;;  %v1293_v39 = vsub.f32 1.0, %v1292_v42  ;;  %vm6522_vm6 = vmor %vm1296_vm14, %vm1297_vm15  ;;  %v2444_v38 = vld [vmem:[%s8090_s3 + $0x428] sm:$0xff]  ;;  %v706_v27 = vpop.f32.mrf.mxu3 }
 0x1b2   :  { %v6496_v47 = vpop.eup %3719  ;;  %v1300_v12 = vand.u32 2147483647, %v5858_v30  ;;  %v1302_v63 = vand.u32 2147483648, %v5858_v30  ;;  %v1592_v7 = vmul.f32 %v5935_v14, %v5870_v62  ;;  %vm1596_vm4 = vweird.f32 %v5870_v62  ;;  %v2403_v30 = vld [vmem:[%s8090_s3 + $0x2e0] sm:$0xff] }
 0x1b3   :  { %v2210_v32 = vadd.f32 %v6080_v34, %v2209_v29  ;;  %v1294_v24 = vmul.f32 %v5931_v21, %v1293_v39  ;;  %vm1597_vm5 = vweird.f32 %v5935_v14  ;;  %v1600_v5 = vand.u32 2147483647, %v5870_v62  ;;  %v2369_v29 = vld [vmem:[%s8090_s3 + $0x1d0] sm:$0xff] }
 0x1b4   :  { %vm6526_vm7 = vcmp.eq.f32.partialorder %v1300_v12, 8.507059e+37  ;;  %v1303_v28 = vor.u32 1.1754944e-38, %v1302_v63  ;;  %v1593_v59 = vsub.f32 1.0, %v1592_v7  ;;  %v1602_v36 = vand.u32 2147483648, %v5870_v62  ;;  %vm6568_vm1 = vmor %vm1596_vm4, %vm1597_vm5  ;;  %v6582_v62 = vpop.permute.xlu2 %2626  ;;  %v6584_v12 = vpop.permute.xlu1 %2816 }
 0x1b5   :  { %v3722_v52 = vpop.eup %3721  ;;  %v2214_v50 = vsel %vm6502_vm3, %v6080_v34, %v2210_v32  ;;  %v1295_v6 = vadd.f32 %v5931_v21, %v1294_v24  ;;  %vm6541_vm8 = vcmp.eq.f32.partialorder %v1600_v5, 8.507059e+37  ;;  %v2915_v51 = vmul.f32 %v2522_v57, %v2327_v0  ;;  %v2404_v34 = vld [vmem:[%s8090_s3 + $0x2e8] sm:$0xff]  ;;  %v6592_v0 = vpop.permute.xlu0 %2511 }
 0x1b6   :  { %v3724_v11 = vpop.eup %3723  ;;  %v6545_v22 = vadd.f32 1.0, %v3722_v52  ;;  %v2219_v16 = vsel %vm6492_vm2, %v2218_v58, %v2214_v50  ;;  %v1594_v1 = vmul.f32 %v5935_v14, %v1593_v59  ;;  %v1603_v45 = vor.u32 1.1754944e-38, %v1602_v36 }
 0x1b7   :  { %v3726_v55 = vpop.eup %3725  ;;  %v6559_v42 = vadd.f32 1.0, %v3724_v11  ;;  %2866 = vperm.xlu2 %3424, %v2219_v16   ;;  %v1299_v58 = vsel %vm6522_vm6, %v5931_v21, %v1295_v6  ;;  %v2916_v9 = vmul.f32 %v2522_v57, %v2328_v33  ;;  %3084 = vst [vmem:[%s8091_s4 + $0x80] sm:$0xff] %v2915_v51  ;;  %v2991_v39 = vmul.f32 %v6472_v19, %v2403_v30  ;;  %v186_v21 = vld [vmem:[%s8089_s2 + $0x288] sm:$0xff] }
 0x1b8   :  { %3727 = vrcp.f32 %v6545_v22  ;;  %v6587_v57 = vadd.f32 1.0, %v3726_v55  ;;  %v1304_v63 = vsel %vm6526_vm7, %v1303_v28, %v1299_v58  ;;  %v1595_v7 = vadd.f32 %v5935_v14, %v1594_v1 }
 0x1b9   :  { %3729 = vrcp.f32 %v6559_v42  ;;  %2561 = vperm.xlu1 %3423, %v1304_v63   ;;  %3085 = vst.msk [vmem:[%s8091_s4 + $0x88] sm:$0xff] %vm3068_vm0, %v2916_v9  ;;  %v2992_v32 = vmul.f32 %v6472_v19, %v2404_v34  ;;  %v3031_v24 = vmul.f32 %v6480_v40, %v2443_v48  ;;  %v3032_v5 = vmul.f32 %v6480_v40, %v2444_v38  ;;  %v125_v34 = vld [vmem:[%s8089_s2 + $0xa0] sm:$0xff]  ;;  %v523_v48 = vpop.f32.mrf.mxu0 }
 0x1ba   :  { %3731 = vrcp.f32 %v6587_v57  ;;  %v1599_v2 = vsel %vm6568_vm1, %v5935_v14, %v1595_v7  ;;  %3160 = vst [vmem:[%s8091_s4 + $0x2e0] sm:$0xff] %v2991_v39  ;;  %v647_v23 = vadd.f32 %v646_v61, %v166_v35  ;;  %v707_v28 = vadd.f32 %v706_v27, %v186_v21 }
 0x1bb   :  { %v1604_v59 = vsel %vm6541_vm8, %v1603_v45, %v1599_v2  ;;  %3161 = vst.msk [vmem:[%s8091_s4 + $0x2e8] sm:$0xff] %vm3068_vm0, %v2992_v32  ;;  %v1307_v19 = vmul.f32 %v6209_v46, %v6141_v26  ;;  %vm1311_vm9 = vweird.f32 %v6141_v26  ;;  %vm1312_vm10 = vweird.f32 %v6209_v46 }
 0x1bc   :  { %2661 = vperm.xlu0 %3422, %v1604_v59   ;;  %3200 = vst [vmem:[%s8091_s4 + $0x420] sm:$0xff] %v3031_v24  ;;  %v3386_v14 = vmul.f32 -1.442695, %v647_v23  ;;  %v3406_v40 = vmul.f32 -1.442695, %v707_v28  ;;  %v1317_v36 = vand.u32 2147483648, %v6141_v26  ;;  %v1607_v33 = vmul.f32 %v6069_v43, %v5991_v44  ;;  %vm6652_vm14 = vmor %vm1311_vm9, %vm1312_vm10  ;;  %v6681_v63 = vpop.permute.xlu2 %2731  ;;  %v6683_v7 = vpop.permute.xlu1 %2516 }
 0x1bd   :  { %3201 = vst.msk [vmem:[%s8091_s4 + $0x428] sm:$0xff] %vm3068_vm0, %v3032_v5  ;;  %v1308_v30 = vsub.f32 1.0, %v1307_v19  ;;  %v1315_v52 = vand.u32 2147483647, %v6141_v26  ;;  %vm1611_vm11 = vweird.f32 %v5991_v44  ;;  %vm1612_vm12 = vweird.f32 %v6069_v43  ;;  %v2370_v26 = vld [vmem:[%s8090_s3 + $0x1d8] sm:$0xff]  ;;  %v6690_v23 = vpop.permute.xlu0 %2616 }
 0x1be   :  { %v6632_v50 = vpop.eup %3727  ;;  %3733 = vpow2.f32 %v3386_v14  ;;  %v1318_v6 = vor.u32 1.1754944e-38, %v1317_v36  ;;  %v1608_v10 = vsub.f32 1.0, %v1607_v33  ;;  %v1615_v51 = vand.u32 2147483647, %v5991_v44  ;;  %vm6675_vm3 = vmor %vm1611_vm11, %vm1612_vm12  ;;  %v2323_v36 = vld [vmem:[%s8090_s3 + $0x60] sm:$0xff] }
 0x1bf   :  { %v6635_v11 = vpop.eup %3729  ;;  %3735 = vpow2.f32 %v3406_v40  ;;  %v1309_v16 = vmul.f32 %v6209_v46, %v1308_v30  ;;  %vm6638_vm13 = vcmp.eq.f32.partialorder %v1315_v52, 8.507059e+37  ;;  %v1617_v45 = vand.u32 2147483648, %v5991_v44  ;;  %v2445_v44 = vld [vmem:[%s8090_s3 + $0x430] sm:$0xff]  ;;  %v2446_v40 = vld [vmem:[%s8090_s3 + $0x438] sm:$0xff] }
 0x1c0   :  { %v6646_v38 = vpop.eup %3731  ;;  %v1609_v27 = vmul.f32 %v6069_v43, %v1608_v10  ;;  %vm6657_vm15 = vcmp.eq.f32.partialorder %v1615_v51, 8.507059e+37  ;;  %v1907_v58 = vmul.f32 %v6073_v3, %v6005_v8  ;;  %vm1911_vm2 = vweird.f32 %v6005_v8  ;;  %v187_v51 = vld [vmem:[%s8089_s2 + $0x290] sm:$0xff] }
 0x1c1   :  { %v1310_v9 = vadd.f32 %v6209_v46, %v1309_v16  ;;  %v1618_v35 = vor.u32 1.1754944e-38, %v1617_v45  ;;  %vm1912_vm4 = vweird.f32 %v6073_v3  ;;  %v1915_v21 = vand.u32 2147483647, %v6005_v8  ;;  %v709_v16 = vpop.f32.mrf.mxu3 }
 0x1c2   :  { %v1610_v32 = vadd.f32 %v6069_v43, %v1609_v27  ;;  %v1908_v24 = vsub.f32 1.0, %v1907_v58  ;;  %v1917_v5 = vand.u32 2147483648, %v6005_v8  ;;  %v524_v2 = vadd.f32 %v523_v48, %v125_v34  ;;  %vm6727_vm6 = vmor %vm1911_vm2, %vm1912_vm4 }
 0x1c3   :  { %v1314_v28 = vsel %vm6652_vm14, %v6209_v46, %v1310_v9  ;;  %vm6695_vm5 = vcmp.eq.f32.partialorder %v1915_v21, 8.507059e+37  ;;  %v2957_v19 = vmul.f32 %v6582_v62, %v2369_v29  ;;  %v2958_v14 = vmul.f32 %v6582_v62, %v2370_v26  ;;  %v2324_v62 = vld [vmem:[%s8090_s3 + $0x68] sm:$0xff] }
 0x1c4   :  { %v3734_v33 = vpop.eup %3733  ;;  %v1319_v46 = vsel %vm6638_vm13, %v1318_v6, %v1314_v28  ;;  %v1614_v30 = vsel %vm6675_vm3, %v6069_v43, %v1610_v32  ;;  %v1909_v52 = vmul.f32 %v6073_v3, %v1908_v24  ;;  %v1918_v10 = vor.u32 1.1754944e-38, %v1917_v5  ;;  %v6778_v5 = vpop.permute.xlu2 %2836 }
 0x1c5   :  { %v3736_v45 = vpop.eup %3735  ;;  %v6719_v34 = vadd.f32 1.0, %v3734_v33  ;;  %2566 = vperm.xlu2 %3424, %v1319_v46   ;;  %v1619_v6 = vsel %vm6657_vm15, %v1618_v35, %v1614_v30  ;;  %v3345_v1 = vmul.f32 -1.442695, %v524_v2  ;;  %3126 = vst [vmem:[%s8091_s4 + $0x1d0] sm:$0xff] %v2957_v19  ;;  %v3033_v48 = vmul.f32 %v6584_v12, %v2445_v44  ;;  %v6780_v2 = vpop.permute.xlu1 %2621 }
 0x1c6   :  { %v6735_v61 = vadd.f32 1.0, %v3736_v45  ;;  %2666 = vperm.xlu1 %3423, %v1619_v6   ;;  %v1910_v27 = vadd.f32 %v6073_v3, %v1909_v52  ;;  %3127 = vst.msk [vmem:[%s8091_s4 + $0x1d8] sm:$0xff] %vm3068_vm0, %v2958_v14  ;;  %v3034_v8 = vmul.f32 %v6584_v12, %v2446_v40  ;;  %v2911_v55 = vmul.f32 %v6592_v0, %v2323_v36  ;;  %v146_v40 = vld [vmem:[%s8089_s2 + $0x148] sm:$0xff]  ;;  %v586_v36 = vpop.f32.mrf.mxu1  ;;  %v6798_v33 = vpop.permute.xlu0 %2721  ;;  %v2411_v45 = vld [vmem:[%s8090_s3 + $0x320] sm:$0xff] }
 0x1c7   :  { %3737 = vrcp.f32 %v6719_v34  ;;  %3202 = vst [vmem:[%s8091_s4 + $0x430] sm:$0xff] %v3033_v48  ;;  %v2912_v58 = vmul.f32 %v6592_v0, %v2324_v62  ;;  %v710_v29 = vadd.f32 %v709_v16, %v187_v51  ;;  %v1622_v26 = vmul.f32 %v6354_v54, %v6290_v60 }
 0x1c8   :  { %3739 = vrcp.f32 %v6735_v61  ;;  %v1914_v12 = vsel %vm6727_vm6, %v6073_v3, %v1910_v27  ;;  %3203 = vst.msk [vmem:[%s8091_s4 + $0x438] sm:$0xff] %vm3068_vm0, %v3034_v8  ;;  %vm1626_vm7 = vweird.f32 %v6290_v60  ;;  %vm1627_vm8 = vweird.f32 %v6354_v54 }
 0x1c9   :  { %v1919_v0 = vsel %vm6695_vm5, %v1918_v10, %v1914_v12  ;;  %3741 = vpow2.f32 %v3345_v1  ;;  %3080 = vst [vmem:[%s8091_s4 + $0x60] sm:$0xff] %v2911_v55  ;;  %v3407_v9 = vmul.f32 -1.442695, %v710_v29  ;;  %v1623_v39 = vsub.f32 1.0, %v1622_v26  ;;  %vm6786_vm10 = vmor %vm1626_vm7, %vm1627_vm8  ;;  %v2412_v55 = vld [vmem:[%s8090_s3 + $0x328] sm:$0xff]  ;;  %v2325_v26 = vld [vmem:[%s8090_s3 + $0x70] sm:$0xff] }
 0x1ca   :  { %2766 = vperm.xlu0 %3422, %v1919_v0   ;;  %3081 = vst.msk [vmem:[%s8091_s4 + $0x68] sm:$0xff] %vm3068_vm0, %v2912_v58  ;;  %v1630_v3 = vand.u32 2147483647, %v6290_v60  ;;  %v1632_v35 = vand.u32 2147483648, %v6290_v60  ;;  %v1922_v21 = vmul.f32 %v6216_v20, %v6163_v4  ;;  %vm1926_vm1 = vweird.f32 %v6163_v4 }
 0x1cb   :  { %3743 = vpow2.f32 %v3407_v9  ;;  %v1624_v32 = vmul.f32 %v6354_v54, %v1623_v39  ;;  %vm1927_vm9 = vweird.f32 %v6216_v20  ;;  %v1930_v24 = vand.u32 2147483647, %v6163_v4 }
 0x1cc   :  { %vm6790_vm11 = vcmp.eq.f32.partialorder %v1630_v3, 8.507059e+37  ;;  %v1633_v59 = vor.u32 1.1754944e-38, %v1632_v35  ;;  %v1923_v19 = vsub.f32 1.0, %v1922_v21  ;;  %v1932_v14 = vand.u32 2147483648, %v6163_v4  ;;  %vm6825_vm15 = vmor %vm1926_vm1, %vm1927_vm9  ;;  %v2326_v35 = vld [vmem:[%s8090_s3 + $0x78] sm:$0xff]  ;;  %v2365_v21 = vld [vmem:[%s8090_s3 + $0x1b0] sm:$0xff] }
 0x1cd   :  { %v6800_v60 = vpop.eup %3737  ;;  %v1625_v46 = vadd.f32 %v6354_v54, %v1624_v32  ;;  %vm6803_vm12 = vcmp.eq.f32.partialorder %v1930_v24, 8.507059e+37  ;;  %v2222_v52 = vmul.f32 %v6231_v37, %v6176_v13  ;;  %vm2226_vm13 = vweird.f32 %v6176_v13  ;;  %v2366_v32 = vld [vmem:[%s8090_s3 + $0x1b8] sm:$0xff]  ;;  %v6898_v30 = vpop.permute.xlu1 %2726  ;;  %v167_v4 = vld [vmem:[%s8089_s2 + $0x1f0] sm:$0xff] }
 0x1ce   :  { %v6810_v10 = vpop.eup %3739  ;;  %v1924_v62 = vmul.f32 %v6216_v20, %v1923_v19  ;;  %v1933_v51 = vor.u32 1.1754944e-38, %v1932_v14  ;;  %vm2227_vm14 = vweird.f32 %v6231_v37  ;;  %v2230_v16 = vand.u32 2147483647, %v6176_v13 }
 0x1cf   :  { %v3742_v6 = vpop.eup %3741  ;;  %v1629_v43 = vsel %vm6786_vm10, %v6354_v54, %v1625_v46  ;;  %v2223_v48 = vsub.f32 1.0, %v2222_v52  ;;  %v2232_v27 = vand.u32 2147483648, %v6176_v13  ;;  %v587_v8 = vadd.f32 %v586_v36, %v146_v40  ;;  %vm6866_vm3 = vmor %vm2226_vm13, %vm2227_vm14 }
 0x1d0   :  { %v6833_v58 = vadd.f32 1.0, %v3742_v6  ;;  %v1634_v54 = vsel %vm6790_vm11, %v1633_v59, %v1629_v43  ;;  %v1925_v29 = vadd.f32 %v6216_v20, %v1924_v62  ;;  %vm6838_vm2 = vcmp.eq.f32.partialorder %v2230_v16, 8.507059e+37 }
 0x1d1   :  { %v3744_v12 = vpop.eup %3743  ;;  %2671 = vperm.xlu2 %3424, %v1634_v54   ;;  %v2224_v0 = vmul.f32 %v6231_v37, %v2223_v48  ;;  %v2233_v9 = vor.u32 1.1754944e-38, %v2232_v27  ;;  %v3366_v39 = vmul.f32 -1.442695, %v587_v8  ;;  %v2999_v3 = vmul.f32 %v6681_v63, %v2411_v45 }
 0x1d2   :  { %3745 = vrcp.f32 %v6833_v58  ;;  %v6857_v24 = vadd.f32 1.0, %v3744_v12  ;;  %v1929_v44 = vsel %vm6825_vm15, %v6216_v20, %v1925_v29  ;;  %v3000_v59 = vmul.f32 %v6681_v63, %v2412_v55  ;;  %v2453_v12 = vld [vmem:[%s8090_s3 + $0x470] sm:$0xff] }
 0x1d3   :  { %v1934_v19 = vsel %vm6803_vm12, %v1933_v51, %v1929_v44  ;;  %v2225_v14 = vadd.f32 %v6231_v37, %v2224_v0  ;;  %3747 = vpow2.f32 %v3366_v39  ;;  %3168 = vst [vmem:[%s8091_s4 + $0x320] sm:$0xff] %v2999_v3  ;;  %v2913_v20 = vmul.f32 %v6683_v7, %v2325_v26  ;;  %v6910_v51 = vpop.permute.xlu0 %2826  ;;  %v649_v26 = vpop.f32.mrf.mxu2 }
 0x1d4   :  { %3749 = vrcp.f32 %v6857_v24  ;;  %2771 = vperm.xlu1 %3423, %v1934_v19   ;;  %3169 = vst.msk [vmem:[%s8091_s4 + $0x328] sm:$0xff] %vm3068_vm0, %v3000_v59  ;;  %v2914_v13 = vmul.f32 %v6683_v7, %v2326_v35  ;;  %v2953_v63 = vmul.f32 %v6690_v23, %v2365_v21  ;;  %v2954_v40 = vmul.f32 %v6690_v23, %v2366_v32  ;;  %v6896_v7 = vpop.permute.xlu2 %2536  ;;  %v2454_v59 = vld [vmem:[%s8090_s3 + $0x478] sm:$0xff] }
 0x1d5   :  { %v2229_v36 = vsel %vm6866_vm3, %v6231_v37, %v2225_v14  ;;  %3082 = vst [vmem:[%s8091_s4 + $0x70] sm:$0xff] %v2913_v20  ;;  %v1937_v46 = vmul.f32 %v6496_v47, %v6443_v17  ;;  %vm1941_vm4 = vweird.f32 %v6443_v17  ;;  %vm1942_vm5 = vweird.f32 %v6496_v47  ;;  %v2367_v20 = vld [vmem:[%s8090_s3 + $0x1c0] sm:$0xff] }
 0x1d6   :  { %v2234_v23 = vsel %vm6838_vm2, %v2233_v9, %v2229_v36  ;;  %3083 = vst.msk [vmem:[%s8091_s4 + $0x78] sm:$0xff] %vm3068_vm0, %v2914_v13  ;;  %v1945_v37 = vand.u32 2147483647, %v6443_v17  ;;  %v1947_v52 = vand.u32 2147483648, %v6443_v17  ;;  %v2237_v62 = vmul.f32 %v6363_v41, %v6311_v15  ;;  %vm6951_vm10 = vmor %vm1941_vm4, %vm1942_vm5  ;;  %v2368_v13 = vld [vmem:[%s8090_s3 + $0x1c8] sm:$0xff] }
 0x1d7   :  { %2871 = vperm.xlu0 %3422, %v2234_v23   ;;  %3122 = vst [vmem:[%s8091_s4 + $0x1b0] sm:$0xff] %v2953_v63  ;;  %v1938_v16 = vsub.f32 1.0, %v1937_v46  ;;  %vm2241_vm6 = vweird.f32 %v6311_v15  ;;  %vm2242_vm7 = vweird.f32 %v6363_v41  ;;  %v2245_v45 = vand.u32 2147483647, %v6311_v15  ;;  %v2407_v23 = vld [vmem:[%s8090_s3 + $0x300] sm:$0xff] }
 0x1d8   :  { %v6918_v6 = vpop.eup %3745  ;;  %3123 = vst.msk [vmem:[%s8091_s4 + $0x1b8] sm:$0xff] %vm3068_vm0, %v2954_v40  ;;  %vm6924_vm8 = vcmp.eq.f32.partialorder %v1945_v37, 8.507059e+37  ;;  %v1948_v1 = vor.u32 1.1754944e-38, %v1947_v52  ;;  %v2238_v48 = vsub.f32 1.0, %v2237_v62  ;;  %v2247_v27 = vand.u32 2147483648, %v6311_v15  ;;  %vm6962_vm12 = vmor %vm2241_vm6, %vm2242_vm7  ;;  %v2408_v37 = vld [vmem:[%s8090_s3 + $0x308] sm:$0xff]  ;;  %v6996_v62 = vpop.permute.xlu1 %2831 }
 0x1d9   :  { %v3748_v8 = vpop.eup %3747  ;;  %v1939_v55 = vmul.f32 %v6496_v47, %v1938_v16  ;;  %vm6930_vm1 = vcmp.eq.f32.partialorder %v2245_v45, 8.507059e+37  ;;  %v1322_v29 = vmul.f32 %v6346_v53, %v6275_v18  ;;  %vm1326_vm9 = vweird.f32 %v6275_v18 }
 0x1da   :  { %v6943_v0 = vpop.eup %3749  ;;  %v6945_v9 = vadd.f32 1.0, %v3748_v8  ;;  %v2239_v3 = vmul.f32 %v6363_v41, %v2238_v48  ;;  %v2248_v35 = vor.u32 1.1754944e-38, %v2247_v27  ;;  %vm1327_vm11 = vweird.f32 %v6346_v53 }
 0x1db   :  { %v1940_v21 = vadd.f32 %v6496_v47, %v1939_v55  ;;  %v1323_v17 = vsub.f32 1.0, %v1322_v29  ;;  %v1330_v44 = vand.u32 2147483647, %v6275_v18  ;;  %v1332_v28 = vand.u32 2147483648, %v6275_v18  ;;  %vm7007_vm14 = vmor %vm1326_vm9, %vm1327_vm11  ;;  %v7015_v43 = vpop.permute.xlu0 %2526 }
 0x1dc   :  { %3751 = vrcp.f32 %v6945_v9  ;;  %v2240_v19 = vadd.f32 %v6363_v41, %v2239_v3  ;;  %v650_v14 = vadd.f32 %v649_v26, %v167_v4  ;;  %v3041_v15 = vmul.f32 %v6778_v5, %v2453_v12  ;;  %v6994_v52 = vpop.permute.xlu2 %2641 }
 0x1dd   :  { %v1944_v63 = vsel %vm6951_vm10, %v6496_v47, %v1940_v21  ;;  %v1324_v40 = vmul.f32 %v6346_v53, %v1323_v17  ;;  %vm6984_vm13 = vcmp.eq.f32.partialorder %v1330_v44, 8.507059e+37  ;;  %v1333_v46 = vor.u32 1.1754944e-38, %v1332_v28  ;;  %v188_v44 = vld [vmem:[%s8089_s2 + $0x298] sm:$0xff]  ;;  %v712_v28 = vpop.f32.mrf.mxu3 }
 0x1de   :  { %v1949_v47 = vsel %vm6924_vm8, %v1948_v1, %v1944_v63  ;;  %v2244_v16 = vsel %vm6962_vm12, %v6363_v41, %v2240_v19  ;;  %v3387_v48 = vmul.f32 -1.442695, %v650_v14  ;;  %v3042_v27 = vmul.f32 %v6778_v5, %v2454_v59  ;;  %3210 = vst [vmem:[%s8091_s4 + $0x470] sm:$0xff] %v3041_v15  ;;  %v2333_v15 = vld [vmem:[%s8090_s3 + $0xb0] sm:$0xff] }
 0x1df   :  { %2776 = vperm.xlu2 %3424, %v1949_v47   ;;  %v2249_v41 = vsel %vm6930_vm1, %v2248_v35, %v2244_v16  ;;  %v1325_v1 = vadd.f32 %v6346_v53, %v1324_v40  ;;  %v2955_v18 = vmul.f32 %v6780_v2, %v2367_v20  ;;  %v2956_v8 = vmul.f32 %v6780_v2, %v2368_v13 }
 0x1e0   :  { %2876 = vperm.xlu1 %3423, %v2249_v41   ;;  %3753 = vpow2.f32 %v3387_v48  ;;  %3211 = vst.msk [vmem:[%s8091_s4 + $0x478] sm:$0xff] %vm3068_vm0, %v3042_v27  ;;  %v2995_v5 = vmul.f32 %v6798_v33, %v2407_v23  ;;  %v2996_v55 = vmul.f32 %v6798_v33, %v2408_v37  ;;  %v2252_v54 = vmul.f32 %v6646_v38, %v6587_v57  ;;  %v7090_v20 = vpop.permute.xlu1 %2531  ;;  %v2334_v27 = vld [vmem:[%s8090_s3 + $0xb8] sm:$0xff]  ;;  %v2409_v41 = vld [vmem:[%s8090_s3 + $0x310] sm:$0xff] }
 0x1e1   :  { %v1329_v29 = vsel %vm7007_vm14, %v6346_v53, %v1325_v1  ;;  %3124 = vst [vmem:[%s8091_s4 + $0x1c0] sm:$0xff] %v2955_v18  ;;  %vm2256_vm15 = vweird.f32 %v6587_v57  ;;  %vm2257_vm2 = vweird.f32 %v6646_v38  ;;  %v2260_v2 = vand.u32 2147483647, %v6587_v57 }
 0x1e2   :  { %v7039_v4 = vpop.eup %3751  ;;  %v1334_v33 = vsel %vm6984_vm13, %v1333_v46, %v1329_v29  ;;  %3125 = vst.msk [vmem:[%s8091_s4 + $0x1c8] sm:$0xff] %vm3068_vm0, %v2956_v8  ;;  %v2253_v53 = vsub.f32 1.0, %v2252_v54  ;;  %v2262_v26 = vand.u32 2147483648, %v6587_v57  ;;  %v1337_v12 = vmul.f32 %v6485_v56, %v6408_v25  ;;  %vm7073_vm6 = vmor %vm2256_vm15, %vm2257_vm2 }
 0x1e3   :  { %2571 = vperm.xlu0 %3422, %v1334_v33   ;;  %3164 = vst [vmem:[%s8091_s4 + $0x300] sm:$0xff] %v2995_v5  ;;  %vm7053_vm3 = vcmp.eq.f32.partialorder %v2260_v2, 8.507059e+37  ;;  %vm1341_vm4 = vweird.f32 %v6408_v25  ;;  %vm1342_vm5 = vweird.f32 %v6485_v56  ;;  %v1345_v3 = vand.u32 2147483647, %v6408_v25  ;;  %v7095_v23 = vpop.permute.xlu0 %2631  ;;  %v2410_v5 = vld [vmem:[%s8090_s3 + $0x318] sm:$0xff] }
 0x1e4   :  { %3165 = vst.msk [vmem:[%s8091_s4 + $0x308] sm:$0xff] %vm3068_vm0, %v2996_v55  ;;  %v2254_v35 = vmul.f32 %v6646_v38, %v2253_v53  ;;  %v2263_v21 = vor.u32 1.1754944e-38, %v2262_v26  ;;  %v1338_v32 = vsub.f32 1.0, %v1337_v12  ;;  %v1347_v17 = vand.u32 2147483648, %v6408_v25  ;;  %v7088_v57 = vpop.permute.xlu2 %2746  ;;  %vm7103_vm9 = vmor %vm1341_vm4, %vm1342_vm5  ;;  %v2449_v55 = vld [vmem:[%s8090_s3 + $0x450] sm:$0xff]  ;;  %v2450_v2 = vld [vmem:[%s8090_s3 + $0x458] sm:$0xff] }
 0x1e5   :  { %vm7077_vm7 = vcmp.eq.f32.partialorder %v1345_v3, 8.507059e+37  ;;  %v1637_v14 = vmul.f32 %v6489_v31, %v6420_v49  ;;  %vm1641_vm8 = vweird.f32 %v6420_v49  ;;  %vm1642_vm1 = vweird.f32 %v6489_v31 }
 0x1e6   :  { %v3754_v13 = vpop.eup %3753  ;;  %v2255_v63 = vadd.f32 %v6646_v38, %v2254_v35  ;;  %v1339_v40 = vmul.f32 %v6485_v56, %v1338_v32  ;;  %v1348_v36 = vor.u32 1.1754944e-38, %v1347_v17  ;;  %v1645_v46 = vand.u32 2147483647, %v6420_v49  ;;  %vm7143_vm11 = vmor %vm1641_vm8, %vm1642_vm1 }
 0x1e7   :  { %v7097_v37 = vadd.f32 1.0, %v3754_v13  ;;  %v1638_v16 = vsub.f32 1.0, %v1637_v14  ;;  %v1647_v45 = vand.u32 2147483648, %v6420_v49  ;;  %v713_v48 = vadd.f32 %v712_v28, %v188_v44 }
 0x1e8   :  { %v2259_v25 = vsel %vm7073_vm6, %v6646_v38, %v2255_v63  ;;  %v1340_v1 = vadd.f32 %v6485_v56, %v1339_v40  ;;  %vm7118_vm10 = vcmp.eq.f32.partialorder %v1645_v46, 8.507059e+37  ;;  %v2921_v8 = vmul.f32 %v6896_v7, %v2333_v15  ;;  %v7176_v44 = vpop.permute.xlu1 %2636 }
 0x1e9   :  { %3755 = vrcp.f32 %v7097_v37  ;;  %v2264_v38 = vsel %vm7053_vm3, %v2263_v21, %v2259_v25  ;;  %v1639_v54 = vmul.f32 %v6489_v31, %v1638_v16  ;;  %v1648_v29 = vor.u32 1.1754944e-38, %v1647_v45  ;;  %v2375_v16 = vld [vmem:[%s8090_s3 + $0x200] sm:$0xff] }
 0x1ea   :  { %2881 = vperm.xlu2 %3424, %v2264_v38   ;;  %v1344_v33 = vsel %vm7103_vm9, %v6485_v56, %v1340_v1  ;;  %v3408_v26 = vmul.f32 -1.442695, %v713_v48  ;;  %v2922_v12 = vmul.f32 %v6896_v7, %v2334_v27  ;;  %3090 = vst [vmem:[%s8091_s4 + $0xb0] sm:$0xff] %v2921_v8  ;;  %v2997_v39 = vmul.f32 %v6898_v30, %v2409_v41  ;;  %v2376_v41 = vld [vmem:[%s8090_s3 + $0x208] sm:$0xff] }
 0x1eb   :  { %v1349_v56 = vsel %vm7077_vm7, %v1348_v36, %v1344_v33  ;;  %v1640_v3 = vadd.f32 %v6489_v31, %v1639_v54  ;;  %v2998_v49 = vmul.f32 %v6898_v30, %v2410_v5  ;;  %v3037_v35 = vmul.f32 %v6910_v51, %v2449_v55  ;;  %v7187_v19 = vpop.permute.xlu0 %2736  ;;  %v2451_v5 = vld [vmem:[%s8090_s3 + $0x460] sm:$0xff]  ;;  %v2452_v33 = vld [vmem:[%s8090_s3 + $0x468] sm:$0xff] }
 0x1ec   :  { %2576 = vperm.xlu1 %3423, %v1349_v56   ;;  %3757 = vpow2.f32 %v3408_v26  ;;  %3091 = vst.msk [vmem:[%s8091_s4 + $0xb8] sm:$0xff] %vm3068_vm0, %v2922_v12  ;;  %v3038_v7 = vmul.f32 %v6910_v51, %v2450_v2  ;;  %v1352_v21 = vmul.f32 %v6918_v6, %v6833_v58  ;;  %vm1356_vm12 = vweird.f32 %v6833_v58  ;;  %v7174_v51 = vpop.permute.xlu2 %2851  ;;  %v2330_v56 = vld [vmem:[%s8090_s3 + $0x98] sm:$0xff]  ;;  %v2332_v54 = vld [vmem:[%s8090_s3 + $0xa8] sm:$0xff] }
 0x1ed   :  { %v1644_v30 = vsel %vm7143_vm11, %v6489_v31, %v1640_v3  ;;  %3166 = vst [vmem:[%s8091_s4 + $0x310] sm:$0xff] %v2997_v39  ;;  %vm1357_vm13 = vweird.f32 %v6918_v6  ;;  %v1360_v32 = vand.u32 2147483647, %v6833_v58  ;;  %v1362_v17 = vand.u32 2147483648, %v6833_v58  ;;  %v2329_v39 = vld [vmem:[%s8090_s3 + $0x90] sm:$0xff] }
 0x1ee   :  { %v1649_v28 = vsel %vm7118_vm10, %v1648_v29, %v1644_v30  ;;  %3167 = vst.msk [vmem:[%s8091_s4 + $0x318] sm:$0xff] %vm3068_vm0, %v2998_v49  ;;  %v1353_v31 = vsub.f32 1.0, %v1352_v21  ;;  %v1652_v59 = vmul.f32 %v6632_v50, %v6545_v22  ;;  %vm1656_vm14 = vweird.f32 %v6545_v22  ;;  %vm7215_vm3 = vmor %vm1356_vm12, %vm1357_vm13 }
 0x1ef   :  { %v7189_v14 = vpop.eup %3755  ;;  %2676 = vperm.xlu0 %3422, %v1649_v28   ;;  %3206 = vst [vmem:[%s8091_s4 + $0x450] sm:$0xff] %v3037_v35  ;;  %vm7194_vm15 = vcmp.eq.f32.partialorder %v1360_v32, 8.507059e+37  ;;  %v1363_v13 = vor.u32 1.1754944e-38, %v1362_v17  ;;  %vm1657_vm2 = vweird.f32 %v6632_v50  ;;  %v1660_v63 = vand.u32 2147483647, %v6545_v22 }
 0x1f0   :  { %3207 = vst.msk [vmem:[%s8091_s4 + $0x458] sm:$0xff] %vm3068_vm0, %v3038_v7  ;;  %v1354_v40 = vmul.f32 %v6918_v6, %v1353_v31  ;;  %v1653_v36 = vsub.f32 1.0, %v1652_v59  ;;  %v1662_v46 = vand.u32 2147483648, %v6545_v22  ;;  %v1952_v47 = vmul.f32 %v6635_v11, %v6559_v42  ;;  %vm7240_vm7 = vmor %vm1656_vm14, %vm1657_vm2  ;;  %v7280_v35 = vpop.permute.xlu1 %2741 }
 0x1f1   :  { %vm7219_vm4 = vcmp.eq.f32.partialorder %v1660_v63, 8.507059e+37  ;;  %vm1956_vm5 = vweird.f32 %v6559_v42  ;;  %vm1957_vm6 = vweird.f32 %v6635_v11  ;;  %v1960_v27 = vand.u32 2147483647, %v6559_v42  ;;  %v2374_v63 = vld [vmem:[%s8090_s3 + $0x1f8] sm:$0xff] }
 0x1f2   :  { %v3758_v25 = vpop.eup %3757  ;;  %v1355_v58 = vadd.f32 %v6918_v6, %v1354_v40  ;;  %v1654_v1 = vmul.f32 %v6632_v50, %v1653_v36  ;;  %v1663_v18 = vor.u32 1.1754944e-38, %v1662_v46  ;;  %v1953_v8 = vsub.f32 1.0, %v1952_v47  ;;  %vm7272_vm1 = vmor %vm1956_vm5, %vm1957_vm6 }
 0x1f3   :  { %v7234_v55 = vadd.f32 1.0, %v3758_v25  ;;  %vm7244_vm8 = vcmp.eq.f32.partialorder %v1960_v27, 8.507059e+37  ;;  %v1962_v29 = vand.u32 2147483648, %v6559_v42  ;;  %v2963_v2 = vmul.f32 %v6994_v52, %v2375_v16  ;;  %v7292_v30 = vpop.permute.xlu0 %2841  ;;  %v2417_v27 = vld [vmem:[%s8090_s3 + $0x350] sm:$0xff] }
 0x1f4   :  { %v1359_v22 = vsel %vm7215_vm3, %v6918_v6, %v1355_v58  ;;  %v1655_v53 = vadd.f32 %v6632_v50, %v1654_v1  ;;  %v1954_v26 = vmul.f32 %v6635_v11, %v1953_v8  ;;  %v2964_v12 = vmul.f32 %v6994_v52, %v2376_v41  ;;  %v7303_v31 = vpop.permute.xlu2 %2551  ;;  %v2418_v41 = vld [vmem:[%s8090_s3 + $0x358] sm:$0xff] }
 0x1f5   :  { %3759 = vrcp.f32 %v7234_v55  ;;  %v1364_v3 = vsel %vm7194_vm15, %v1363_v13, %v1359_v22  ;;  %v1963_v52 = vor.u32 1.1754944e-38, %v1962_v29  ;;  %3132 = vst [vmem:[%s8091_s4 + $0x200] sm:$0xff] %v2963_v2  ;;  %v3039_v49 = vmul.f32 %v6996_v62, %v2451_v5  ;;  %v2371_v29 = vld [vmem:[%s8090_s3 + $0x1e0] sm:$0xff] }
 0x1f6   :  { %2581 = vperm.xlu2 %3424, %v1364_v3   ;;  %v1659_v7 = vsel %vm7240_vm7, %v6632_v50, %v1655_v53  ;;  %v1955_v42 = vadd.f32 %v6635_v11, %v1954_v26  ;;  %3133 = vst.msk [vmem:[%s8091_s4 + $0x208] sm:$0xff] %vm3068_vm0, %v2964_v12  ;;  %v3040_v21 = vmul.f32 %v6996_v62, %v2452_v33  ;;  %vm1671_vm9 = vweird.f32 %v6945_v9 }
 0x1f7   :  { %v1664_v32 = vsel %vm7219_vm4, %v1663_v18, %v1659_v7  ;;  %3208 = vst [vmem:[%s8091_s4 + $0x460] sm:$0xff] %v3039_v49  ;;  %v2917_v50 = vmul.f32 %v7015_v43, %v2329_v39  ;;  %v2918_v17 = vmul.f32 %v7015_v43, %v2330_v56  ;;  %v1667_v28 = vmul.f32 %v7039_v4, %v6945_v9  ;;  %v2331_v18 = vld [vmem:[%s8090_s3 + $0xa0] sm:$0xff]  ;;  %v2372_v39 = vld [vmem:[%s8090_s3 + $0x1e8] sm:$0xff] }
 0x1f8   :  { %2681 = vperm.xlu1 %3423, %v1664_v32   ;;  %v1959_v62 = vsel %vm7272_vm1, %v6635_v11, %v1955_v42  ;;  %3209 = vst.msk [vmem:[%s8091_s4 + $0x468] sm:$0xff] %vm3068_vm0, %v3040_v21  ;;  %vm1672_vm10 = vweird.f32 %v7039_v4  ;;  %v1675_v59 = vand.u32 2147483647, %v6945_v9  ;;  %v1677_v43 = vand.u32 2147483648, %v6945_v9  ;;  %v7371_v2 = vpop.permute.xlu1 %2846 }
 0x1f9   :  { %v1964_v15 = vsel %vm7244_vm8, %v1963_v52, %v1959_v62  ;;  %3086 = vst [vmem:[%s8091_s4 + $0x90] sm:$0xff] %v2917_v50  ;;  %v1668_v13 = vsub.f32 1.0, %v1667_v28  ;;  %v1967_v11 = vmul.f32 %v6800_v60, %v6719_v34  ;;  %vm1971_vm11 = vweird.f32 %v6719_v34  ;;  %vm7349_vm14 = vmor %vm1671_vm9, %vm1672_vm10 }
 0x1fa   :  { %2781 = vperm.xlu0 %3422, %v1964_v15   ;;  %3087 = vst.msk [vmem:[%s8091_s4 + $0x98] sm:$0xff] %vm3068_vm0, %v2918_v17  ;;  %vm7327_vm12 = vcmp.eq.f32.partialorder %v1675_v59, 8.507059e+37  ;;  %v1678_v40 = vor.u32 1.1754944e-38, %v1677_v43  ;;  %vm1972_vm13 = vweird.f32 %v6800_v60  ;;  %v1975_v36 = vand.u32 2147483647, %v6719_v34  ;;  %v2459_v59 = vld [vmem:[%s8090_s3 + $0x4a0] sm:$0xff] }
 0x1fb   :  { %v7333_v46 = vpop.eup %3759  ;;  %v1669_v47 = vmul.f32 %v7039_v4, %v1668_v13  ;;  %v1968_v16 = vsub.f32 1.0, %v1967_v11  ;;  %v1977_v45 = vand.u32 2147483648, %v6719_v34  ;;  %v2267_v48 = vmul.f32 %v6810_v10, %v6735_v61  ;;  %vm7377_vm4 = vmor %vm1971_vm11, %vm1972_vm13  ;;  %v7391_v56 = vpop.permute.xlu0 %2541  ;;  %v2373_v43 = vld [vmem:[%s8090_s3 + $0x1f0] sm:$0xff]  ;;  %v2336_v11 = vld [vmem:[%s8090_s3 + $0xc8] sm:$0xff] }
 0x1fc   :  { %vm7353_vm15 = vcmp.eq.f32.partialorder %v1975_v36, 8.507059e+37  ;;  %vm2271_vm2 = vweird.f32 %v6735_v61  ;;  %vm2272_vm3 = vweird.f32 %v6810_v10  ;;  %v2275_v1 = vand.u32 2147483647, %v6735_v61  ;;  %v7424_v50 = vpop.permute.xlu2 %2656  ;;  %v2414_v36 = vld [vmem:[%s8090_s3 + $0x338] sm:$0xff] }
 0x1fd   :  { %v1670_v9 = vadd.f32 %v7039_v4, %v1669_v47  ;;  %v1969_v8 = vmul.f32 %v6800_v60, %v1968_v16  ;;  %v1978_v5 = vor.u32 1.1754944e-38, %v1977_v45  ;;  %v2268_v38 = vsub.f32 1.0, %v2267_v48  ;;  %vm7405_vm6 = vmor %vm2271_vm2, %vm2272_vm3 }
 0x1fe   :  { %vm7381_vm5 = vcmp.eq.f32.partialorder %v2275_v1, 8.507059e+37  ;;  %v2277_v53 = vand.u32 2147483648, %v6735_v61  ;;  %v3005_v26 = vmul.f32 %v7088_v57, %v2417_v27  ;;  %v3006_v12 = vmul.f32 %v7088_v57, %v2418_v41  ;;  %v2455_v57 = vld [vmem:[%s8090_s3 + $0x480] sm:$0xff] }
 0x1ff   :  { %v1674_v34 = vsel %vm7349_vm14, %v7039_v4, %v1670_v9  ;;  %v1970_v3 = vadd.f32 %v6800_v60, %v1969_v8  ;;  %v2269_v6 = vmul.f32 %v6810_v10, %v2268_v38  ;;  %v2919_v52 = vmul.f32 %v7090_v20, %v2331_v18 }
 0x200   :  { %v1679_v49 = vsel %vm7327_vm12, %v1678_v40, %v1674_v34  ;;  %v2278_v7 = vor.u32 1.1754944e-38, %v2277_v53  ;;  %3174 = vst [vmem:[%s8091_s4 + $0x350] sm:$0xff] %v3005_v26  ;;  %v2920_v4 = vmul.f32 %v7090_v20, %v2332_v54  ;;  %v2959_v42 = vmul.f32 %v7095_v23, %v2371_v29  ;;  %v2413_v40 = vld [vmem:[%s8090_s3 + $0x330] sm:$0xff]  ;;  %v7480_v27 = vpop.permute.xlu1 %2546  ;;  %v2339_v54 = vld [vmem:[%s8090_s3 + $0xe0] sm:$0xff]  ;;  %v2340_v53 = vld [vmem:[%s8090_s3 + $0xe8] sm:$0xff] }
 0x201   :  { %2686 = vperm.xlu2 %3424, %v1679_v49   ;;  %v1974_v21 = vsel %vm7377_vm4, %v6800_v60, %v1970_v3  ;;  %v2270_v61 = vadd.f32 %v6810_v10, %v2269_v6  ;;  %3175 = vst.msk [vmem:[%s8091_s4 + $0x358] sm:$0xff] %vm3068_vm0, %v3006_v12  ;;  %v2960_v32 = vmul.f32 %v7095_v23, %v2372_v39  ;;  %vm1986_vm7 = vweird.f32 %v7097_v37  ;;  %v2415_v26 = vld [vmem:[%s8090_s3 + $0x340] sm:$0xff]  ;;  %v2416_v6 = vld [vmem:[%s8090_s3 + $0x348] sm:$0xff] }
 0x202   :  { %v1979_v20 = vsel %vm7353_vm15, %v1978_v5, %v1974_v21  ;;  %3088 = vst [vmem:[%s8091_s4 + $0xa0] sm:$0xff] %v2919_v52  ;;  %v1982_v60 = vmul.f32 %v7189_v14, %v7097_v37  ;;  %vm1987_vm8 = vweird.f32 %v7189_v14  ;;  %v1990_v17 = vand.u32 2147483647, %v7097_v37  ;;  %v2464_v21 = vld [vmem:[%s8090_s3 + $0x4c8] sm:$0xff] }
 0x203   :  { %2786 = vperm.xlu1 %3423, %v1979_v20   ;;  %v2274_v23 = vsel %vm7405_vm6, %v6810_v10, %v2270_v61  ;;  %3089 = vst.msk [vmem:[%s8091_s4 + $0xa8] sm:$0xff] %vm3068_vm0, %v2920_v4  ;;  %v1992_v28 = vand.u32 2147483648, %v7097_v37  ;;  %v2282_v62 = vmul.f32 %v6943_v0, %v6857_v24  ;;  %vm2286_vm1 = vweird.f32 %v6857_v24  ;;  %v2460_v10 = vld [vmem:[%s8090_s3 + $0x4a8] sm:$0xff]  ;;  %v7486_v18 = vpop.permute.xlu0 %2646  ;;  %vm7492_vm11 = vmor %vm1986_vm7, %vm1987_vm8  ;;  %v2381_v20 = vld [vmem:[%s8090_s3 + $0x230] sm:$0xff] }
 0x204   :  { %v2279_v15 = vsel %vm7381_vm5, %v2278_v7, %v2274_v23  ;;  %3128 = vst [vmem:[%s8091_s4 + $0x1e0] sm:$0xff] %v2959_v42  ;;  %v1983_v13 = vsub.f32 1.0, %v1982_v60  ;;  %vm7460_vm9 = vcmp.eq.f32.partialorder %v1990_v17, 8.507059e+37  ;;  %vm2287_vm10 = vweird.f32 %v6943_v0  ;;  %v2762_v7 = vpop.permute.xlu2 %2761  ;;  %v2382_v23 = vld [vmem:[%s8090_s3 + $0x238] sm:$0xff]  ;;  %v2380_v37 = vld [vmem:[%s8090_s3 + $0x228] sm:$0xff] }
 0x205   :  { %2886 = vperm.xlu0 %3422, %v2279_v15   ;;  %3129 = vst.msk [vmem:[%s8091_s4 + $0x1e8] sm:$0xff] %vm3068_vm0, %v2960_v32  ;;  %v1993_v47 = vor.u32 1.1754944e-38, %v1992_v28  ;;  %v2283_v16 = vsub.f32 1.0, %v2282_v62  ;;  %v2290_v45 = vand.u32 2147483647, %v6857_v24  ;;  %v2292_v48 = vand.u32 2147483648, %v6857_v24  ;;  %vm7510_vm13 = vmor %vm2286_vm1, %vm2287_vm10 }
 0x206   :  { %v1984_v41 = vmul.f32 %v7189_v14, %v1983_v13  ;;  %v3047_v25 = vmul.f32 %v7174_v51, %v2459_v59  ;;  %v3048_v58 = vmul.f32 %v7174_v51, %v2460_v10  ;;  %v2961_v1 = vmul.f32 %v7176_v44, %v2373_v43  ;;  %v2457_v28 = vld [vmem:[%s8090_s3 + $0x490] sm:$0xff]  ;;  %v2458_v10 = vld [vmem:[%s8090_s3 + $0x498] sm:$0xff] }
 0x207   :  { %v2284_v8 = vmul.f32 %v6943_v0, %v2283_v16  ;;  %vm7497_vm12 = vcmp.eq.f32.partialorder %v2290_v45, 8.507059e+37  ;;  %v2293_v38 = vor.u32 1.1754944e-38, %v2292_v48  ;;  %v2962_v51 = vmul.f32 %v7176_v44, %v2374_v63  ;;  %v2423_v63 = vld [vmem:[%s8090_s3 + $0x380] sm:$0xff]  ;;  %v2338_v48 = vld [vmem:[%s8090_s3 + $0xd8] sm:$0xff] }
 0x208   :  { %v1985_v29 = vadd.f32 %v7189_v14, %v1984_v41  ;;  %3216 = vst [vmem:[%s8091_s4 + $0x4a0] sm:$0xff] %v3047_v25  ;;  %v3001_v44 = vmul.f32 %v7187_v19, %v2413_v40  ;;  %v3002_v33 = vmul.f32 %v7187_v19, %v2414_v36  ;;  %v2297_v22 = vmul.f32 %v7333_v46, %v7234_v55  ;;  %v2652_v60 = vpop.permute.xlu1 %2651  ;;  %v2424_v36 = vld [vmem:[%s8090_s3 + $0x388] sm:$0xff]  ;;  %v2377_v41 = vld [vmem:[%s8090_s3 + $0x210] sm:$0xff] }
 0x209   :  { %v2285_v24 = vadd.f32 %v6943_v0, %v2284_v8  ;;  %3217 = vst.msk [vmem:[%s8091_s4 + $0x4a8] sm:$0xff] %vm3068_vm0, %v3048_v58  ;;  %vm2301_vm14 = vweird.f32 %v7234_v55  ;;  %vm2302_vm15 = vweird.f32 %v7333_v46  ;;  %v2305_v19 = vand.u32 2147483647, %v7234_v55  ;;  %v2465_v8 = vld [vmem:[%s8090_s3 + $0x4d0] sm:$0xff] }
 0x20a   :  { %v1989_v12 = vsel %vm7492_vm11, %v7189_v14, %v1985_v29  ;;  %3130 = vst [vmem:[%s8091_s4 + $0x1f0] sm:$0xff] %v2961_v1  ;;  %v2298_v39 = vsub.f32 1.0, %v2297_v22  ;;  %v2307_v34 = vand.u32 2147483648, %v7234_v55  ;;  %v2927_v3 = vmul.f32 %v7303_v31, %v2339_v54  ;;  %vm7577_vm2 = vmor %vm2301_vm14, %vm2302_vm15  ;;  %v2378_v1 = vld [vmem:[%s8090_s3 + $0x218] sm:$0xff]  ;;  %v2379_v54 = vld [vmem:[%s8090_s3 + $0x220] sm:$0xff] }
 0x20b   :  { %v1994_v52 = vsel %vm7460_vm9, %v1993_v47, %v1989_v12  ;;  %v2289_v14 = vsel %vm7510_vm13, %v6943_v0, %v2285_v24  ;;  %3131 = vst.msk [vmem:[%s8091_s4 + $0x1f8] sm:$0xff] %vm3068_vm0, %v2962_v51  ;;  %v2928_v49 = vmul.f32 %v7303_v31, %v2340_v53  ;;  %v3003_v42 = vmul.f32 %v7280_v35, %v2415_v26  ;;  %v2456_v31 = vld [vmem:[%s8090_s3 + $0x488] sm:$0xff]  ;;  %v2752_v43 = vpop.permute.xlu0 %2751  ;;  %v2337_v47 = vld [vmem:[%s8090_s3 + $0xd0] sm:$0xff]  ;;  %v2346_v12 = vld [vmem:[%s8090_s3 + $0x118] sm:$0xff] }
 0x20c   :  { %2791 = vperm.xlu2 %3424, %v1994_v52   ;;  %v2294_v4 = vsel %vm7497_vm12, %v2293_v38, %v2289_v14  ;;  %3170 = vst [vmem:[%s8091_s4 + $0x330] sm:$0xff] %v3001_v44  ;;  %v2299_v0 = vmul.f32 %v7333_v46, %v2298_v39  ;;  %v2308_v61 = vor.u32 1.1754944e-38, %v2307_v34  ;;  %v3004_v32 = vmul.f32 %v7280_v35, %v2416_v6  ;;  %v2466_v38 = vld [vmem:[%s8090_s3 + $0x4d8] sm:$0xff]  ;;  %v2420_v22 = vld [vmem:[%s8090_s3 + $0x368] sm:$0xff]  ;;  %v2345_v24 = vld [vmem:[%s8090_s3 + $0x110] sm:$0xff] }
 0x20d   :  { %2891 = vperm.xlu1 %3423, %v2294_v4   ;;  %3171 = vst.msk [vmem:[%s8091_s4 + $0x338] sm:$0xff] %vm3068_vm0, %v3002_v33  ;;  %vm2306_vm3 = vcmp.eq.f32.partialorder %v2305_v19, 8.507059e+37  ;;  %v3043_v55 = vmul.f32 %v7292_v30, %v2455_v57  ;;  %v3044_v35 = vmul.f32 %v7292_v30, %v2456_v31  ;;  %v2969_v59 = vmul.f32 %v7424_v50, %v2381_v20  ;;  %v2421_v34 = vld [vmem:[%s8090_s3 + $0x370] sm:$0xff]  ;;  %v2422_v52 = vld [vmem:[%s8090_s3 + $0x378] sm:$0xff]  ;;  %v2387_v20 = vld [vmem:[%s8090_s3 + $0x260] sm:$0xff] }
 0x20e   :  { %v2300_v17 = vadd.f32 %v7333_v46, %v2299_v0  ;;  %3096 = vst [vmem:[%s8091_s4 + $0xe0] sm:$0xff] %v2927_v3  ;;  %v2970_v15 = vmul.f32 %v7424_v50, %v2382_v23  ;;  %v3045_v13 = vmul.f32 %v7371_v2, %v2457_v28  ;;  %v3046_v50 = vmul.f32 %v7371_v2, %v2458_v10  ;;  %v2342_v23 = vld [vmem:[%s8090_s3 + $0xf8] sm:$0xff]  ;;  %v2343_v28 = vld [vmem:[%s8090_s3 + $0x100] sm:$0xff] }
 0x20f   :  { %3097 = vst.msk [vmem:[%s8091_s4 + $0xe8] sm:$0xff] %vm3068_vm0, %v2928_v49  ;;  %v2924_v2 = vmul.f32 %v7391_v56, %v2336_v11  ;;  %v3011_v45 = vmul.f32 %v2762_v7, %v2423_v63  ;;  %v2925_v58 = vmul.f32 %v7480_v27, %v2337_v47  ;;  %v2926_v9 = vmul.f32 %v7480_v27, %v2338_v48  ;;  %v2461_v49 = vld [vmem:[%s8090_s3 + $0x4b0] sm:$0xff]  ;;  %v2384_v11 = vld [vmem:[%s8090_s3 + $0x248] sm:$0xff] }
 0x210   :  { %v2304_v62 = vsel %vm7577_vm2, %v7333_v46, %v2300_v17  ;;  %3172 = vst [vmem:[%s8091_s4 + $0x340] sm:$0xff] %v3003_v42  ;;  %v2335_v46 = vld [vmem:[%s8090_s3 + $0xc0] sm:$0xff]  ;;  %v2757_v25 = vpop.permute.xlu1 %2756  ;;  %v2965_v5 = vmul.f32 %v7486_v18, %v2377_v41  ;;  %v2966_v27 = vmul.f32 %v7486_v18, %v2378_v1  ;;  %v2967_v33 = vmul.f32 %v2652_v60, %v2379_v54  ;;  %v2429_v47 = vld [vmem:[%s8090_s3 + $0x3b0] sm:$0xff]  ;;  %v2472_v54 = vld [vmem:[%s8090_s3 + $0x508] sm:$0xff] }
 0x211   :  { %v2309_v30 = vsel %vm2306_vm3, %v2308_v61, %v2304_v62  ;;  %3173 = vst.msk [vmem:[%s8091_s4 + $0x348] sm:$0xff] %vm3068_vm0, %v3004_v32  ;;  %v2923_v40 = vmul.f32 %v7391_v56, %v2335_v46  ;;  %v2867_v16 = vpop.permute.xlu2 %2866  ;;  %v3012_v56 = vmul.f32 %v2762_v7, %v2424_v36  ;;  %v2419_v18 = vld [vmem:[%s8090_s3 + $0x360] sm:$0xff]  ;;  %v2968_v53 = vmul.f32 %v2652_v60, %v2380_v37  ;;  %v2462_v7 = vld [vmem:[%s8090_s3 + $0x4b8] sm:$0xff]  ;;  %v2388_v60 = vld [vmem:[%s8090_s3 + $0x268] sm:$0xff] }
 0x212   :  { %3212 = vst [vmem:[%s8091_s4 + $0x480] sm:$0xff] %v3043_v55  ;;  %v3053_v29 = vmul.f32 %v2867_v16, %v2465_v8  ;;  %v3054_v44 = vmul.f32 %v2867_v16, %v2466_v38  ;;  %v3007_v26 = vmul.f32 %v2752_v43, %v2419_v18  ;;  %v3008_v39 = vmul.f32 %v2752_v43, %v2420_v22  ;;  %v2463_v42 = vld [vmem:[%s8090_s3 + $0x4c0] sm:$0xff]  ;;  %v2341_v55 = vld [vmem:[%s8090_s3 + $0xf0] sm:$0xff]  ;;  %v2430_v16 = vld [vmem:[%s8090_s3 + $0x3b8] sm:$0xff] }
 0x213   :  { %3213 = vst.msk [vmem:[%s8091_s4 + $0x488] sm:$0xff] %vm3068_vm0, %v3044_v35  ;;  %v2857_v51 = vpop.permute.xlu0 %2856  ;;  %v3009_v57 = vmul.f32 %v2757_v25, %v2421_v34  ;;  %v3010_v0 = vmul.f32 %v2757_v25, %v2422_v52  ;;  %v2383_v46 = vld [vmem:[%s8090_s3 + $0x240] sm:$0xff]  ;;  %v2426_v8 = vld [vmem:[%s8090_s3 + $0x398] sm:$0xff] }
 0x214   :  { %2896 = vperm.xlu2 %3424, %v2309_v30   ;;  %3138 = vst [vmem:[%s8091_s4 + $0x230] sm:$0xff] %v2969_v59  ;;  %v3049_v31 = vmul.f32 %v2857_v51, %v2461_v49  ;;  %v3050_v61 = vmul.f32 %v2857_v51, %v2462_v7  ;;  %v2344_v30 = vld [vmem:[%s8090_s3 + $0x108] sm:$0xff]  ;;  %v2427_v37 = vld [vmem:[%s8090_s3 + $0x3a0] sm:$0xff]  ;;  %v2470_v49 = vld [vmem:[%s8090_s3 + $0x4f8] sm:$0xff] }
 0x215   :  { %3139 = vst.msk [vmem:[%s8091_s4 + $0x238] sm:$0xff] %vm3068_vm0, %v2970_v15 }
 0x216   :  { %3214 = vst [vmem:[%s8091_s4 + $0x490] sm:$0xff] %v3045_v13 }
 0x217   :  { %3215 = vst.msk [vmem:[%s8091_s4 + $0x498] sm:$0xff] %vm3068_vm0, %v3046_v50 }
 0x218   :  { %3092 = vst [vmem:[%s8091_s4 + $0xc0] sm:$0xff] %v2923_v40 }
 0x219   :  { %3093 = vst.msk [vmem:[%s8091_s4 + $0xc8] sm:$0xff] %vm3068_vm0, %v2924_v2  ;;  %v2385_v2 = vld [vmem:[%s8090_s3 + $0x250] sm:$0xff] }
 0x21a   :  { %3180 = vst [vmem:[%s8091_s4 + $0x380] sm:$0xff] %v3011_v45  ;;  %v2386_v45 = vld [vmem:[%s8090_s3 + $0x258] sm:$0xff] }
 0x21b   :  { %3181 = vst.msk [vmem:[%s8091_s4 + $0x388] sm:$0xff] %vm3068_vm0, %v3012_v56 }
 0x21c   :  { %3094 = vst [vmem:[%s8091_s4 + $0xd0] sm:$0xff] %v2925_v58 }
 0x21d   :  { %3095 = vst.msk [vmem:[%s8091_s4 + $0xd8] sm:$0xff] %vm3068_vm0, %v2926_v9  ;;  %v2862_v3 = vpop.permute.xlu1 %2861  ;;  %v2425_v9 = vld [vmem:[%s8090_s3 + $0x390] sm:$0xff] }
 0x21e   :  { %3134 = vst [vmem:[%s8091_s4 + $0x210] sm:$0xff] %v2965_v5  ;;  %v3051_v32 = vmul.f32 %v2862_v3, %v2463_v42  ;;  %v3052_v17 = vmul.f32 %v2862_v3, %v2464_v21  ;;  %v2351_v3 = vld [vmem:[%s8090_s3 + $0x140] sm:$0xff]  ;;  %v2348_v21 = vld [vmem:[%s8090_s3 + $0x128] sm:$0xff] }
 0x21f   :  { %3135 = vst.msk [vmem:[%s8091_s4 + $0x218] sm:$0xff] %vm3068_vm0, %v2966_v27  ;;  %v2567_v19 = vpop.permute.xlu2 %2566  ;;  %v2471_v27 = vld [vmem:[%s8090_s3 + $0x500] sm:$0xff] }
 0x220   :  { %3222 = vst [vmem:[%s8091_s4 + $0x4d0] sm:$0xff] %v3053_v29  ;;  %v2933_v6 = vmul.f32 %v2567_v19, %v2345_v24  ;;  %v2934_v14 = vmul.f32 %v2567_v19, %v2346_v12  ;;  %v2557_v4 = vpop.permute.xlu0 %2556  ;;  %v2467_v19 = vld [vmem:[%s8090_s3 + $0x4e0] sm:$0xff] }
 0x221   :  { %3223 = vst.msk [vmem:[%s8091_s4 + $0x4d8] sm:$0xff] %vm3068_vm0, %v3054_v44  ;;  %v2929_v43 = vmul.f32 %v2557_v4, %v2341_v55  ;;  %v2930_v15 = vmul.f32 %v2557_v4, %v2342_v23  ;;  %v2428_v44 = vld [vmem:[%s8090_s3 + $0x3a8] sm:$0xff] }
 0x222   :  { %3136 = vst [vmem:[%s8091_s4 + $0x220] sm:$0xff] %v2967_v33 }
 0x223   :  { %3137 = vst.msk [vmem:[%s8091_s4 + $0x228] sm:$0xff] %vm3068_vm0, %v2968_v53 }
 0x224   :  { %3176 = vst [vmem:[%s8091_s4 + $0x360] sm:$0xff] %v3007_v26  ;;  %v2468_v26 = vld [vmem:[%s8090_s3 + $0x4e8] sm:$0xff] }
 0x225   :  { %3177 = vst.msk [vmem:[%s8091_s4 + $0x368] sm:$0xff] %vm3068_vm0, %v3008_v39 }
 0x226   :  { %3102 = vst [vmem:[%s8091_s4 + $0x110] sm:$0xff] %v2933_v6  ;;  %v2352_v6 = vld [vmem:[%s8090_s3 + $0x148] sm:$0xff] }
 0x227   :  { %3103 = vst.msk [vmem:[%s8091_s4 + $0x118] sm:$0xff] %vm3068_vm0, %v2934_v14  ;;  %v2469_v14 = vld [vmem:[%s8090_s3 + $0x4f0] sm:$0xff] }
 0x228   :  { %3178 = vst [vmem:[%s8091_s4 + $0x370] sm:$0xff] %v3009_v57 }
 0x229   :  { %3179 = vst.msk [vmem:[%s8091_s4 + $0x378] sm:$0xff] %vm3068_vm0, %v3010_v0 }
 0x22a   :  { %3218 = vst [vmem:[%s8091_s4 + $0x4b0] sm:$0xff] %v3049_v31  ;;  %v2347_v31 = vld [vmem:[%s8090_s3 + $0x120] sm:$0xff] }
 0x22b   :  { %3219 = vst.msk [vmem:[%s8091_s4 + $0x4b8] sm:$0xff] %vm3068_vm0, %v3050_v61  ;;  %v2672_v35 = vpop.permute.xlu2 %2671  ;;  %v2562_v62 = vpop.permute.xlu1 %2561 }
 0x22c   :  { %v2975_v59 = vmul.f32 %v2672_v35, %v2387_v20  ;;  %v2976_v10 = vmul.f32 %v2672_v35, %v2388_v60  ;;  %3220 = vst [vmem:[%s8091_s4 + $0x4c0] sm:$0xff] %v3051_v32  ;;  %v2931_v13 = vmul.f32 %v2562_v62, %v2343_v28  ;;  %v2932_v63 = vmul.f32 %v2562_v62, %v2344_v30  ;;  %v2393_v60 = vld [vmem:[%s8090_s3 + $0x290] sm:$0xff]  ;;  %v2350_v62 = vld [vmem:[%s8090_s3 + $0x138] sm:$0xff] }
 0x22d   :  { %3221 = vst.msk [vmem:[%s8091_s4 + $0x4c8] sm:$0xff] %vm3068_vm0, %v3052_v17  ;;  %v2394_v17 = vld [vmem:[%s8090_s3 + $0x298] sm:$0xff]  ;;  %v2349_v28 = vld [vmem:[%s8090_s3 + $0x130] sm:$0xff] }
 0x22e   :  { %3144 = vst [vmem:[%s8091_s4 + $0x260] sm:$0xff] %v2975_v59  ;;  %v2662_v50 = vpop.permute.xlu0 %2661  ;;  %v2389_v30 = vld [vmem:[%s8090_s3 + $0x270] sm:$0xff] }
 0x22f   :  { %3145 = vst.msk [vmem:[%s8091_s4 + $0x268] sm:$0xff] %vm3068_vm0, %v2976_v10  ;;  %v2971_v40 = vmul.f32 %v2662_v50, %v2383_v46  ;;  %v2972_v36 = vmul.f32 %v2662_v50, %v2384_v11  ;;  %v2435_v50 = vld [vmem:[%s8090_s3 + $0x3e0] sm:$0xff] }
 0x230   :  { %3098 = vst [vmem:[%s8091_s4 + $0xf0] sm:$0xff] %v2929_v43 }
 0x231   :  { %3099 = vst.msk [vmem:[%s8091_s4 + $0xf8] sm:$0xff] %vm3068_vm0, %v2930_v15  ;;  %v2390_v15 = vld [vmem:[%s8090_s3 + $0x278] sm:$0xff] }
 0x232   :  { %3100 = vst [vmem:[%s8091_s4 + $0x100] sm:$0xff] %v2931_v13 }
 0x233   :  { %3101 = vst.msk [vmem:[%s8091_s4 + $0x108] sm:$0xff] %vm3068_vm0, %v2932_v63  ;;  %v2436_v63 = vld [vmem:[%s8090_s3 + $0x3e8] sm:$0xff] }
 0x234   :  { %3140 = vst [vmem:[%s8091_s4 + $0x240] sm:$0xff] %v2971_v40 }
 0x235   :  { %3141 = vst.msk [vmem:[%s8091_s4 + $0x248] sm:$0xff] %vm3068_vm0, %v2972_v36 }
 0x238   :  { %v2667_v48 = vpop.permute.xlu1 %2666 }
 0x239   :  { %v2777_v56 = vpop.permute.xlu2 %2776  ;;  %v2973_v41 = vmul.f32 %v2667_v48, %v2385_v2  ;;  %v2974_v1 = vmul.f32 %v2667_v48, %v2386_v45  ;;  %v2431_v48 = vld [vmem:[%s8090_s3 + $0x3c0] sm:$0xff] }
 0x23a   :  { %v3017_v25 = vmul.f32 %v2777_v56, %v2429_v47  ;;  %v3018_v58 = vmul.f32 %v2777_v56, %v2430_v16  ;;  %v2391_v47 = vld [vmem:[%s8090_s3 + $0x280] sm:$0xff]  ;;  %v2392_v16 = vld [vmem:[%s8090_s3 + $0x288] sm:$0xff] }
 0x23b   :  { %3142 = vst [vmem:[%s8091_s4 + $0x250] sm:$0xff] %v2973_v41  ;;  %v2432_v56 = vld [vmem:[%s8090_s3 + $0x3c8] sm:$0xff] }
 0x23c   :  { %3186 = vst [vmem:[%s8091_s4 + $0x3b0] sm:$0xff] %v3017_v25  ;;  %v2767_v5 = vpop.permute.xlu0 %2766 }
 0x23d   :  { %3187 = vst.msk [vmem:[%s8091_s4 + $0x3b8] sm:$0xff] %vm3068_vm0, %v3018_v58  ;;  %v3013_v38 = vmul.f32 %v2767_v5, %v2425_v9  ;;  %v3014_v51 = vmul.f32 %v2767_v5, %v2426_v8  ;;  %v2477_v58 = vld [vmem:[%s8090_s3 + $0x530] sm:$0xff] }
 0x23e   :  { %3143 = vst.msk [vmem:[%s8091_s4 + $0x258] sm:$0xff] %vm3068_vm0, %v2974_v1  ;;  %v2478_v1 = vld [vmem:[%s8090_s3 + $0x538] sm:$0xff] }
 0x23f   :  { %3182 = vst [vmem:[%s8091_s4 + $0x390] sm:$0xff] %v3013_v38 }
 0x240   :  { %3183 = vst.msk [vmem:[%s8091_s4 + $0x398] sm:$0xff] %vm3068_vm0, %v3014_v51 }
 0x244   :  { %v2882_v29 = vpop.permute.xlu2 %2881 }
 0x245   :  { %v3059_v18 = vmul.f32 %v2882_v29, %v2471_v27  ;;  %v3060_v33 = vmul.f32 %v2882_v29, %v2472_v54  ;;  %v2433_v54 = vld [vmem:[%s8090_s3 + $0x3d0] sm:$0xff]  ;;  %v2434_v29 = vld [vmem:[%s8090_s3 + $0x3d8] sm:$0xff] }
 0x246   :  { %v2772_v22 = vpop.permute.xlu1 %2771 }
 0x247   :  { %3228 = vst [vmem:[%s8091_s4 + $0x500] sm:$0xff] %v3059_v18  ;;  %v3015_v53 = vmul.f32 %v2772_v22, %v2427_v37  ;;  %v3016_v24 = vmul.f32 %v2772_v22, %v2428_v44  ;;  %v2473_v44 = vld [vmem:[%s8090_s3 + $0x510] sm:$0xff]  ;;  %v2474_v18 = vld [vmem:[%s8090_s3 + $0x518] sm:$0xff] }
 0x248   :  { %3229 = vst.msk [vmem:[%s8091_s4 + $0x508] sm:$0xff] %vm3068_vm0, %v3060_v33 }
 0x249   :  { %3184 = vst [vmem:[%s8091_s4 + $0x3a0] sm:$0xff] %v3015_v53  ;;  %v2872_v12 = vpop.permute.xlu0 %2871 }
 0x24a   :  { %3185 = vst.msk [vmem:[%s8091_s4 + $0x3a8] sm:$0xff] %vm3068_vm0, %v3016_v24  ;;  %v3055_v39 = vmul.f32 %v2872_v12, %v2467_v19  ;;  %v3056_v34 = vmul.f32 %v2872_v12, %v2468_v26  ;;  %v2475_v26 = vld [vmem:[%s8090_s3 + $0x520] sm:$0xff]  ;;  %v2476_v12 = vld [vmem:[%s8090_s3 + $0x528] sm:$0xff] }
 0x24c   :  { %3224 = vst [vmem:[%s8091_s4 + $0x4e0] sm:$0xff] %v3055_v39 }
 0x24d   :  { %3225 = vst.msk [vmem:[%s8091_s4 + $0x4e8] sm:$0xff] %vm3068_vm0, %v3056_v34 }
 0x250   :  { %v2582_v52 = vpop.permute.xlu2 %2581 }
 0x251   :  { %v2939_v57 = vmul.f32 %v2582_v52, %v2351_v3  ;;  %v2940_v7 = vmul.f32 %v2582_v52, %v2352_v6 }
 0x252   :  { %v2877_v4 = vpop.permute.xlu1 %2876 }
 0x253   :  { %3108 = vst [vmem:[%s8091_s4 + $0x140] sm:$0xff] %v2939_v57  ;;  %v3057_v0 = vmul.f32 %v2877_v4, %v2469_v14  ;;  %v3058_v42 = vmul.f32 %v2877_v4, %v2470_v49 }
 0x254   :  { %3109 = vst.msk [vmem:[%s8091_s4 + $0x148] sm:$0xff] %vm3068_vm0, %v2940_v7 }
 0x255   :  { %3226 = vst [vmem:[%s8091_s4 + $0x4f0] sm:$0xff] %v3057_v0  ;;  %v2572_v61 = vpop.permute.xlu0 %2571 }
 0x256   :  { %3227 = vst.msk [vmem:[%s8091_s4 + $0x4f8] sm:$0xff] %vm3068_vm0, %v3058_v42  ;;  %v2935_v32 = vmul.f32 %v2572_v61, %v2347_v31  ;;  %v2936_v20 = vmul.f32 %v2572_v61, %v2348_v21 }
 0x258   :  { %3104 = vst [vmem:[%s8091_s4 + $0x120] sm:$0xff] %v2935_v32 }
 0x259   :  { %3105 = vst.msk [vmem:[%s8091_s4 + $0x128] sm:$0xff] %vm3068_vm0, %v2936_v20 }
 0x25b   :  { %v2687_v55 = vpop.permute.xlu2 %2686 }
 0x25c   :  { %v2981_v23 = vmul.f32 %v2687_v55, %v2393_v60  ;;  %v2982_v35 = vmul.f32 %v2687_v55, %v2394_v17 }
 0x25e   :  { %3150 = vst [vmem:[%s8091_s4 + $0x290] sm:$0xff] %v2981_v23  ;;  %v2577_v59 = vpop.permute.xlu1 %2576 }
 0x25f   :  { %3151 = vst.msk [vmem:[%s8091_s4 + $0x298] sm:$0xff] %vm3068_vm0, %v2982_v35  ;;  %v2937_v10 = vmul.f32 %v2577_v59, %v2349_v28  ;;  %v2938_v43 = vmul.f32 %v2577_v59, %v2350_v62 }
 0x261   :  { %3106 = vst [vmem:[%s8091_s4 + $0x130] sm:$0xff] %v2937_v10  ;;  %v2677_v46 = vpop.permute.xlu0 %2676 }
 0x262   :  { %3107 = vst.msk [vmem:[%s8091_s4 + $0x138] sm:$0xff] %vm3068_vm0, %v2938_v43  ;;  %v2977_v13 = vmul.f32 %v2677_v46, %v2389_v30  ;;  %v2978_v11 = vmul.f32 %v2677_v46, %v2390_v15 }
 0x264   :  { %3146 = vst [vmem:[%s8091_s4 + $0x270] sm:$0xff] %v2977_v13 }
 0x265   :  { %3147 = vst.msk [vmem:[%s8091_s4 + $0x278] sm:$0xff] %vm3068_vm0, %v2978_v11 }
 0x266   :  { %v2792_v40 = vpop.permute.xlu2 %2791 }
 0x267   :  { %v3023_v36 = vmul.f32 %v2792_v40, %v2435_v50  ;;  %v3024_v2 = vmul.f32 %v2792_v40, %v2436_v63 }
 0x269   :  { %3192 = vst [vmem:[%s8091_s4 + $0x3e0] sm:$0xff] %v3023_v36 }
 0x26a   :  { %3193 = vst.msk [vmem:[%s8091_s4 + $0x3e8] sm:$0xff] %vm3068_vm0, %v3024_v2  ;;  %v2682_v45 = vpop.permute.xlu1 %2681 }
 0x26b   :  { %v2979_v41 = vmul.f32 %v2682_v45, %v2391_v47  ;;  %v2980_v25 = vmul.f32 %v2682_v45, %v2392_v16 }
 0x26c   :  { %v2782_v9 = vpop.permute.xlu0 %2781 }
 0x26d   :  { %3148 = vst [vmem:[%s8091_s4 + $0x280] sm:$0xff] %v2979_v41  ;;  %v3019_v8 = vmul.f32 %v2782_v9, %v2431_v48  ;;  %v3020_v5 = vmul.f32 %v2782_v9, %v2432_v56 }
 0x26e   :  { %v2897_v38 = vpop.permute.xlu2 %2896  ;;  %3149 = vst.msk [vmem:[%s8091_s4 + $0x288] sm:$0xff] %vm3068_vm0, %v2980_v25 }
 0x26f   :  { %v3065_v51 = vmul.f32 %v2897_v38, %v2477_v58  ;;  %v3066_v27 = vmul.f32 %v2897_v38, %v2478_v1  ;;  %3188 = vst [vmem:[%s8091_s4 + $0x3c0] sm:$0xff] %v3019_v8 }
 0x270   :  { %3189 = vst.msk [vmem:[%s8091_s4 + $0x3c8] sm:$0xff] %vm3068_vm0, %v3020_v5 }
 0x271   :  { %3234 = vst [vmem:[%s8091_s4 + $0x530] sm:$0xff] %v3065_v51 }
 0x272   :  { %3235 = vst.msk [vmem:[%s8091_s4 + $0x538] sm:$0xff] %vm3068_vm0, %v3066_v27 }
 0x275   :  { %v2787_v37 = vpop.permute.xlu1 %2786 }
 0x276   :  { %v3021_v33 = vmul.f32 %v2787_v37, %v2433_v54  ;;  %v3022_v22 = vmul.f32 %v2787_v37, %v2434_v29 }
 0x277   :  { %v2887_v53 = vpop.permute.xlu0 %2886 }
 0x278   :  { %3190 = vst [vmem:[%s8091_s4 + $0x3d0] sm:$0xff] %v3021_v33  ;;  %v3061_v24 = vmul.f32 %v2887_v53, %v2473_v44  ;;  %v3062_v19 = vmul.f32 %v2887_v53, %v2474_v18 }
 0x279   :  { %3191 = vst.msk [vmem:[%s8091_s4 + $0x3d8] sm:$0xff] %vm3068_vm0, %v3022_v22 }
 0x27a   :  { %3230 = vst [vmem:[%s8091_s4 + $0x510] sm:$0xff] %v3061_v24 }
 0x27b   :  { %3231 = vst.msk [vmem:[%s8091_s4 + $0x518] sm:$0xff] %vm3068_vm0, %v3062_v19 }
 0x27f   :  { %v2892_v39 = vpop.permute.xlu1 %2891 }
 0x280   :  { %v3063_v34 = vmul.f32 %v2892_v39, %v2475_v26  ;;  %v3064_v3 = vmul.f32 %v2892_v39, %v2476_v12 }
 0x282   :  { %3232 = vst [vmem:[%s8091_s4 + $0x520] sm:$0xff] %v3063_v34 }
 0x283   :  { %3233 = vst.msk [vmem:[%s8091_s4 + $0x528] sm:$0xff] %vm3068_vm0, %v3064_v3 }

</bundles_post_ra>
